<compile_context>
chip_gen: v7x
topology: tpu7x:2x2x1
jax: 0.10.0
libtpu: 0.0.40
codegen_flags: <defaults>
</compile_context>

<pallas_src>
import jax
import jax.numpy as jnp
from jax.experimental import pallas as pl
from jax.experimental.pallas import tpu as pltpu

# ------------------------- scaled-down config -------------------------
BATCH = 2
IN_CH = 3
IMG = 32
PATCH = 16
GRID_HW = IMG // PATCH            # 2
NUM_PATCHES = GRID_HW * GRID_HW   # 4
TOKENS = NUM_PATCHES + 1          # cls + patches = 5
T_PAD = 8                         # tokens padded to a sublane multiple
EMBED = 128                       # scaled down from 768
DEPTH = 2                         # scaled down from 12
HEADS = 4
HEAD_DIM = EMBED // HEADS         # 32
HIDDEN = 4 * EMBED                # 512
LORA_R = 8                        # gamma
LORA_ALPHA = 16
LORA_SCALE = LORA_ALPHA / LORA_R  # 2.0
BVP_OUT = 32                      # scaled down from 256
LN_EPS_VIT = 1e-6
LN_EPS_GATE = 1e-5

B_CHUNK = 1                       # images per grid step (parallel axis; v7x megacore)
CHUNK_ROWS = B_CHUNK * T_PAD      # token rows per grid step
PRED_PAD = 128                    # lane-dense combined HR/SPO/RF output width
SIG_PAD = 128                     # lane-dense bvp output width (>= BVP_OUT)

assert BATCH % B_CHUNK == 0


# ------------------------- in-kernel helpers -------------------------
def _layernorm(y, gamma, beta, eps):
    mu = jnp.mean(y, axis=-1, keepdims=True)
    yc = y - mu
    var = jnp.mean(yc * yc, axis=-1, keepdims=True)
    return yc * jax.lax.rsqrt(var + eps) * gamma + beta


def _bf(x):
    return x.astype(jnp.bfloat16)


# ------------------------- kernel 1: patch embed + cls + pos (padded) ----
def _embed_kernel(p_ref, w_ref, b_ref, cls_ref, pos_ref, o_ref):
    # patches (B*NP, C*P*P) @ W (C*P*P, D) == the 16x16/16 conv as a matmul
    tok = jnp.dot(_bf(p_ref[...]), w_ref[...],
                  preferred_element_type=jnp.float32) + b_ref[...]
    pos = pos_ref[...]                         # (TOKENS, D) f32
    cls_row = cls_ref[...] + pos[0:1, :]       # (1, D)
    pos_tok = pos[1:TOKENS, :]                 # (NUM_PATCHES, D)
    # zero the slab once (covers the pad rows), then direct row-slice stores.
    o_ref[...] = jnp.zeros((BATCH * T_PAD, EMBED), jnp.float32)
    for b in range(BATCH):
        r = b * T_PAD
        o_ref[r:r + 1, :] = cls_row
        o_ref[r + 1:r + 1 + NUM_PATCHES, :] = (
            tok[b * NUM_PATCHES:(b + 1) * NUM_PATCHES, :] + pos_tok)


def embed_tokens(patches, params):
    return pl.pallas_call(
        _embed_kernel,
        out_shape=jax.ShapeDtypeStruct((BATCH * T_PAD, EMBED), jnp.float32),
    )(patches, params["patch_w"], params["patch_b"], params["cls"], params["pos"])


# ------------------------- kernel 2: all blocks fused over a depth grid ---
def _block_kernel(x_ref, ln1g_ref, ln1b_ref, qkvw_ref, qkvb_ref,
                  projw_ref, projb_ref, ln2g_ref, ln2b_ref,
                  fc1w_ref, fc1b_ref, fc2w_ref, fc2b_ref,
                  feat_ref, xs_ref, att_ref):
    d = pl.program_id(1)

    @pl.when(d == 0)
    def _init():                                 # load this batch-chunk's tokens
        xs_ref[...] = x_ref[...]

    x = xs_ref[...]                              # (CHUNK_ROWS, D) f32 carry

    # --- attention sub-block: pre-LN, fused qkv (LoRA already merged) ---
    h = _layernorm(x, ln1g_ref[0], ln1b_ref[0], LN_EPS_VIT)
    qkv = jnp.dot(_bf(h), qkvw_ref[0],
                  preferred_element_type=jnp.float32) + qkvb_ref[0]  # (rows, 3D) f32

    scale = HEAD_DIM ** -0.5
    # padded key rows (token index >= TOKENS) must never be attended to
    key_id = jax.lax.broadcasted_iota(jnp.int32, (T_PAD, T_PAD), 1)
    neg = jnp.where(key_id >= TOKENS, -1e30, 0.0).astype(jnp.float32)

    for bi in range(B_CHUNK):
        rows = qkv[bi * T_PAD:(bi + 1) * T_PAD, :]           # (T_PAD, 3D)
        for hd in range(HEADS):
            lo = hd * HEAD_DIM
            q = rows[:, lo:lo + HEAD_DIM]
            k = rows[:, EMBED + lo:EMBED + lo + HEAD_DIM]
            v = rows[:, 2 * EMBED + lo:2 * EMBED + lo + HEAD_DIM]
            s = jax.lax.dot_general(_bf(q), _bf(k), (((1,), (1,)), ((), ())),
                                    preferred_element_type=jnp.float32)
            s = s * scale + neg
            s = s - jnp.max(s, axis=-1, keepdims=True)
            p = jnp.exp(s)
            p = p * pl.reciprocal(jnp.sum(p, axis=-1, keepdims=True), approx=True)
            o = jnp.dot(_bf(p), _bf(v), preferred_element_type=jnp.float32)
            # direct store at the head's static lane offset (no concat chain)
            att_ref[bi * T_PAD:(bi + 1) * T_PAD, lo:lo + HEAD_DIM] = o

    att = att_ref[...]                                        # (rows, D) f32
    x = x + jnp.dot(_bf(att), projw_ref[0],
                    preferred_element_type=jnp.float32) + projb_ref[0]

    # --- MLP sub-block: pre-LN, fc1 + GELU, fc2 (LoRA merged) ---
    h2 = _layernorm(x, ln2g_ref[0], ln2b_ref[0], LN_EPS_VIT)
    f1 = jax.nn.gelu(jnp.dot(_bf(h2), fc1w_ref[0],
                             preferred_element_type=jnp.float32) + fc1b_ref[0],
                     approximate=True)
    f2 = jnp.dot(_bf(f1), fc2w_ref[0],
                 preferred_element_type=jnp.float32) + fc2b_ref[0]
    xn = x + f2

    xs_ref[...] = xn                                          # carry to block d+1
    feat_ref[0, :, :] = xn                                    # per-depth activation out


def vit_blocks_fused(x, p):
    M, D = x.shape                       # (BATCH*T_PAD, EMBED)
    n_b = BATCH // B_CHUNK

    def wspec(r, c):
        return pl.BlockSpec((1, r, c), lambda b, d: (d, 0, 0))

    grid_spec = pltpu.PrefetchScalarGridSpec(
        num_scalar_prefetch=0,
        grid=(n_b, DEPTH),
        in_specs=[
            pl.BlockSpec((CHUNK_ROWS, D), lambda b, d: (b, 0)),   # token slab
            wspec(1, D), wspec(1, D),                             # ln1 g, b
            wspec(D, 3 * D), wspec(1, 3 * D),                     # qkv w, b
            wspec(D, D), wspec(1, D),                             # proj w, b
            wspec(1, D), wspec(1, D),                             # ln2 g, b
            wspec(D, HIDDEN), wspec(1, HIDDEN),                   # fc1 w, b
            wspec(HIDDEN, D), wspec(1, D),                        # fc2 w, b
        ],
        out_specs=pl.BlockSpec((1, CHUNK_ROWS, D), lambda b, d: (d, b, 0)),
        scratch_shapes=[pltpu.VMEM((CHUNK_ROWS, D), jnp.float32),   # activation carry
                        pltpu.VMEM((CHUNK_ROWS, D), jnp.float32)],  # attention slab
    )
    return pl.pallas_call(
        _block_kernel,
        out_shape=jax.ShapeDtypeStruct((DEPTH, M, D), jnp.float32),
        grid_spec=grid_spec,
        compiler_params=pltpu.CompilerParams(
            dimension_semantics=("parallel", "arbitrary"),
            vmem_limit_bytes=32 * 1024 * 1024),
    )(x, p["ln1_g"], p["ln1_b"], p["qkv_w"], p["qkv_b"],
      p["proj_w"], p["proj_b"], p["ln2_g"], p["ln2_b"],
      p["fc1_w"], p["fc1_b"], p["fc2_w"], p["fc2_b"])


# ------------------------- kernel 3: fused pooling + gated heads ----------
def _head_kernel(x_ref, q_ref, fcg_ref, fcb_ref,
                 gw1_ref, gb1_ref, gg1_ref, gbe1_ref,
                 gw2_ref, gb2_ref, gg2_ref, gbe2_ref,
                 hw_ref, hb_ref, bw1_ref, bb1_ref, bw2_ref, bb2_ref,
                 sig_ref, pred_ref, em_ref, emhr_ref, emspo_ref, emrf_ref):
    inv = 1.0 / NUM_PATCHES
    x = x_ref[...]                                  # (B, T_PAD, D)
    q = q_ref[...]
    # global pool over the real patch tokens only (drop cls, ignore padding)
    em = jnp.sum(x[:, 1:TOKENS, :], axis=1) * inv
    em = _layernorm(em, fcg_ref[...], fcb_ref[...], LN_EPS_VIT)
    qf = jnp.sum(q[:, 1:TOKENS, :], axis=1) * inv
    qf = _layernorm(qf, fcg_ref[...], fcb_ref[...], LN_EPS_VIT)
    em_ref[...] = em

    # first gate layer for hr/spo/rf merged into one (D, 3D) matmul
    h1_all = jnp.dot(_bf(qf), gw1_ref[...],
                     preferred_element_type=jnp.float32) + gb1_ref[...]   # (B, 3D)

    em_out_refs = (emhr_ref, emspo_ref, emrf_ref)
    em_gated = []
    preds = []
    for i in range(3):   # hr, spo, rf gates (unrolled)
        h1 = h1_all[:, i * EMBED:(i + 1) * EMBED]
        h1 = jnp.maximum(_layernorm(h1, gg1_ref[i], gbe1_ref[i], LN_EPS_GATE), 0.0)
        h2 = jnp.dot(_bf(h1), gw2_ref[i],
                     preferred_element_type=jnp.float32) + gb2_ref[i]
        h2 = _layernorm(h2, gg2_ref[i], gbe2_ref[i], LN_EPS_GATE)
        em_t = (2.0 * jax.nn.sigmoid(h2)) * em      # dropout = identity (eval)
        em_gated.append(em_t)
        em_out_refs[i][...] = em_t
        # (D,1) regressor as a lane reduction; results combined lane-dense below
        preds.append(jnp.sum(em_t * hw_ref[i], axis=-1, keepdims=True) + hb_ref[i])

    pad = jnp.zeros((BATCH, PRED_PAD - 3), jnp.float32)
    pred_ref[...] = jnp.concatenate(preds + [pad], axis=-1)   # one 128-lane store

    # bvp MLP on em_hr (output padded to 128 lanes; sliced in wrapper)
    bh = jnp.maximum(jnp.dot(_bf(em_gated[0]), bw1_ref[...],
                             preferred_element_type=jnp.float32) + bb1_ref[...], 0.0)
    sig_ref[...] = jnp.dot(_bf(bh), bw2_ref[...],
                           preferred_element_type=jnp.float32) + bb2_ref[...]


def heads_fused(x_pad, q_pad, p):
    B, D = x_pad.shape[0], EMBED
    return pl.pallas_call(
        _head_kernel,
        out_shape=(
            jax.ShapeDtypeStruct((B, SIG_PAD), jnp.float32),   # Sig (padded)
            jax.ShapeDtypeStruct((B, PRED_PAD), jnp.float32),  # HR|SPO|RF (padded)
            jax.ShapeDtypeStruct((B, D), jnp.float32),         # em
            jax.ShapeDtypeStruct((B, D), jnp.float32),         # em_hr
            jax.ShapeDtypeStruct((B, D), jnp.float32),         # em_spo
            jax.ShapeDtypeStruct((B, D), jnp.float32),         # em_rf
        ),
    )(x_pad, q_pad, p["fc_norm_g"], p["fc_norm_b"],
      p["gate_w1"], p["gate_b1"], p["gate_g1"], p["gate_be1"],
      p["gate_w2"], p["gate_b2"], p["gate_g2"], p["gate_be2"],
      p["head_w"], p["head_b"],
      p["bvp_w1"], p["bvp_b1"], p["bvp_w2"], p["bvp_b2"])


# ------------------------- parameter init ---------------------------------
def init_params(seed=42):
    keys = iter(jax.random.split(jax.random.PRNGKey(seed), 128))

    def rnd(shape, s=0.02):
        return (s * jax.random.normal(next(keys), shape)).astype(jnp.float32)

    D, H3, HID, R = EMBED, 3 * EMBED, HIDDEN, LORA_R
    p = {
        "patch_w": rnd((IN_CH * PATCH * PATCH, D)),
        "patch_b": jnp.zeros((D,), jnp.float32),
        "cls": rnd((1, 1, D)),
        "pos": rnd((1, TOKENS, D)),
        "fc_norm_g": jnp.ones((D,), jnp.float32),
        "fc_norm_b": jnp.zeros((D,), jnp.float32),
        "bvp_w1": rnd((D, D)), "bvp_b1": jnp.zeros((D,), jnp.float32),
        "bvp_w2": rnd((D, BVP_OUT)), "bvp_b2": jnp.zeros((BVP_OUT,), jnp.float32),
    }
    blocks = []
    for _ in range(DEPTH):
        blocks.append(dict(
            ln1_g=jnp.ones((D,), jnp.float32), ln1_b=jnp.zeros((D,), jnp.float32),
            qkv_w=rnd((D, H3)), qkv_b=jnp.zeros((H3,), jnp.float32),
            qkv_a=rnd((D, R)), qkv_B=rnd((R, H3)),
            proj_w=rnd((D, D)), proj_b=jnp.zeros((D,), jnp.float32),
            ln2_g=jnp.ones((D,), jnp.float32), ln2_b=jnp.zeros((D,), jnp.float32),
            fc1_w=rnd((D, HID)), fc1_b=jnp.zeros((HID,), jnp.float32),
            fc1_a=rnd((D, R)), fc1_B=rnd((R, HID)),
            fc2_w=rnd((HID, D)), fc2_b=jnp.zeros((D,), jnp.float32),
            fc2_a=rnd((HID, R)), fc2_B=rnd((R, D)),
        ))
    p["blocks"] = blocks
    for t in ("hr", "spo", "rf"):
        p[f"{t}_w"] = rnd((D, 1))
        p[f"{t}_b"] = jnp.zeros((1,), jnp.float32)
        p[f"gate_{t}"] = dict(
            w1=rnd((D, D)), b1=jnp.zeros((D,), jnp.float32),
            g1=jnp.ones((D,), jnp.float32), be1=jnp.zeros((D,), jnp.float32),
            w2=rnd((D, D)), b2=jnp.zeros((D,), jnp.float32),
            g2=jnp.ones((D,), jnp.float32), be2=jnp.zeros((D,), jnp.float32),
        )
    return p


def prepare_params(p):
    """One-time inference prep: merge LoRA into base weights
    (x@W + b + s*(x@A)@B == x@(W + s*A@B) + b), cast matmul weights to bf16,
    stack per-block weights along a leading depth axis, merge the three gate
    first layers / regressor heads, and reshape 1-D vectors to (1, N) rows."""
    D = EMBED
    bf16 = jnp.bfloat16
    out = {
        "patch_w": p["patch_w"].astype(bf16),
        "patch_b": p["patch_b"].reshape(1, D),
        "cls": p["cls"].reshape(1, D),
        "pos": p["pos"].reshape(TOKENS, D),
        "fc_norm_g": p["fc_norm_g"].reshape(1, D),
        "fc_norm_b": p["fc_norm_b"].reshape(1, D),
        "bvp_w1": p["bvp_w1"].astype(bf16),
        "bvp_b1": p["bvp_b1"].reshape(1, D),
        "bvp_w2": jnp.pad(p["bvp_w2"], ((0, 0), (0, SIG_PAD - BVP_OUT))).astype(bf16),
        "bvp_b2": jnp.pad(p["bvp_b2"], (0, SIG_PAD - BVP_OUT)).reshape(1, SIG_PAD),
    }

    def merge_block(blk):
        return dict(
            ln1_g=blk["ln1_g"].reshape(1, D), ln1_b=blk["ln1_b"].reshape(1, D),
            qkv_w=(blk["qkv_w"] + LORA_SCALE * (blk["qkv_a"] @ blk["qkv_B"])).astype(bf16),
            qkv_b=blk["qkv_b"].reshape(1, 3 * D),
            proj_w=blk["proj_w"].astype(bf16),
            proj_b=blk["proj_b"].reshape(1, D),
            ln2_g=blk["ln2_g"].reshape(1, D), ln2_b=blk["ln2_b"].reshape(1, D),
            fc1_w=(blk["fc1_w"] + LORA_SCALE * (blk["fc1_a"] @ blk["fc1_B"])).astype(bf16),
            fc1_b=blk["fc1_b"].reshape(1, HIDDEN),
            fc2_w=(blk["fc2_w"] + LORA_SCALE * (blk["fc2_a"] @ blk["fc2_B"])).astype(bf16),
            fc2_b=blk["fc2_b"].reshape(1, D),
        )

    merged = [merge_block(b) for b in p["blocks"]]
    for k in merged[0]:
        out[k] = jnp.stack([m[k] for m in merged])     # (DEPTH, ...) stacks

    names = ("hr", "spo", "rf")
    out["gate_w1"] = jnp.concatenate(
        [p[f"gate_{n}"]["w1"] for n in names], axis=1).astype(bf16)        # (D, 3D)
    out["gate_b1"] = jnp.concatenate(
        [p[f"gate_{n}"]["b1"] for n in names]).reshape(1, 3 * D)
    stack = lambda key: jnp.stack([p[f"gate_{n}"][key] for n in names])
    out["gate_g1"] = stack("g1").reshape(3, 1, D)
    out["gate_be1"] = stack("be1").reshape(3, 1, D)
    out["gate_w2"] = stack("w2").astype(bf16)                              # (3, D, D)
    out["gate_b2"] = stack("b2").reshape(3, 1, D)
    out["gate_g2"] = stack("g2").reshape(3, 1, D)
    out["gate_be2"] = stack("be2").reshape(3, 1, D)
    out["head_w"] = jnp.stack([p[f"{n}_w"].reshape(1, D) for n in names])  # (3, 1, D)
    out["head_b"] = jnp.stack([p[f"{n}_b"] for n in names]).reshape(3, 1, 1)
    return out


# ------------------------- forward pass -------------------------
def forward(params, img):
    B, D = img.shape[0], EMBED

    # --- patchify (NCHW -> (B*NP, C*P*P)): pure layout glue in plain JAX ---
    x = img.reshape(B, IN_CH, GRID_HW, PATCH, GRID_HW, PATCH)
    x = x.transpose(0, 2, 4, 1, 3, 5).reshape(B * NUM_PATCHES, IN_CH * PATCH * PATCH)

    # --- fused patch-embed + cls + pos -> padded (B*T_PAD, D) token slab ---
    xp = embed_tokens(x, params)
    # pos_drop / patch_drop / norm_pre: identity (eval / default config)

    query_pad = xp                   # self.query(x) returns x (get_query = side effect)

    # --- all transformer blocks: one pallas_call, weights streamed over depth ---
    feat_all = vit_blocks_fused(xp, params)          # (DEPTH, B*T_PAD, D)
    x_final = feat_all[DEPTH - 1]

    feat = [xp.reshape(B, T_PAD, D)[:, :TOKENS, :]]
    for d in range(DEPTH):
        feat.append(feat_all[d].reshape(B, T_PAD, D)[:, :TOKENS, :])

    Sig_pad, preds, em, em_hr, em_spo, em_rf = heads_fused(
        x_final.reshape(B, T_PAD, D), query_pad.reshape(B, T_PAD, D), params)

    Sig = Sig_pad[:, :BVP_OUT]
    HR = preds[:, 0:1]
    SPO = preds[:, 1:2]
    RF = preds[:, 2:3]
    return Sig, HR, SPO, RF, feat, em_spo, [em, em_hr, em_spo, em_rf]


# ------------------------- main -------------------------
if __name__ == "__main__":
    params = prepare_params(init_params(seed=42))
    img = jax.random.normal(jax.random.PRNGKey(0),
                            (BATCH, IN_CH, IMG, IMG), dtype=jnp.float32)
    fwd = jax.jit(forward)
    out = fwd(params, img)
    jax.block_until_ready(out)
    Sig, HR, SPO, RF, feat, em_spo, ems = out
    assert Sig.shape == (BATCH, BVP_OUT)
    assert HR.shape == SPO.shape == RF.shape == (BATCH, 1)
    assert len(feat) == DEPTH + 1 and feat[0].shape == (BATCH, TOKENS, EMBED)
    assert em_spo.shape == (BATCH, EMBED) and len(ems) == 4
    for a in (Sig, HR, SPO, RF, em_spo):
        assert bool(jnp.all(jnp.isfinite(a)))
    print("KERNEL_OK")
</pallas_src>

<mosaic_0001>
module attributes {stable_mosaic.version = 11 : i64} {
  func.func @_embed_kernel(%arg0: memref<8x768xf32, #tpu.memory_space<vmem>>, %arg1: memref<768x128xbf16, #tpu.memory_space<vmem>>, %arg2: memref<1x128xf32, #tpu.memory_space<vmem>>, %arg3: memref<1x128xf32, #tpu.memory_space<vmem>>, %arg4: memref<5x128xf32, #tpu.memory_space<vmem>>, %arg5: memref<16x128xf32, #tpu.memory_space<vmem>>) attributes {dimension_semantics = [], scalar_prefetch = 0 : i64, scratch_operands = 0 : i64, tpu.core_type = #tpu.core_type<tc>} {
    %c0 = arith.constant 0 : index
    %c0_0 = arith.constant 0 : index
    %0 = vector.load %arg0[%c0, %c0_0] : memref<8x768xf32, #tpu.memory_space<vmem>>, vector<8x768xf32>
    %1 = arith.truncf %0 : vector<8x768xf32> to vector<8x768xbf16>
    %c0_1 = arith.constant 0 : index
    %c0_2 = arith.constant 0 : index
    %2 = vector.load %arg1[%c0_1, %c0_2] : memref<768x128xbf16, #tpu.memory_space<vmem>>, vector<768x128xbf16>
    %cst = arith.constant dense<0.000000e+00> : vector<8x128xf32>
    %3 = tpu.matmul %1, %2, %cst {dimension_numbers = #tpu.dot_dimension_numbers<[1], [0], [0], [1], [0, 0, 1, 1], [], []>} : vector<8x768xbf16>, vector<768x128xbf16>, vector<8x128xf32> -> vector<8x128xf32>
    %c0_3 = arith.constant 0 : index
    %c0_4 = arith.constant 0 : index
    %4 = vector.load %arg2[%c0_3, %c0_4] : memref<1x128xf32, #tpu.memory_space<vmem>>, vector<1x128xf32>
    %5 = vector.broadcast %4 : vector<1x128xf32> to vector<8x128xf32>
    %6 = arith.addf %3, %5 : vector<8x128xf32>
    %c0_5 = arith.constant 0 : index
    %c0_6 = arith.constant 0 : index
    %7 = vector.load %arg4[%c0_5, %c0_6] : memref<5x128xf32, #tpu.memory_space<vmem>>, vector<5x128xf32>
    %c0_7 = arith.constant 0 : index
    %c0_8 = arith.constant 0 : index
    %8 = vector.load %arg3[%c0_7, %c0_8] : memref<1x128xf32, #tpu.memory_space<vmem>>, vector<1x128xf32>
    %9 = vector.extract_strided_slice %7 {offsets = [0, 0], sizes = [1, 128], strides = [1, 1]} : vector<5x128xf32> to vector<1x128xf32>
    %10 = arith.addf %8, %9 : vector<1x128xf32>
    %11 = vector.extract_strided_slice %7 {offsets = [1, 0], sizes = [4, 128], strides = [1, 1]} : vector<5x128xf32> to vector<4x128xf32>
    %cst_9 = arith.constant 0.000000e+00 : f32
    %12 = vector.broadcast %cst_9 : f32 to vector<16x128xf32>
    %c0_10 = arith.constant 0 : index
    %c0_11 = arith.constant 0 : index
    %13 = vector.load %arg5[%c0_10, %c0_11] : memref<16x128xf32, #tpu.memory_space<vmem>>, vector<16x128xf32>
    tpu.vector_store %arg5[%c0_10, %c0_11], %12 {strides = array<i32>} : memref<16x128xf32, #tpu.memory_space<vmem>>, vector<16x128xf32>,
    %c0_12 = arith.constant 0 : index
    %c0_13 = arith.constant 0 : index
    %14 = vector.load %arg5[%c0_12, %c0_13] : memref<16x128xf32, #tpu.memory_space<vmem>>, vector<1x128xf32>
    tpu.vector_store %arg5[%c0_12, %c0_13], %10 {strides = array<i32>} : memref<16x128xf32, #tpu.memory_space<vmem>>, vector<1x128xf32>,
    %15 = vector.extract_strided_slice %6 {offsets = [0, 0], sizes = [4, 128], strides = [1, 1]} : vector<8x128xf32> to vector<4x128xf32>
    %16 = arith.addf %15, %11 : vector<4x128xf32>
    %c1 = arith.constant 1 : index
    %c0_14 = arith.constant 0 : index
    %17 = vector.load %arg5[%c1, %c0_14] : memref<16x128xf32, #tpu.memory_space<vmem>>, vector<4x128xf32>
    tpu.vector_store %arg5[%c1, %c0_14], %16 {strides = array<i32>} : memref<16x128xf32, #tpu.memory_space<vmem>>, vector<4x128xf32>,
    %c8 = arith.constant 8 : index
    %c0_15 = arith.constant 0 : index
    %18 = vector.load %arg5[%c8, %c0_15] : memref<16x128xf32, #tpu.memory_space<vmem>>, vector<1x128xf32>
    tpu.vector_store %arg5[%c8, %c0_15], %10 {strides = array<i32>} : memref<16x128xf32, #tpu.memory_space<vmem>>, vector<1x128xf32>,
    %19 = vector.extract_strided_slice %6 {offsets = [4, 0], sizes = [4, 128], strides = [1, 1]} : vector<8x128xf32> to vector<4x128xf32>
    %20 = arith.addf %19, %11 : vector<4x128xf32>
    %c9 = arith.constant 9 : index
    %c0_16 = arith.constant 0 : index
    %21 = vector.load %arg5[%c9, %c0_16] : memref<16x128xf32, #tpu.memory_space<vmem>>, vector<4x128xf32>
    tpu.vector_store %arg5[%c9, %c0_16], %20 {strides = array<i32>} : memref<16x128xf32, #tpu.memory_space<vmem>>, vector<4x128xf32>,
    return
  }
}

module attributes {stable_mosaic.version = 11 : i64} {
  func.func @_block_kernel(%arg0: i32, %arg1: i32, %arg2: memref<8x128xf32, #tpu.memory_space<vmem>>, %arg3: memref<1x1x128xf32, #tpu.memory_space<vmem>>, %arg4: memref<1x1x128xf32, #tpu.memory_space<vmem>>, %arg5: memref<1x128x384xbf16, #tpu.memory_space<vmem>>, %arg6: memref<1x1x384xf32, #tpu.memory_space<vmem>>, %arg7: memref<1x128x128xbf16, #tpu.memory_space<vmem>>, %arg8: memref<1x1x128xf32, #tpu.memory_space<vmem>>, %arg9: memref<1x1x128xf32, #tpu.memory_space<vmem>>, %arg10: memref<1x1x128xf32, #tpu.memory_space<vmem>>, %arg11: memref<1x128x512xbf16, #tpu.memory_space<vmem>>, %arg12: memref<1x1x512xf32, #tpu.memory_space<vmem>>, %arg13: memref<1x512x128xbf16, #tpu.memory_space<vmem>>, %arg14: memref<1x1x128xf32, #tpu.memory_space<vmem>>, %arg15: memref<1x8x128xf32, #tpu.memory_space<vmem>>, %arg16: memref<8x128xf32, #tpu.memory_space<vmem>>, %arg17: memref<8x128xf32, #tpu.memory_space<vmem>>) attributes {dimension_semantics = [#tpu.dimension_semantics<parallel>, #tpu.dimension_semantics<arbitrary>], iteration_bounds = array<i64: 2, 2>, scalar_prefetch = 0 : i64, scratch_operands = 2 : i64, tpu.core_type = #tpu.core_type<tc>, window_params = [{transform_indices = @transform_0, window_bounds = array<i64: 8, 128>}, {transform_indices = @transform_1, window_bounds = array<i64: 1, 1, 128>}, {transform_indices = @transform_2, window_bounds = array<i64: 1, 1, 128>}, {transform_indices = @transform_3, window_bounds = array<i64: 1, 128, 384>}, {transform_indices = @transform_4, window_bounds = array<i64: 1, 1, 384>}, {transform_indices = @transform_5, window_bounds = array<i64: 1, 128, 128>}, {transform_indices = @transform_6, window_bounds = array<i64: 1, 1, 128>}, {transform_indices = @transform_7, window_bounds = array<i64: 1, 1, 128>}, {transform_indices = @transform_8, window_bounds = array<i64: 1, 1, 128>}, {transform_indices = @transform_9, window_bounds = array<i64: 1, 128, 512>}, {transform_indices = @transform_10, window_bounds = array<i64: 1, 1, 512>}, {transform_indices = @transform_11, window_bounds = array<i64: 1, 512, 128>}, {transform_indices = @transform_12, window_bounds = array<i64: 1, 1, 128>}, {transform_indices = @transform_13, window_bounds = array<i64: 1, 8, 128>}]} {
    %c0_i32 = arith.constant 0 : i32
    %0 = arith.cmpi eq, %arg1, %c0_i32 : i32
    %1 = arith.extui %0 : i1 to i32
    %c0_i32_0 = arith.constant 0 : i32
    %2 = arith.cmpi ne, %1, %c0_i32_0 : i32
    scf.if %2 {
      %c0_89 = arith.constant 0 : index
      %c0_90 = arith.constant 0 : index
      %202 = vector.load %arg2[%c0_89, %c0_90] : memref<8x128xf32, #tpu.memory_space<vmem>>, vector<8x128xf32>
      %c0_91 = arith.constant 0 : index
      %c0_92 = arith.constant 0 : index
      %203 = vector.load %arg16[%c0_91, %c0_92] : memref<8x128xf32, #tpu.memory_space<vmem>>, vector<8x128xf32>
      tpu.vector_store %arg16[%c0_91, %c0_92], %202 {strides = array<i32>} : memref<8x128xf32, #tpu.memory_space<vmem>>, vector<8x128xf32>,
    } else {
    }
    %c0 = arith.constant 0 : index
    %c0_1 = arith.constant 0 : index
    %3 = vector.load %arg16[%c0, %c0_1] : memref<8x128xf32, #tpu.memory_space<vmem>>, vector<8x128xf32>
    %c0_2 = arith.constant 0 : index
    %c0_3 = arith.constant 0 : index
    %c0_4 = arith.constant 0 : index
    %4 = vector.load %arg3[%c0_2, %c0_3, %c0_4] : memref<1x1x128xf32, #tpu.memory_space<vmem>>, vector<1x1x128xf32>
    %5 = vector.shape_cast %4 : vector<1x1x128xf32> to vector<1x128xf32>
    %c0_5 = arith.constant 0 : index
    %c0_6 = arith.constant 0 : index
    %c0_7 = arith.constant 0 : index
    %6 = vector.load %arg4[%c0_5, %c0_6, %c0_7] : memref<1x1x128xf32, #tpu.memory_space<vmem>>, vector<1x1x128xf32>
    %7 = vector.shape_cast %6 : vector<1x1x128xf32> to vector<1x128xf32>
    %cst = arith.constant dense<0.000000e+00> : vector<8xf32>
    %8 = vector.multi_reduction <add>, %3, %cst [1] : vector<8x128xf32> to vector<8xf32>
    %9 = vector.shape_cast %8 : vector<8xf32> to vector<8x1xf32>
    %cst_8 = arith.constant 1.280000e+02 : f32
    %10 = vector.broadcast %cst_8 : f32 to vector<8x1xf32>
    %11 = arith.divf %9, %10 : vector<8x1xf32>
    %12 = vector.broadcast %11 : vector<8x1xf32> to vector<8x128xf32>
    %13 = arith.subf %3, %12 : vector<8x128xf32>
    %14 = arith.mulf %13, %13 : vector<8x128xf32>
    %cst_9 = arith.constant dense<0.000000e+00> : vector<8xf32>
    %15 = vector.multi_reduction <add>, %14, %cst_9 [1] : vector<8x128xf32> to vector<8xf32>
    %16 = vector.shape_cast %15 : vector<8xf32> to vector<8x1xf32>
    %cst_10 = arith.constant 1.280000e+02 : f32
    %17 = vector.broadcast %cst_10 : f32 to vector<8x1xf32>
    %18 = arith.divf %16, %17 : vector<8x1xf32>
    %cst_11 = arith.constant 9.99999997E-7 : f32
    %19 = vector.broadcast %cst_11 : f32 to vector<8x1xf32>
    %20 = arith.addf %18, %19 : vector<8x1xf32>
    %21 = math.rsqrt %20 : vector<8x1xf32>
    %22 = vector.broadcast %21 : vector<8x1xf32> to vector<8x128xf32>
    %23 = arith.mulf %13, %22 : vector<8x128xf32>
    %24 = vector.broadcast %5 : vector<1x128xf32> to vector<8x128xf32>
    %25 = arith.mulf %23, %24 : vector<8x128xf32>
    %26 = vector.broadcast %7 : vector<1x128xf32> to vector<8x128xf32>
    %27 = arith.addf %25, %26 : vector<8x128xf32>
    %28 = arith.truncf %27 : vector<8x128xf32> to vector<8x128xbf16>
    %c0_12 = arith.constant 0 : index
    %c0_13 = arith.constant 0 : index
    %c0_14 = arith.constant 0 : index
    %29 = vector.load %arg5[%c0_12, %c0_13, %c0_14] : memref<1x128x384xbf16, #tpu.memory_space<vmem>>, vector<1x128x384xbf16>
    %30 = vector.shape_cast %29 : vector<1x128x384xbf16> to vector<128x384xbf16>
    %cst_15 = arith.constant dense<0.000000e+00> : vector<8x384xf32>
    %31 = tpu.matmul %28, %30, %cst_15 {dimension_numbers = #tpu.dot_dimension_numbers<[1], [0], [0], [1], [0, 0, 1, 1], [], []>} : vector<8x128xbf16>, vector<128x384xbf16>, vector<8x384xf32> -> vector<8x384xf32>
    %c0_16 = arith.constant 0 : index
    %c0_17 = arith.constant 0 : index
    %c0_18 = arith.constant 0 : index
    %32 = vector.load %arg6[%c0_16, %c0_17, %c0_18] : memref<1x1x384xf32, #tpu.memory_space<vmem>>, vector<1x1x384xf32>
    %33 = vector.shape_cast %32 : vector<1x1x384xf32> to vector<1x384xf32>
    %34 = vector.broadcast %33 : vector<1x384xf32> to vector<8x384xf32>
    %35 = arith.addf %31, %34 : vector<8x384xf32>
    %36 = tpu.iota {dimensions = array<i32: 1>} : vector<8x8xi32>
    %c5_i32 = arith.constant 5 : i32
    %37 = vector.broadcast %c5_i32 : i32 to vector<8x8xi32>
    %38 = arith.cmpi sge, %36, %37 : vector<8x8xi32>
    %cst_19 = arith.constant -1.000000e+30 : f32
    %cst_20 = arith.constant 0.000000e+00 : f32
    %39 = vector.broadcast %cst_19 : f32 to vector<8x8xf32>
    %40 = vector.broadcast %cst_20 : f32 to vector<8x8xf32>
    %41 = arith.select %38, %39, %40 : vector<8x8xi1>, vector<8x8xf32>
    %42 = vector.extract_strided_slice %35 {offsets = [0, 0], sizes = [8, 32], strides = [1, 1]} : vector<8x384xf32> to vector<8x32xf32>
    %43 = vector.extract_strided_slice %35 {offsets = [0, 128], sizes = [8, 32], strides = [1, 1]} : vector<8x384xf32> to vector<8x32xf32>
    %44 = vector.extract_strided_slice %35 {offsets = [0, 256], sizes = [8, 32], strides = [1, 1]} : vector<8x384xf32> to vector<8x32xf32>
    %45 = arith.truncf %42 : vector<8x32xf32> to vector<8x32xbf16>
    %46 = arith.truncf %43 : vector<8x32xf32> to vector<8x32xbf16>
    %cst_21 = arith.constant dense<0.000000e+00> : vector<8x8xf32>
    %47 = tpu.matmul %45, %46, %cst_21 {dimension_numbers = #tpu.dot_dimension_numbers<[1], [1], [0], [0], [0, 0, 1, 0], [], []>} : vector<8x32xbf16>, vector<8x32xbf16>, vector<8x8xf32> -> vector<8x8xf32>
    %cst_22 = arith.constant 0.176776692 : f32
    %48 = vector.broadcast %cst_22 : f32 to vector<8x8xf32>
    %49 = arith.mulf %47, %48 : vector<8x8xf32>
    %50 = arith.addf %49, %41 : vector<8x8xf32>
    %cst_23 = arith.constant dense<0xFF800000> : vector<8xf32>
    %51 = vector.multi_reduction <maximumf>, %50, %cst_23 [1] : vector<8x8xf32> to vector<8xf32>
    %52 = vector.shape_cast %51 : vector<8xf32> to vector<8x1xf32>
    %53 = vector.broadcast %52 : vector<8x1xf32> to vector<8x8xf32>
    %54 = arith.subf %50, %53 : vector<8x8xf32>
    %55 = math.exp %54 : vector<8x8xf32>
    %cst_24 = arith.constant dense<0.000000e+00> : vector<8xf32>
    %56 = vector.multi_reduction <add>, %55, %cst_24 [1] : vector<8x8xf32> to vector<8xf32>
    %57 = vector.shape_cast %56 : vector<8xf32> to vector<8x1xf32>
    %58 = tpu.reciprocal %57 {approx = true} : vector<8x1xf32> -> vector<8x1xf32>
    %59 = vector.broadcast %58 : vector<8x1xf32> to vector<8x8xf32>
    %60 = arith.mulf %55, %59 : vector<8x8xf32>
    %61 = arith.truncf %60 : vector<8x8xf32> to vector<8x8xbf16>
    %62 = arith.truncf %44 : vector<8x32xf32> to vector<8x32xbf16>
    %cst_25 = arith.constant dense<0.000000e+00> : vector<8x32xf32>
    %63 = tpu.matmul %61, %62, %cst_25 {dimension_numbers = #tpu.dot_dimension_numbers<[1], [0], [0], [1], [0, 0, 1, 1], [], []>} : vector<8x8xbf16>, vector<8x32xbf16>, vector<8x32xf32> -> vector<8x32xf32>
    %c0_26 = arith.constant 0 : index
    %c0_27 = arith.constant 0 : index
    %64 = vector.load %arg17[%c0_26, %c0_27] : memref<8x128xf32, #tpu.memory_space<vmem>>, vector<8x32xf32>
    tpu.vector_store %arg17[%c0_26, %c0_27], %63 {strides = array<i32>} : memref<8x128xf32, #tpu.memory_space<vmem>>, vector<8x32xf32>,
    %65 = vector.extract_strided_slice %35 {offsets = [0, 32], sizes = [8, 32], strides = [1, 1]} : vector<8x384xf32> to vector<8x32xf32>
    %66 = vector.extract_strided_slice %35 {offsets = [0, 160], sizes = [8, 32], strides = [1, 1]} : vector<8x384xf32> to vector<8x32xf32>
    %67 = vector.extract_strided_slice %35 {offsets = [0, 288], sizes = [8, 32], strides = [1, 1]} : vector<8x384xf32> to vector<8x32xf32>
    %68 = arith.truncf %65 : vector<8x32xf32> to vector<8x32xbf16>
    %69 = arith.truncf %66 : vector<8x32xf32> to vector<8x32xbf16>
    %cst_28 = arith.constant dense<0.000000e+00> : vector<8x8xf32>
    %70 = tpu.matmul %68, %69, %cst_28 {dimension_numbers = #tpu.dot_dimension_numbers<[1], [1], [0], [0], [0, 0, 1, 0], [], []>} : vector<8x32xbf16>, vector<8x32xbf16>, vector<8x8xf32> -> vector<8x8xf32>
    %cst_29 = arith.constant 0.176776692 : f32
    %71 = vector.broadcast %cst_29 : f32 to vector<8x8xf32>
    %72 = arith.mulf %70, %71 : vector<8x8xf32>
    %73 = arith.addf %72, %41 : vector<8x8xf32>
    %cst_30 = arith.constant dense<0xFF800000> : vector<8xf32>
    %74 = vector.multi_reduction <maximumf>, %73, %cst_30 [1] : vector<8x8xf32> to vector<8xf32>
    %75 = vector.shape_cast %74 : vector<8xf32> to vector<8x1xf32>
    %76 = vector.broadcast %75 : vector<8x1xf32> to vector<8x8xf32>
    %77 = arith.subf %73, %76 : vector<8x8xf32>
    %78 = math.exp %77 : vector<8x8xf32>
    %cst_31 = arith.constant dense<0.000000e+00> : vector<8xf32>
    %79 = vector.multi_reduction <add>, %78, %cst_31 [1] : vector<8x8xf32> to vector<8xf32>
    %80 = vector.shape_cast %79 : vector<8xf32> to vector<8x1xf32>
    %81 = tpu.reciprocal %80 {approx = true} : vector<8x1xf32> -> vector<8x1xf32>
    %82 = vector.broadcast %81 : vector<8x1xf32> to vector<8x8xf32>
    %83 = arith.mulf %78, %82 : vector<8x8xf32>
    %84 = arith.truncf %83 : vector<8x8xf32> to vector<8x8xbf16>
    %85 = arith.truncf %67 : vector<8x32xf32> to vector<8x32xbf16>
    %cst_32 = arith.constant dense<0.000000e+00> : vector<8x32xf32>
    %86 = tpu.matmul %84, %85, %cst_32 {dimension_numbers = #tpu.dot_dimension_numbers<[1], [0], [0], [1], [0, 0, 1, 1], [], []>} : vector<8x8xbf16>, vector<8x32xbf16>, vector<8x32xf32> -> vector<8x32xf32>
    %c0_33 = arith.constant 0 : index
    %c32 = arith.constant 32 : index
    %87 = vector.load %arg17[%c0_33, %c32] : memref<8x128xf32, #tpu.memory_space<vmem>>, vector<8x32xf32>
    tpu.vector_store %arg17[%c0_33, %c32], %86 {strides = array<i32>} : memref<8x128xf32, #tpu.memory_space<vmem>>, vector<8x32xf32>,
    %88 = vector.extract_strided_slice %35 {offsets = [0, 64], sizes = [8, 32], strides = [1, 1]} : vector<8x384xf32> to vector<8x32xf32>
    %89 = vector.extract_strided_slice %35 {offsets = [0, 192], sizes = [8, 32], strides = [1, 1]} : vector<8x384xf32> to vector<8x32xf32>
    %90 = vector.extract_strided_slice %35 {offsets = [0, 320], sizes = [8, 32], strides = [1, 1]} : vector<8x384xf32> to vector<8x32xf32>
    %91 = arith.truncf %88 : vector<8x32xf32> to vector<8x32xbf16>
    %92 = arith.truncf %89 : vector<8x32xf32> to vector<8x32xbf16>
    %cst_34 = arith.constant dense<0.000000e+00> : vector<8x8xf32>
    %93 = tpu.matmul %91, %92, %cst_34 {dimension_numbers = #tpu.dot_dimension_numbers<[1], [1], [0], [0], [0, 0, 1, 0], [], []>} : vector<8x32xbf16>, vector<8x32xbf16>, vector<8x8xf32> -> vector<8x8xf32>
    %cst_35 = arith.constant 0.176776692 : f32
    %94 = vector.broadcast %cst_35 : f32 to vector<8x8xf32>
    %95 = arith.mulf %93, %94 : vector<8x8xf32>
    %96 = arith.addf %95, %41 : vector<8x8xf32>
    %cst_36 = arith.constant dense<0xFF800000> : vector<8xf32>
    %97 = vector.multi_reduction <maximumf>, %96, %cst_36 [1] : vector<8x8xf32> to vector<8xf32>
    %98 = vector.shape_cast %97 : vector<8xf32> to vector<8x1xf32>
    %99 = vector.broadcast %98 : vector<8x1xf32> to vector<8x8xf32>
    %100 = arith.subf %96, %99 : vector<8x8xf32>
    %101 = math.exp %100 : vector<8x8xf32>
    %cst_37 = arith.constant dense<0.000000e+00> : vector<8xf32>
    %102 = vector.multi_reduction <add>, %101, %cst_37 [1] : vector<8x8xf32> to vector<8xf32>
    %103 = vector.shape_cast %102 : vector<8xf32> to vector<8x1xf32>
    %104 = tpu.reciprocal %103 {approx = true} : vector<8x1xf32> -> vector<8x1xf32>
    %105 = vector.broadcast %104 : vector<8x1xf32> to vector<8x8xf32>
    %106 = arith.mulf %101, %105 : vector<8x8xf32>
    %107 = arith.truncf %106 : vector<8x8xf32> to vector<8x8xbf16>
    %108 = arith.truncf %90 : vector<8x32xf32> to vector<8x32xbf16>
    %cst_38 = arith.constant dense<0.000000e+00> : vector<8x32xf32>
    %109 = tpu.matmul %107, %108, %cst_38 {dimension_numbers = #tpu.dot_dimension_numbers<[1], [0], [0], [1], [0, 0, 1, 1], [], []>} : vector<8x8xbf16>, vector<8x32xbf16>, vector<8x32xf32> -> vector<8x32xf32>
    %c0_39 = arith.constant 0 : index
    %c64 = arith.constant 64 : index
    %110 = vector.load %arg17[%c0_39, %c64] : memref<8x128xf32, #tpu.memory_space<vmem>>, vector<8x32xf32>
    tpu.vector_store %arg17[%c0_39, %c64], %109 {strides = array<i32>} : memref<8x128xf32, #tpu.memory_space<vmem>>, vector<8x32xf32>,
    %111 = vector.extract_strided_slice %35 {offsets = [0, 96], sizes = [8, 32], strides = [1, 1]} : vector<8x384xf32> to vector<8x32xf32>
    %112 = vector.extract_strided_slice %35 {offsets = [0, 224], sizes = [8, 32], strides = [1, 1]} : vector<8x384xf32> to vector<8x32xf32>
    %113 = vector.extract_strided_slice %35 {offsets = [0, 352], sizes = [8, 32], strides = [1, 1]} : vector<8x384xf32> to vector<8x32xf32>
    %114 = arith.truncf %111 : vector<8x32xf32> to vector<8x32xbf16>
    %115 = arith.truncf %112 : vector<8x32xf32> to vector<8x32xbf16>
    %cst_40 = arith.constant dense<0.000000e+00> : vector<8x8xf32>
    %116 = tpu.matmul %114, %115, %cst_40 {dimension_numbers = #tpu.dot_dimension_numbers<[1], [1], [0], [0], [0, 0, 1, 0], [], []>} : vector<8x32xbf16>, vector<8x32xbf16>, vector<8x8xf32> -> vector<8x8xf32>
    %cst_41 = arith.constant 0.176776692 : f32
    %117 = vector.broadcast %cst_41 : f32 to vector<8x8xf32>
    %118 = arith.mulf %116, %117 : vector<8x8xf32>
    %119 = arith.addf %118, %41 : vector<8x8xf32>
    %cst_42 = arith.constant dense<0xFF800000> : vector<8xf32>
    %120 = vector.multi_reduction <maximumf>, %119, %cst_42 [1] : vector<8x8xf32> to vector<8xf32>
    %121 = vector.shape_cast %120 : vector<8xf32> to vector<8x1xf32>
    %122 = vector.broadcast %121 : vector<8x1xf32> to vector<8x8xf32>
    %123 = arith.subf %119, %122 : vector<8x8xf32>
    %124 = math.exp %123 : vector<8x8xf32>
    %cst_43 = arith.constant dense<0.000000e+00> : vector<8xf32>
    %125 = vector.multi_reduction <add>, %124, %cst_43 [1] : vector<8x8xf32> to vector<8xf32>
    %126 = vector.shape_cast %125 : vector<8xf32> to vector<8x1xf32>
    %127 = tpu.reciprocal %126 {approx = true} : vector<8x1xf32> -> vector<8x1xf32>
    %128 = vector.broadcast %127 : vector<8x1xf32> to vector<8x8xf32>
    %129 = arith.mulf %124, %128 : vector<8x8xf32>
    %130 = arith.truncf %129 : vector<8x8xf32> to vector<8x8xbf16>
    %131 = arith.truncf %113 : vector<8x32xf32> to vector<8x32xbf16>
    %cst_44 = arith.constant dense<0.000000e+00> : vector<8x32xf32>
    %132 = tpu.matmul %130, %131, %cst_44 {dimension_numbers = #tpu.dot_dimension_numbers<[1], [0], [0], [1], [0, 0, 1, 1], [], []>} : vector<8x8xbf16>, vector<8x32xbf16>, vector<8x32xf32> -> vector<8x32xf32>
    %c0_45 = arith.constant 0 : index
    %c96 = arith.constant 96 : index
    %133 = vector.load %arg17[%c0_45, %c96] : memref<8x128xf32, #tpu.memory_space<vmem>>, vector<8x32xf32>
    tpu.vector_store %arg17[%c0_45, %c96], %132 {strides = array<i32>} : memref<8x128xf32, #tpu.memory_space<vmem>>, vector<8x32xf32>,
    %c0_46 = arith.constant 0 : index
    %c0_47 = arith.constant 0 : index
    %134 = vector.load %arg17[%c0_46, %c0_47] : memref<8x128xf32, #tpu.memory_space<vmem>>, vector<8x128xf32>
    %135 = arith.truncf %134 : vector<8x128xf32> to vector<8x128xbf16>
    %c0_48 = arith.constant 0 : index
    %c0_49 = arith.constant 0 : index
    %c0_50 = arith.constant 0 : index
    %136 = vector.load %arg7[%c0_48, %c0_49, %c0_50] : memref<1x128x128xbf16, #tpu.memory_space<vmem>>, vector<1x128x128xbf16>
    %137 = vector.shape_cast %136 : vector<1x128x128xbf16> to vector<128x128xbf16>
    %cst_51 = arith.constant dense<0.000000e+00> : vector<8x128xf32>
    %138 = tpu.matmul %135, %137, %cst_51 {dimension_numbers = #tpu.dot_dimension_numbers<[1], [0], [0], [1], [0, 0, 1, 1], [], []>} : vector<8x128xbf16>, vector<128x128xbf16>, vector<8x128xf32> -> vector<8x128xf32>
    %139 = arith.addf %3, %138 : vector<8x128xf32>
    %c0_52 = arith.constant 0 : index
    %c0_53 = arith.constant 0 : index
    %c0_54 = arith.constant 0 : index
    %140 = vector.load %arg8[%c0_52, %c0_53, %c0_54] : memref<1x1x128xf32, #tpu.memory_space<vmem>>, vector<1x1x128xf32>
    %141 = vector.shape_cast %140 : vector<1x1x128xf32> to vector<1x128xf32>
    %142 = vector.broadcast %141 : vector<1x128xf32> to vector<8x128xf32>
    %143 = arith.addf %139, %142 : vector<8x128xf32>
    %c0_55 = arith.constant 0 : index
    %c0_56 = arith.constant 0 : index
    %c0_57 = arith.constant 0 : index
    %144 = vector.load %arg9[%c0_55, %c0_56, %c0_57] : memref<1x1x128xf32, #tpu.memory_space<vmem>>, vector<1x1x128xf32>
    %145 = vector.shape_cast %144 : vector<1x1x128xf32> to vector<1x128xf32>
    %c0_58 = arith.constant 0 : index
    %c0_59 = arith.constant 0 : index
    %c0_60 = arith.constant 0 : index
    %146 = vector.load %arg10[%c0_58, %c0_59, %c0_60] : memref<1x1x128xf32, #tpu.memory_space<vmem>>, vector<1x1x128xf32>
    %147 = vector.shape_cast %146 : vector<1x1x128xf32> to vector<1x128xf32>
    %cst_61 = arith.constant dense<0.000000e+00> : vector<8xf32>
    %148 = vector.multi_reduction <add>, %143, %cst_61 [1] : vector<8x128xf32> to vector<8xf32>
    %149 = vector.shape_cast %148 : vector<8xf32> to vector<8x1xf32>
    %cst_62 = arith.constant 1.280000e+02 : f32
    %150 = vector.broadcast %cst_62 : f32 to vector<8x1xf32>
    %151 = arith.divf %149, %150 : vector<8x1xf32>
    %152 = vector.broadcast %151 : vector<8x1xf32> to vector<8x128xf32>
    %153 = arith.subf %143, %152 : vector<8x128xf32>
    %154 = arith.mulf %153, %153 : vector<8x128xf32>
    %cst_63 = arith.constant dense<0.000000e+00> : vector<8xf32>
    %155 = vector.multi_reduction <add>, %154, %cst_63 [1] : vector<8x128xf32> to vector<8xf32>
    %156 = vector.shape_cast %155 : vector<8xf32> to vector<8x1xf32>
    %cst_64 = arith.constant 1.280000e+02 : f32
    %157 = vector.broadcast %cst_64 : f32 to vector<8x1xf32>
    %158 = arith.divf %156, %157 : vector<8x1xf32>
    %cst_65 = arith.constant 9.99999997E-7 : f32
    %159 = vector.broadcast %cst_65 : f32 to vector<8x1xf32>
    %160 = arith.addf %158, %159 : vector<8x1xf32>
    %161 = math.rsqrt %160 : vector<8x1xf32>
    %162 = vector.broadcast %161 : vector<8x1xf32> to vector<8x128xf32>
    %163 = arith.mulf %153, %162 : vector<8x128xf32>
    %164 = vector.broadcast %145 : vector<1x128xf32> to vector<8x128xf32>
    %165 = arith.mulf %163, %164 : vector<8x128xf32>
    %166 = vector.broadcast %147 : vector<1x128xf32> to vector<8x128xf32>
    %167 = arith.addf %165, %166 : vector<8x128xf32>
    %168 = arith.truncf %167 : vector<8x128xf32> to vector<8x128xbf16>
    %c0_66 = arith.constant 0 : index
    %c0_67 = arith.constant 0 : index
    %c0_68 = arith.constant 0 : index
    %169 = vector.load %arg11[%c0_66, %c0_67, %c0_68] : memref<1x128x512xbf16, #tpu.memory_space<vmem>>, vector<1x128x512xbf16>
    %170 = vector.shape_cast %169 : vector<1x128x512xbf16> to vector<128x512xbf16>
    %cst_69 = arith.constant dense<0.000000e+00> : vector<8x512xf32>
    %171 = tpu.matmul %168, %170, %cst_69 {dimension_numbers = #tpu.dot_dimension_numbers<[1], [0], [0], [1], [0, 0, 1, 1], [], []>} : vector<8x128xbf16>, vector<128x512xbf16>, vector<8x512xf32> -> vector<8x512xf32>
    %c0_70 = arith.constant 0 : index
    %c0_71 = arith.constant 0 : index
    %c0_72 = arith.constant 0 : index
    %172 = vector.load %arg12[%c0_70, %c0_71, %c0_72] : memref<1x1x512xf32, #tpu.memory_space<vmem>>, vector<1x1x512xf32>
    %173 = vector.shape_cast %172 : vector<1x1x512xf32> to vector<1x512xf32>
    %174 = vector.broadcast %173 : vector<1x512xf32> to vector<8x512xf32>
    %175 = arith.addf %171, %174 : vector<8x512xf32>
    %176 = arith.mulf %175, %175 : vector<8x512xf32>
    %177 = arith.mulf %175, %176 : vector<8x512xf32>
    %cst_73 = arith.constant 4.471500e-02 : f32
    %178 = vector.broadcast %cst_73 : f32 to vector<8x512xf32>
    %179 = arith.mulf %178, %177 : vector<8x512xf32>
    %180 = arith.addf %175, %179 : vector<8x512xf32>
    %cst_74 = arith.constant 0.797884583 : f32
    %181 = vector.broadcast %cst_74 : f32 to vector<8x512xf32>
    %182 = arith.mulf %181, %180 : vector<8x512xf32>
    %183 = math.tanh %182 : vector<8x512xf32>
    %cst_75 = arith.constant 1.000000e+00 : f32
    %184 = vector.broadcast %cst_75 : f32 to vector<8x512xf32>
    %185 = arith.addf %184, %183 : vector<8x512xf32>
    %cst_76 = arith.constant 5.000000e-01 : f32
    %186 = vector.broadcast %cst_76 : f32 to vector<8x512xf32>
    %187 = arith.mulf %186, %185 : vector<8x512xf32>
    %188 = arith.mulf %175, %187 : vector<8x512xf32>
    %189 = arith.truncf %188 : vector<8x512xf32> to vector<8x512xbf16>
    %c0_77 = arith.constant 0 : index
    %c0_78 = arith.constant 0 : index
    %c0_79 = arith.constant 0 : index
    %190 = vector.load %arg13[%c0_77, %c0_78, %c0_79] : memref<1x512x128xbf16, #tpu.memory_space<vmem>>, vector<1x512x128xbf16>
    %191 = vector.shape_cast %190 : vector<1x512x128xbf16> to vector<512x128xbf16>
    %cst_80 = arith.constant dense<0.000000e+00> : vector<8x128xf32>
    %192 = tpu.matmul %189, %191, %cst_80 {dimension_numbers = #tpu.dot_dimension_numbers<[1], [0], [0], [1], [0, 0, 1, 1], [], []>} : vector<8x512xbf16>, vector<512x128xbf16>, vector<8x128xf32> -> vector<8x128xf32>
    %c0_81 = arith.constant 0 : index
    %c0_82 = arith.constant 0 : index
    %c0_83 = arith.constant 0 : index
    %193 = vector.load %arg14[%c0_81, %c0_82, %c0_83] : memref<1x1x128xf32, #tpu.memory_space<vmem>>, vector<1x1x128xf32>
    %194 = vector.shape_cast %193 : vector<1x1x128xf32> to vector<1x128xf32>
    %195 = vector.broadcast %194 : vector<1x128xf32> to vector<8x128xf32>
    %196 = arith.addf %192, %195 : vector<8x128xf32>
    %197 = arith.addf %143, %196 : vector<8x128xf32>
    %c0_84 = arith.constant 0 : index
    %c0_85 = arith.constant 0 : index
    %198 = vector.load %arg16[%c0_84, %c0_85] : memref<8x128xf32, #tpu.memory_space<vmem>>, vector<8x128xf32>
    tpu.vector_store %arg16[%c0_84, %c0_85], %197 {strides = array<i32>} : memref<8x128xf32, #tpu.memory_space<vmem>>, vector<8x128xf32>,
    %c0_86 = arith.constant 0 : index
    %c0_87 = arith.constant 0 : index
    %c0_88 = arith.constant 0 : index
    %199 = vector.load %arg15[%c0_86, %c0_87, %c0_88] : memref<1x8x128xf32, #tpu.memory_space<vmem>>, vector<1x8x128xf32>
    %200 = vector.shape_cast %199 : vector<1x8x128xf32> to vector<8x128xf32>
    %201 = vector.shape_cast %197 : vector<8x128xf32> to vector<1x8x128xf32>
    tpu.vector_store %arg15[%c0_86, %c0_87, %c0_88], %201 {strides = array<i32>} : memref<1x8x128xf32, #tpu.memory_space<vmem>>, vector<1x8x128xf32>,
    return
  }
  func.func @transform_0(%arg0: i32, %arg1: i32) -> (i32, i32) {
    %c0_i32 = arith.constant 0 : i32
    %c0_i32_0 = arith.constant 0 : i32
    return %arg0, %c0_i32 : i32, i32
  }
  func.func @transform_1(%arg0: i32, %arg1: i32) -> (i32, i32, i32) {
    %c0_i32 = arith.constant 0 : i32
    %c0_i32_0 = arith.constant 0 : i32
    %c0_i32_1 = arith.constant 0 : i32
    return %arg1, %c0_i32, %c0_i32_0 : i32, i32, i32
  }
  func.func @transform_2(%arg0: i32, %arg1: i32) -> (i32, i32, i32) {
    %c0_i32 = arith.constant 0 : i32
    %c0_i32_0 = arith.constant 0 : i32
    %c0_i32_1 = arith.constant 0 : i32
    return %arg1, %c0_i32, %c0_i32_0 : i32, i32, i32
  }
  func.func @transform_3(%arg0: i32, %arg1: i32) -> (i32, i32, i32) {
    %c0_i32 = arith.constant 0 : i32
    %c0_i32_0 = arith.constant 0 : i32
    %c0_i32_1 = arith.constant 0 : i32
    return %arg1, %c0_i32, %c0_i32_0 : i32, i32, i32
  }
  func.func @transform_4(%arg0: i32, %arg1: i32) -> (i32, i32, i32) {
    %c0_i32 = arith.constant 0 : i32
    %c0_i32_0 = arith.constant 0 : i32
    %c0_i32_1 = arith.constant 0 : i32
    return %arg1, %c0_i32, %c0_i32_0 : i32, i32, i32
  }
  func.func @transform_5(%arg0: i32, %arg1: i32) -> (i32, i32, i32) {
    %c0_i32 = arith.constant 0 : i32
    %c0_i32_0 = arith.constant 0 : i32
    %c0_i32_1 = arith.constant 0 : i32
    return %arg1, %c0_i32, %c0_i32_0 : i32, i32, i32
  }
  func.func @transform_6(%arg0: i32, %arg1: i32) -> (i32, i32, i32) {
    %c0_i32 = arith.constant 0 : i32
    %c0_i32_0 = arith.constant 0 : i32
    %c0_i32_1 = arith.constant 0 : i32
    return %arg1, %c0_i32, %c0_i32_0 : i32, i32, i32
  }
  func.func @transform_7(%arg0: i32, %arg1: i32) -> (i32, i32, i32) {
    %c0_i32 = arith.constant 0 : i32
    %c0_i32_0 = arith.constant 0 : i32
    %c0_i32_1 = arith.constant 0 : i32
    return %arg1, %c0_i32, %c0_i32_0 : i32, i32, i32
  }
  func.func @transform_8(%arg0: i32, %arg1: i32) -> (i32, i32, i32) {
    %c0_i32 = arith.constant 0 : i32
    %c0_i32_0 = arith.constant 0 : i32
    %c0_i32_1 = arith.constant 0 : i32
    return %arg1, %c0_i32, %c0_i32_0 : i32, i32, i32
  }
  func.func @transform_9(%arg0: i32, %arg1: i32) -> (i32, i32, i32) {
    %c0_i32 = arith.constant 0 : i32
    %c0_i32_0 = arith.constant 0 : i32
    %c0_i32_1 = arith.constant 0 : i32
    return %arg1, %c0_i32, %c0_i32_0 : i32, i32, i32
  }
  func.func @transform_10(%arg0: i32, %arg1: i32) -> (i32, i32, i32) {
    %c0_i32 = arith.constant 0 : i32
    %c0_i32_0 = arith.constant 0 : i32
    %c0_i32_1 = arith.constant 0 : i32
    return %arg1, %c0_i32, %c0_i32_0 : i32, i32, i32
  }
  func.func @transform_11(%arg0: i32, %arg1: i32) -> (i32, i32, i32) {
    %c0_i32 = arith.constant 0 : i32
    %c0_i32_0 = arith.constant 0 : i32
    %c0_i32_1 = arith.constant 0 : i32
    return %arg1, %c0_i32, %c0_i32_0 : i32, i32, i32
  }
  func.func @transform_12(%arg0: i32, %arg1: i32) -> (i32, i32, i32) {
    %c0_i32 = arith.constant 0 : i32
    %c0_i32_0 = arith.constant 0 : i32
    %c0_i32_1 = arith.constant 0 : i32
    return %arg1, %c0_i32, %c0_i32_0 : i32, i32, i32
  }
  func.func @transform_13(%arg0: i32, %arg1: i32) -> (i32, i32, i32) {
    %c0_i32 = arith.constant 0 : i32
    %c0_i32_0 = arith.constant 0 : i32
    return %arg1, %arg0, %c0_i32 : i32, i32, i32
  }
}

module attributes {stable_mosaic.version = 11 : i64} {
  func.func @_head_kernel(%arg0: memref<2x8x128xf32, #tpu.memory_space<vmem>>, %arg1: memref<2x8x128xf32, #tpu.memory_space<vmem>>, %arg2: memref<1x128xf32, #tpu.memory_space<vmem>>, %arg3: memref<1x128xf32, #tpu.memory_space<vmem>>, %arg4: memref<128x384xbf16, #tpu.memory_space<vmem>>, %arg5: memref<1x384xf32, #tpu.memory_space<vmem>>, %arg6: memref<3x1x128xf32, #tpu.memory_space<vmem>>, %arg7: memref<3x1x128xf32, #tpu.memory_space<vmem>>, %arg8: memref<3x128x128xbf16, #tpu.memory_space<vmem>>, %arg9: memref<3x1x128xf32, #tpu.memory_space<vmem>>, %arg10: memref<3x1x128xf32, #tpu.memory_space<vmem>>, %arg11: memref<3x1x128xf32, #tpu.memory_space<vmem>>, %arg12: memref<3x1x128xf32, #tpu.memory_space<vmem>>, %arg13: memref<3x1x1xf32, #tpu.memory_space<vmem>>, %arg14: memref<128x128xbf16, #tpu.memory_space<vmem>>, %arg15: memref<1x128xf32, #tpu.memory_space<vmem>>, %arg16: memref<128x128xbf16, #tpu.memory_space<vmem>>, %arg17: memref<1x128xf32, #tpu.memory_space<vmem>>, %arg18: memref<2x128xf32, #tpu.memory_space<vmem>>, %arg19: memref<2x128xf32, #tpu.memory_space<vmem>>, %arg20: memref<2x128xf32, #tpu.memory_space<vmem>>, %arg21: memref<2x128xf32, #tpu.memory_space<vmem>>, %arg22: memref<2x128xf32, #tpu.memory_space<vmem>>, %arg23: memref<2x128xf32, #tpu.memory_space<vmem>>) attributes {dimension_semantics = [], scalar_prefetch = 0 : i64, scratch_operands = 0 : i64, tpu.core_type = #tpu.core_type<tc>} {
    %c0 = arith.constant 0 : index
    %c0_0 = arith.constant 0 : index
    %c0_1 = arith.constant 0 : index
    %0 = vector.load %arg0[%c0, %c0_0, %c0_1] : memref<2x8x128xf32, #tpu.memory_space<vmem>>, vector<2x8x128xf32>
    %c0_2 = arith.constant 0 : index
    %c0_3 = arith.constant 0 : index
    %c0_4 = arith.constant 0 : index
    %1 = vector.load %arg1[%c0_2, %c0_3, %c0_4] : memref<2x8x128xf32, #tpu.memory_space<vmem>>, vector<2x8x128xf32>
    %2 = vector.extract_strided_slice %0 {offsets = [0, 1, 0], sizes = [2, 4, 128], strides = [1, 1, 1]} : vector<2x8x128xf32> to vector<2x4x128xf32>
    %cst = arith.constant dense<0.000000e+00> : vector<2x128xf32>
    %3 = vector.multi_reduction <add>, %2, %cst [1] : vector<2x4x128xf32> to vector<2x128xf32>
    %cst_5 = arith.constant 2.500000e-01 : f32
    %4 = vector.broadcast %cst_5 : f32 to vector<2x128xf32>
    %5 = arith.mulf %3, %4 : vector<2x128xf32>
    %c0_6 = arith.constant 0 : index
    %c0_7 = arith.constant 0 : index
    %6 = vector.load %arg2[%c0_6, %c0_7] : memref<1x128xf32, #tpu.memory_space<vmem>>, vector<1x128xf32>
    %c0_8 = arith.constant 0 : index
    %c0_9 = arith.constant 0 : index
    %7 = vector.load %arg3[%c0_8, %c0_9] : memref<1x128xf32, #tpu.memory_space<vmem>>, vector<1x128xf32>
    %cst_10 = arith.constant dense<0.000000e+00> : vector<2xf32>
    %8 = vector.multi_reduction <add>, %5, %cst_10 [1] : vector<2x128xf32> to vector<2xf32>
    %9 = vector.shape_cast %8 : vector<2xf32> to vector<2x1xf32>
    %cst_11 = arith.constant 1.280000e+02 : f32
    %10 = vector.broadcast %cst_11 : f32 to vector<2x1xf32>
    %11 = arith.divf %9, %10 : vector<2x1xf32>
    %12 = vector.broadcast %11 : vector<2x1xf32> to vector<2x128xf32>
    %13 = arith.subf %5, %12 : vector<2x128xf32>
    %14 = arith.mulf %13, %13 : vector<2x128xf32>
    %cst_12 = arith.constant dense<0.000000e+00> : vector<2xf32>
    %15 = vector.multi_reduction <add>, %14, %cst_12 [1] : vector<2x128xf32> to vector<2xf32>
    %16 = vector.shape_cast %15 : vector<2xf32> to vector<2x1xf32>
    %cst_13 = arith.constant 1.280000e+02 : f32
    %17 = vector.broadcast %cst_13 : f32 to vector<2x1xf32>
    %18 = arith.divf %16, %17 : vector<2x1xf32>
    %cst_14 = arith.constant 9.99999997E-7 : f32
    %19 = vector.broadcast %cst_14 : f32 to vector<2x1xf32>
    %20 = arith.addf %18, %19 : vector<2x1xf32>
    %21 = math.rsqrt %20 : vector<2x1xf32>
    %22 = vector.broadcast %21 : vector<2x1xf32> to vector<2x128xf32>
    %23 = arith.mulf %13, %22 : vector<2x128xf32>
    %24 = vector.broadcast %6 : vector<1x128xf32> to vector<2x128xf32>
    %25 = arith.mulf %23, %24 : vector<2x128xf32>
    %26 = vector.broadcast %7 : vector<1x128xf32> to vector<2x128xf32>
    %27 = arith.addf %25, %26 : vector<2x128xf32>
    %28 = vector.extract_strided_slice %1 {offsets = [0, 1, 0], sizes = [2, 4, 128], strides = [1, 1, 1]} : vector<2x8x128xf32> to vector<2x4x128xf32>
    %cst_15 = arith.constant dense<0.000000e+00> : vector<2x128xf32>
    %29 = vector.multi_reduction <add>, %28, %cst_15 [1] : vector<2x4x128xf32> to vector<2x128xf32>
    %cst_16 = arith.constant 2.500000e-01 : f32
    %30 = vector.broadcast %cst_16 : f32 to vector<2x128xf32>
    %31 = arith.mulf %29, %30 : vector<2x128xf32>
    %c0_17 = arith.constant 0 : index
    %c0_18 = arith.constant 0 : index
    %32 = vector.load %arg2[%c0_17, %c0_18] : memref<1x128xf32, #tpu.memory_space<vmem>>, vector<1x128xf32>
    %c0_19 = arith.constant 0 : index
    %c0_20 = arith.constant 0 : index
    %33 = vector.load %arg3[%c0_19, %c0_20] : memref<1x128xf32, #tpu.memory_space<vmem>>, vector<1x128xf32>
    %cst_21 = arith.constant dense<0.000000e+00> : vector<2xf32>
    %34 = vector.multi_reduction <add>, %31, %cst_21 [1] : vector<2x128xf32> to vector<2xf32>
    %35 = vector.shape_cast %34 : vector<2xf32> to vector<2x1xf32>
    %cst_22 = arith.constant 1.280000e+02 : f32
    %36 = vector.broadcast %cst_22 : f32 to vector<2x1xf32>
    %37 = arith.divf %35, %36 : vector<2x1xf32>
    %38 = vector.broadcast %37 : vector<2x1xf32> to vector<2x128xf32>
    %39 = arith.subf %31, %38 : vector<2x128xf32>
    %40 = arith.mulf %39, %39 : vector<2x128xf32>
    %cst_23 = arith.constant dense<0.000000e+00> : vector<2xf32>
    %41 = vector.multi_reduction <add>, %40, %cst_23 [1] : vector<2x128xf32> to vector<2xf32>
    %42 = vector.shape_cast %41 : vector<2xf32> to vector<2x1xf32>
    %cst_24 = arith.constant 1.280000e+02 : f32
    %43 = vector.broadcast %cst_24 : f32 to vector<2x1xf32>
    %44 = arith.divf %42, %43 : vector<2x1xf32>
    %cst_25 = arith.constant 9.99999997E-7 : f32
    %45 = vector.broadcast %cst_25 : f32 to vector<2x1xf32>
    %46 = arith.addf %44, %45 : vector<2x1xf32>
    %47 = math.rsqrt %46 : vector<2x1xf32>
    %48 = vector.broadcast %47 : vector<2x1xf32> to vector<2x128xf32>
    %49 = arith.mulf %39, %48 : vector<2x128xf32>
    %50 = vector.broadcast %32 : vector<1x128xf32> to vector<2x128xf32>
    %51 = arith.mulf %49, %50 : vector<2x128xf32>
    %52 = vector.broadcast %33 : vector<1x128xf32> to vector<2x128xf32>
    %53 = arith.addf %51, %52 : vector<2x128xf32>
    %c0_26 = arith.constant 0 : index
    %c0_27 = arith.constant 0 : index
    %54 = vector.load %arg20[%c0_26, %c0_27] : memref<2x128xf32, #tpu.memory_space<vmem>>, vector<2x128xf32>
    tpu.vector_store %arg20[%c0_26, %c0_27], %27 {strides = array<i32>} : memref<2x128xf32, #tpu.memory_space<vmem>>, vector<2x128xf32>,
    %55 = arith.truncf %53 : vector<2x128xf32> to vector<2x128xbf16>
    %c0_28 = arith.constant 0 : index
    %c0_29 = arith.constant 0 : index
    %56 = vector.load %arg4[%c0_28, %c0_29] : memref<128x384xbf16, #tpu.memory_space<vmem>>, vector<128x384xbf16>
    %cst_30 = arith.constant dense<0.000000e+00> : vector<2x384xf32>
    %57 = tpu.matmul %55, %56, %cst_30 {dimension_numbers = #tpu.dot_dimension_numbers<[1], [0], [0], [1], [0, 0, 1, 1], [], []>} : vector<2x128xbf16>, vector<128x384xbf16>, vector<2x384xf32> -> vector<2x384xf32>
    %c0_31 = arith.constant 0 : index
    %c0_32 = arith.constant 0 : index
    %58 = vector.load %arg5[%c0_31, %c0_32] : memref<1x384xf32, #tpu.memory_space<vmem>>, vector<1x384xf32>
    %59 = vector.broadcast %58 : vector<1x384xf32> to vector<2x384xf32>
    %60 = arith.addf %57, %59 : vector<2x384xf32>
    %61 = vector.extract_strided_slice %60 {offsets = [0, 0], sizes = [2, 128], strides = [1, 1]} : vector<2x384xf32> to vector<2x128xf32>
    %c0_33 = arith.constant 0 : index
    %c0_34 = arith.constant 0 : index
    %c0_35 = arith.constant 0 : index
    %62 = vector.load %arg6[%c0_33, %c0_34, %c0_35] : memref<3x1x128xf32, #tpu.memory_space<vmem>>, vector<1x1x128xf32>
    %63 = vector.shape_cast %62 : vector<1x1x128xf32> to vector<1x128xf32>
    %c0_36 = arith.constant 0 : index
    %c0_37 = arith.constant 0 : index
    %c0_38 = arith.constant 0 : index
    %64 = vector.load %arg7[%c0_36, %c0_37, %c0_38] : memref<3x1x128xf32, #tpu.memory_space<vmem>>, vector<1x1x128xf32>
    %65 = vector.shape_cast %64 : vector<1x1x128xf32> to vector<1x128xf32>
    %cst_39 = arith.constant dense<0.000000e+00> : vector<2xf32>
    %66 = vector.multi_reduction <add>, %61, %cst_39 [1] : vector<2x128xf32> to vector<2xf32>
    %67 = vector.shape_cast %66 : vector<2xf32> to vector<2x1xf32>
    %cst_40 = arith.constant 1.280000e+02 : f32
    %68 = vector.broadcast %cst_40 : f32 to vector<2x1xf32>
    %69 = arith.divf %67, %68 : vector<2x1xf32>
    %70 = vector.broadcast %69 : vector<2x1xf32> to vector<2x128xf32>
    %71 = arith.subf %61, %70 : vector<2x128xf32>
    %72 = arith.mulf %71, %71 : vector<2x128xf32>
    %cst_41 = arith.constant dense<0.000000e+00> : vector<2xf32>
    %73 = vector.multi_reduction <add>, %72, %cst_41 [1] : vector<2x128xf32> to vector<2xf32>
    %74 = vector.shape_cast %73 : vector<2xf32> to vector<2x1xf32>
    %cst_42 = arith.constant 1.280000e+02 : f32
    %75 = vector.broadcast %cst_42 : f32 to vector<2x1xf32>
    %76 = arith.divf %74, %75 : vector<2x1xf32>
    %cst_43 = arith.constant 9.99999974E-6 : f32
    %77 = vector.broadcast %cst_43 : f32 to vector<2x1xf32>
    %78 = arith.addf %76, %77 : vector<2x1xf32>
    %79 = math.rsqrt %78 : vector<2x1xf32>
    %80 = vector.broadcast %79 : vector<2x1xf32> to vector<2x128xf32>
    %81 = arith.mulf %71, %80 : vector<2x128xf32>
    %82 = vector.broadcast %63 : vector<1x128xf32> to vector<2x128xf32>
    %83 = arith.mulf %81, %82 : vector<2x128xf32>
    %84 = vector.broadcast %65 : vector<1x128xf32> to vector<2x128xf32>
    %85 = arith.addf %83, %84 : vector<2x128xf32>
    %cst_44 = arith.constant 0.000000e+00 : f32
    %86 = vector.broadcast %cst_44 : f32 to vector<2x128xf32>
    %87 = arith.maximumf %85, %86 : vector<2x128xf32>
    %88 = arith.truncf %87 : vector<2x128xf32> to vector<2x128xbf16>
    %c0_45 = arith.constant 0 : index
    %c0_46 = arith.constant 0 : index
    %c0_47 = arith.constant 0 : index
    %89 = vector.load %arg8[%c0_45, %c0_46, %c0_47] : memref<3x128x128xbf16, #tpu.memory_space<vmem>>, vector<1x128x128xbf16>
    %90 = vector.shape_cast %89 : vector<1x128x128xbf16> to vector<128x128xbf16>
    %cst_48 = arith.constant dense<0.000000e+00> : vector<2x128xf32>
    %91 = tpu.matmul %88, %90, %cst_48 {dimension_numbers = #tpu.dot_dimension_numbers<[1], [0], [0], [1], [0, 0, 1, 1], [], []>} : vector<2x128xbf16>, vector<128x128xbf16>, vector<2x128xf32> -> vector<2x128xf32>
    %c0_49 = arith.constant 0 : index
    %c0_50 = arith.constant 0 : index
    %c0_51 = arith.constant 0 : index
    %92 = vector.load %arg9[%c0_49, %c0_50, %c0_51] : memref<3x1x128xf32, #tpu.memory_space<vmem>>, vector<1x1x128xf32>
    %93 = vector.shape_cast %92 : vector<1x1x128xf32> to vector<1x128xf32>
    %94 = vector.broadcast %93 : vector<1x128xf32> to vector<2x128xf32>
    %95 = arith.addf %91, %94 : vector<2x128xf32>
    %c0_52 = arith.constant 0 : index
    %c0_53 = arith.constant 0 : index
    %c0_54 = arith.constant 0 : index
    %96 = vector.load %arg10[%c0_52, %c0_53, %c0_54] : memref<3x1x128xf32, #tpu.memory_space<vmem>>, vector<1x1x128xf32>
    %97 = vector.shape_cast %96 : vector<1x1x128xf32> to vector<1x128xf32>
    %c0_55 = arith.constant 0 : index
    %c0_56 = arith.constant 0 : index
    %c0_57 = arith.constant 0 : index
    %98 = vector.load %arg11[%c0_55, %c0_56, %c0_57] : memref<3x1x128xf32, #tpu.memory_space<vmem>>, vector<1x1x128xf32>
    %99 = vector.shape_cast %98 : vector<1x1x128xf32> to vector<1x128xf32>
    %cst_58 = arith.constant dense<0.000000e+00> : vector<2xf32>
    %100 = vector.multi_reduction <add>, %95, %cst_58 [1] : vector<2x128xf32> to vector<2xf32>
    %101 = vector.shape_cast %100 : vector<2xf32> to vector<2x1xf32>
    %cst_59 = arith.constant 1.280000e+02 : f32
    %102 = vector.broadcast %cst_59 : f32 to vector<2x1xf32>
    %103 = arith.divf %101, %102 : vector<2x1xf32>
    %104 = vector.broadcast %103 : vector<2x1xf32> to vector<2x128xf32>
    %105 = arith.subf %95, %104 : vector<2x128xf32>
    %106 = arith.mulf %105, %105 : vector<2x128xf32>
    %cst_60 = arith.constant dense<0.000000e+00> : vector<2xf32>
    %107 = vector.multi_reduction <add>, %106, %cst_60 [1] : vector<2x128xf32> to vector<2xf32>
    %108 = vector.shape_cast %107 : vector<2xf32> to vector<2x1xf32>
    %cst_61 = arith.constant 1.280000e+02 : f32
    %109 = vector.broadcast %cst_61 : f32 to vector<2x1xf32>
    %110 = arith.divf %108, %109 : vector<2x1xf32>
    %cst_62 = arith.constant 9.99999974E-6 : f32
    %111 = vector.broadcast %cst_62 : f32 to vector<2x1xf32>
    %112 = arith.addf %110, %111 : vector<2x1xf32>
    %113 = math.rsqrt %112 : vector<2x1xf32>
    %114 = vector.broadcast %113 : vector<2x1xf32> to vector<2x128xf32>
    %115 = arith.mulf %105, %114 : vector<2x128xf32>
    %116 = vector.broadcast %97 : vector<1x128xf32> to vector<2x128xf32>
    %117 = arith.mulf %115, %116 : vector<2x128xf32>
    %118 = vector.broadcast %99 : vector<1x128xf32> to vector<2x128xf32>
    %119 = arith.addf %117, %118 : vector<2x128xf32>
    %120 = arith.negf %119 : vector<2x128xf32>
    %121 = math.exp %120 : vector<2x128xf32>
    %cst_63 = arith.constant 1.000000e+00 : f32
    %122 = vector.broadcast %cst_63 : f32 to vector<2x128xf32>
    %123 = arith.addf %122, %121 : vector<2x128xf32>
    %124 = arith.divf %122, %123 : vector<2x128xf32>
    %cst_64 = arith.constant 2.000000e+00 : f32
    %125 = vector.broadcast %cst_64 : f32 to vector<2x128xf32>
    %126 = arith.mulf %125, %124 : vector<2x128xf32>
    %127 = arith.mulf %126, %27 : vector<2x128xf32>
    %c0_65 = arith.constant 0 : index
    %c0_66 = arith.constant 0 : index
    %128 = vector.load %arg21[%c0_65, %c0_66] : memref<2x128xf32, #tpu.memory_space<vmem>>, vector<2x128xf32>
    tpu.vector_store %arg21[%c0_65, %c0_66], %127 {strides = array<i32>} : memref<2x128xf32, #tpu.memory_space<vmem>>, vector<2x128xf32>,
    %c0_67 = arith.constant 0 : index
    %c0_68 = arith.constant 0 : index
    %c0_69 = arith.constant 0 : index
    %129 = vector.load %arg12[%c0_67, %c0_68, %c0_69] : memref<3x1x128xf32, #tpu.memory_space<vmem>>, vector<1x1x128xf32>
    %130 = vector.shape_cast %129 : vector<1x1x128xf32> to vector<1x128xf32>
    %131 = vector.broadcast %130 : vector<1x128xf32> to vector<2x128xf32>
    %132 = arith.mulf %127, %131 : vector<2x128xf32>
    %cst_70 = arith.constant dense<0.000000e+00> : vector<2xf32>
    %133 = vector.multi_reduction <add>, %132, %cst_70 [1] : vector<2x128xf32> to vector<2xf32>
    %134 = vector.shape_cast %133 : vector<2xf32> to vector<2x1xf32>
    %c0_71 = arith.constant 0 : index
    %c0_72 = arith.constant 0 : index
    %c0_73 = arith.constant 0 : index
    %135 = vector.load %arg13[%c0_71, %c0_72, %c0_73] : memref<3x1x1xf32, #tpu.memory_space<vmem>>, vector<1x1x1xf32>
    %136 = vector.shape_cast %135 : vector<1x1x1xf32> to vector<1x1xf32>
    %137 = vector.broadcast %136 : vector<1x1xf32> to vector<2x1xf32>
    %138 = arith.addf %134, %137 : vector<2x1xf32>
    %139 = vector.extract_strided_slice %60 {offsets = [0, 128], sizes = [2, 128], strides = [1, 1]} : vector<2x384xf32> to vector<2x128xf32>
    %c1 = arith.constant 1 : index
    %c0_74 = arith.constant 0 : index
    %c0_75 = arith.constant 0 : index
    %140 = vector.load %arg6[%c1, %c0_74, %c0_75] : memref<3x1x128xf32, #tpu.memory_space<vmem>>, vector<1x1x128xf32>
    %141 = vector.shape_cast %140 : vector<1x1x128xf32> to vector<1x128xf32>
    %c1_76 = arith.constant 1 : index
    %c0_77 = arith.constant 0 : index
    %c0_78 = arith.constant 0 : index
    %142 = vector.load %arg7[%c1_76, %c0_77, %c0_78] : memref<3x1x128xf32, #tpu.memory_space<vmem>>, vector<1x1x128xf32>
    %143 = vector.shape_cast %142 : vector<1x1x128xf32> to vector<1x128xf32>
    %cst_79 = arith.constant dense<0.000000e+00> : vector<2xf32>
    %144 = vector.multi_reduction <add>, %139, %cst_79 [1] : vector<2x128xf32> to vector<2xf32>
    %145 = vector.shape_cast %144 : vector<2xf32> to vector<2x1xf32>
    %cst_80 = arith.constant 1.280000e+02 : f32
    %146 = vector.broadcast %cst_80 : f32 to vector<2x1xf32>
    %147 = arith.divf %145, %146 : vector<2x1xf32>
    %148 = vector.broadcast %147 : vector<2x1xf32> to vector<2x128xf32>
    %149 = arith.subf %139, %148 : vector<2x128xf32>
    %150 = arith.mulf %149, %149 : vector<2x128xf32>
    %cst_81 = arith.constant dense<0.000000e+00> : vector<2xf32>
    %151 = vector.multi_reduction <add>, %150, %cst_81 [1] : vector<2x128xf32> to vector<2xf32>
    %152 = vector.shape_cast %151 : vector<2xf32> to vector<2x1xf32>
    %cst_82 = arith.constant 1.280000e+02 : f32
    %153 = vector.broadcast %cst_82 : f32 to vector<2x1xf32>
    %154 = arith.divf %152, %153 : vector<2x1xf32>
    %cst_83 = arith.constant 9.99999974E-6 : f32
    %155 = vector.broadcast %cst_83 : f32 to vector<2x1xf32>
    %156 = arith.addf %154, %155 : vector<2x1xf32>
    %157 = math.rsqrt %156 : vector<2x1xf32>
    %158 = vector.broadcast %157 : vector<2x1xf32> to vector<2x128xf32>
    %159 = arith.mulf %149, %158 : vector<2x128xf32>
    %160 = vector.broadcast %141 : vector<1x128xf32> to vector<2x128xf32>
    %161 = arith.mulf %159, %160 : vector<2x128xf32>
    %162 = vector.broadcast %143 : vector<1x128xf32> to vector<2x128xf32>
    %163 = arith.addf %161, %162 : vector<2x128xf32>
    %cst_84 = arith.constant 0.000000e+00 : f32
    %164 = vector.broadcast %cst_84 : f32 to vector<2x128xf32>
    %165 = arith.maximumf %163, %164 : vector<2x128xf32>
    %166 = arith.truncf %165 : vector<2x128xf32> to vector<2x128xbf16>
    %c1_85 = arith.constant 1 : index
    %c0_86 = arith.constant 0 : index
    %c0_87 = arith.constant 0 : index
    %167 = vector.load %arg8[%c1_85, %c0_86, %c0_87] : memref<3x128x128xbf16, #tpu.memory_space<vmem>>, vector<1x128x128xbf16>
    %168 = vector.shape_cast %167 : vector<1x128x128xbf16> to vector<128x128xbf16>
    %cst_88 = arith.constant dense<0.000000e+00> : vector<2x128xf32>
    %169 = tpu.matmul %166, %168, %cst_88 {dimension_numbers = #tpu.dot_dimension_numbers<[1], [0], [0], [1], [0, 0, 1, 1], [], []>} : vector<2x128xbf16>, vector<128x128xbf16>, vector<2x128xf32> -> vector<2x128xf32>
    %c1_89 = arith.constant 1 : index
    %c0_90 = arith.constant 0 : index
    %c0_91 = arith.constant 0 : index
    %170 = vector.load %arg9[%c1_89, %c0_90, %c0_91] : memref<3x1x128xf32, #tpu.memory_space<vmem>>, vector<1x1x128xf32>
    %171 = vector.shape_cast %170 : vector<1x1x128xf32> to vector<1x128xf32>
    %172 = vector.broadcast %171 : vector<1x128xf32> to vector<2x128xf32>
    %173 = arith.addf %169, %172 : vector<2x128xf32>
    %c1_92 = arith.constant 1 : index
    %c0_93 = arith.constant 0 : index
    %c0_94 = arith.constant 0 : index
    %174 = vector.load %arg10[%c1_92, %c0_93, %c0_94] : memref<3x1x128xf32, #tpu.memory_space<vmem>>, vector<1x1x128xf32>
    %175 = vector.shape_cast %174 : vector<1x1x128xf32> to vector<1x128xf32>
    %c1_95 = arith.constant 1 : index
    %c0_96 = arith.constant 0 : index
    %c0_97 = arith.constant 0 : index
    %176 = vector.load %arg11[%c1_95, %c0_96, %c0_97] : memref<3x1x128xf32, #tpu.memory_space<vmem>>, vector<1x1x128xf32>
    %177 = vector.shape_cast %176 : vector<1x1x128xf32> to vector<1x128xf32>
    %cst_98 = arith.constant dense<0.000000e+00> : vector<2xf32>
    %178 = vector.multi_reduction <add>, %173, %cst_98 [1] : vector<2x128xf32> to vector<2xf32>
    %179 = vector.shape_cast %178 : vector<2xf32> to vector<2x1xf32>
    %cst_99 = arith.constant 1.280000e+02 : f32
    %180 = vector.broadcast %cst_99 : f32 to vector<2x1xf32>
    %181 = arith.divf %179, %180 : vector<2x1xf32>
    %182 = vector.broadcast %181 : vector<2x1xf32> to vector<2x128xf32>
    %183 = arith.subf %173, %182 : vector<2x128xf32>
    %184 = arith.mulf %183, %183 : vector<2x128xf32>
    %cst_100 = arith.constant dense<0.000000e+00> : vector<2xf32>
    %185 = vector.multi_reduction <add>, %184, %cst_100 [1] : vector<2x128xf32> to vector<2xf32>
    %186 = vector.shape_cast %185 : vector<2xf32> to vector<2x1xf32>
    %cst_101 = arith.constant 1.280000e+02 : f32
    %187 = vector.broadcast %cst_101 : f32 to vector<2x1xf32>
    %188 = arith.divf %186, %187 : vector<2x1xf32>
    %cst_102 = arith.constant 9.99999974E-6 : f32
    %189 = vector.broadcast %cst_102 : f32 to vector<2x1xf32>
    %190 = arith.addf %188, %189 : vector<2x1xf32>
    %191 = math.rsqrt %190 : vector<2x1xf32>
    %192 = vector.broadcast %191 : vector<2x1xf32> to vector<2x128xf32>
    %193 = arith.mulf %183, %192 : vector<2x128xf32>
    %194 = vector.broadcast %175 : vector<1x128xf32> to vector<2x128xf32>
    %195 = arith.mulf %193, %194 : vector<2x128xf32>
    %196 = vector.broadcast %177 : vector<1x128xf32> to vector<2x128xf32>
    %197 = arith.addf %195, %196 : vector<2x128xf32>
    %198 = arith.negf %197 : vector<2x128xf32>
    %199 = math.exp %198 : vector<2x128xf32>
    %cst_103 = arith.constant 1.000000e+00 : f32
    %200 = vector.broadcast %cst_103 : f32 to vector<2x128xf32>
    %201 = arith.addf %200, %199 : vector<2x128xf32>
    %202 = arith.divf %200, %201 : vector<2x128xf32>
    %cst_104 = arith.constant 2.000000e+00 : f32
    %203 = vector.broadcast %cst_104 : f32 to vector<2x128xf32>
    %204 = arith.mulf %203, %202 : vector<2x128xf32>
    %205 = arith.mulf %204, %27 : vector<2x128xf32>
    %c0_105 = arith.constant 0 : index
    %c0_106 = arith.constant 0 : index
    %206 = vector.load %arg22[%c0_105, %c0_106] : memref<2x128xf32, #tpu.memory_space<vmem>>, vector<2x128xf32>
    tpu.vector_store %arg22[%c0_105, %c0_106], %205 {strides = array<i32>} : memref<2x128xf32, #tpu.memory_space<vmem>>, vector<2x128xf32>,
    %c1_107 = arith.constant 1 : index
    %c0_108 = arith.constant 0 : index
    %c0_109 = arith.constant 0 : index
    %207 = vector.load %arg12[%c1_107, %c0_108, %c0_109] : memref<3x1x128xf32, #tpu.memory_space<vmem>>, vector<1x1x128xf32>
    %208 = vector.shape_cast %207 : vector<1x1x128xf32> to vector<1x128xf32>
    %209 = vector.broadcast %208 : vector<1x128xf32> to vector<2x128xf32>
    %210 = arith.mulf %205, %209 : vector<2x128xf32>
    %cst_110 = arith.constant dense<0.000000e+00> : vector<2xf32>
    %211 = vector.multi_reduction <add>, %210, %cst_110 [1] : vector<2x128xf32> to vector<2xf32>
    %212 = vector.shape_cast %211 : vector<2xf32> to vector<2x1xf32>
    %c1_111 = arith.constant 1 : index
    %c0_112 = arith.constant 0 : index
    %c0_113 = arith.constant 0 : index
    %213 = vector.load %arg13[%c1_111, %c0_112, %c0_113] : memref<3x1x1xf32, #tpu.memory_space<vmem>>, vector<1x1x1xf32>
    %214 = vector.shape_cast %213 : vector<1x1x1xf32> to vector<1x1xf32>
    %215 = vector.broadcast %214 : vector<1x1xf32> to vector<2x1xf32>
    %216 = arith.addf %212, %215 : vector<2x1xf32>
    %217 = vector.extract_strided_slice %60 {offsets = [0, 256], sizes = [2, 128], strides = [1, 1]} : vector<2x384xf32> to vector<2x128xf32>
    %c2 = arith.constant 2 : index
    %c0_114 = arith.constant 0 : index
    %c0_115 = arith.constant 0 : index
    %218 = vector.load %arg6[%c2, %c0_114, %c0_115] : memref<3x1x128xf32, #tpu.memory_space<vmem>>, vector<1x1x128xf32>
    %219 = vector.shape_cast %218 : vector<1x1x128xf32> to vector<1x128xf32>
    %c2_116 = arith.constant 2 : index
    %c0_117 = arith.constant 0 : index
    %c0_118 = arith.constant 0 : index
    %220 = vector.load %arg7[%c2_116, %c0_117, %c0_118] : memref<3x1x128xf32, #tpu.memory_space<vmem>>, vector<1x1x128xf32>
    %221 = vector.shape_cast %220 : vector<1x1x128xf32> to vector<1x128xf32>
    %cst_119 = arith.constant dense<0.000000e+00> : vector<2xf32>
    %222 = vector.multi_reduction <add>, %217, %cst_119 [1] : vector<2x128xf32> to vector<2xf32>
    %223 = vector.shape_cast %222 : vector<2xf32> to vector<2x1xf32>
    %cst_120 = arith.constant 1.280000e+02 : f32
    %224 = vector.broadcast %cst_120 : f32 to vector<2x1xf32>
    %225 = arith.divf %223, %224 : vector<2x1xf32>
    %226 = vector.broadcast %225 : vector<2x1xf32> to vector<2x128xf32>
    %227 = arith.subf %217, %226 : vector<2x128xf32>
    %228 = arith.mulf %227, %227 : vector<2x128xf32>
    %cst_121 = arith.constant dense<0.000000e+00> : vector<2xf32>
    %229 = vector.multi_reduction <add>, %228, %cst_121 [1] : vector<2x128xf32> to vector<2xf32>
    %230 = vector.shape_cast %229 : vector<2xf32> to vector<2x1xf32>
    %cst_122 = arith.constant 1.280000e+02 : f32
    %231 = vector.broadcast %cst_122 : f32 to vector<2x1xf32>
    %232 = arith.divf %230, %231 : vector<2x1xf32>
    %cst_123 = arith.constant 9.99999974E-6 : f32
    %233 = vector.broadcast %cst_123 : f32 to vector<2x1xf32>
    %234 = arith.addf %232, %233 : vector<2x1xf32>
    %235 = math.rsqrt %234 : vector<2x1xf32>
    %236 = vector.broadcast %235 : vector<2x1xf32> to vector<2x128xf32>
    %237 = arith.mulf %227, %236 : vector<2x128xf32>
    %238 = vector.broadcast %219 : vector<1x128xf32> to vector<2x128xf32>
    %239 = arith.mulf %237, %238 : vector<2x128xf32>
    %240 = vector.broadcast %221 : vector<1x128xf32> to vector<2x128xf32>
    %241 = arith.addf %239, %240 : vector<2x128xf32>
    %cst_124 = arith.constant 0.000000e+00 : f32
    %242 = vector.broadcast %cst_124 : f32 to vector<2x128xf32>
    %243 = arith.maximumf %241, %242 : vector<2x128xf32>
    %244 = arith.truncf %243 : vector<2x128xf32> to vector<2x128xbf16>
    %c2_125 = arith.constant 2 : index
    %c0_126 = arith.constant 0 : index
    %c0_127 = arith.constant 0 : index
    %245 = vector.load %arg8[%c2_125, %c0_126, %c0_127] : memref<3x128x128xbf16, #tpu.memory_space<vmem>>, vector<1x128x128xbf16>
    %246 = vector.shape_cast %245 : vector<1x128x128xbf16> to vector<128x128xbf16>
    %cst_128 = arith.constant dense<0.000000e+00> : vector<2x128xf32>
    %247 = tpu.matmul %244, %246, %cst_128 {dimension_numbers = #tpu.dot_dimension_numbers<[1], [0], [0], [1], [0, 0, 1, 1], [], []>} : vector<2x128xbf16>, vector<128x128xbf16>, vector<2x128xf32> -> vector<2x128xf32>
    %c2_129 = arith.constant 2 : index
    %c0_130 = arith.constant 0 : index
    %c0_131 = arith.constant 0 : index
    %248 = vector.load %arg9[%c2_129, %c0_130, %c0_131] : memref<3x1x128xf32, #tpu.memory_space<vmem>>, vector<1x1x128xf32>
    %249 = vector.shape_cast %248 : vector<1x1x128xf32> to vector<1x128xf32>
    %250 = vector.broadcast %249 : vector<1x128xf32> to vector<2x128xf32>
    %251 = arith.addf %247, %250 : vector<2x128xf32>
    %c2_132 = arith.constant 2 : index
    %c0_133 = arith.constant 0 : index
    %c0_134 = arith.constant 0 : index
    %252 = vector.load %arg10[%c2_132, %c0_133, %c0_134] : memref<3x1x128xf32, #tpu.memory_space<vmem>>, vector<1x1x128xf32>
    %253 = vector.shape_cast %252 : vector<1x1x128xf32> to vector<1x128xf32>
    %c2_135 = arith.constant 2 : index
    %c0_136 = arith.constant 0 : index
    %c0_137 = arith.constant 0 : index
    %254 = vector.load %arg11[%c2_135, %c0_136, %c0_137] : memref<3x1x128xf32, #tpu.memory_space<vmem>>, vector<1x1x128xf32>
    %255 = vector.shape_cast %254 : vector<1x1x128xf32> to vector<1x128xf32>
    %cst_138 = arith.constant dense<0.000000e+00> : vector<2xf32>
    %256 = vector.multi_reduction <add>, %251, %cst_138 [1] : vector<2x128xf32> to vector<2xf32>
    %257 = vector.shape_cast %256 : vector<2xf32> to vector<2x1xf32>
    %cst_139 = arith.constant 1.280000e+02 : f32
    %258 = vector.broadcast %cst_139 : f32 to vector<2x1xf32>
    %259 = arith.divf %257, %258 : vector<2x1xf32>
    %260 = vector.broadcast %259 : vector<2x1xf32> to vector<2x128xf32>
    %261 = arith.subf %251, %260 : vector<2x128xf32>
    %262 = arith.mulf %261, %261 : vector<2x128xf32>
    %cst_140 = arith.constant dense<0.000000e+00> : vector<2xf32>
    %263 = vector.multi_reduction <add>, %262, %cst_140 [1] : vector<2x128xf32> to vector<2xf32>
    %264 = vector.shape_cast %263 : vector<2xf32> to vector<2x1xf32>
    %cst_141 = arith.constant 1.280000e+02 : f32
    %265 = vector.broadcast %cst_141 : f32 to vector<2x1xf32>
    %266 = arith.divf %264, %265 : vector<2x1xf32>
    %cst_142 = arith.constant 9.99999974E-6 : f32
    %267 = vector.broadcast %cst_142 : f32 to vector<2x1xf32>
    %268 = arith.addf %266, %267 : vector<2x1xf32>
    %269 = math.rsqrt %268 : vector<2x1xf32>
    %270 = vector.broadcast %269 : vector<2x1xf32> to vector<2x128xf32>
    %271 = arith.mulf %261, %270 : vector<2x128xf32>
    %272 = vector.broadcast %253 : vector<1x128xf32> to vector<2x128xf32>
    %273 = arith.mulf %271, %272 : vector<2x128xf32>
    %274 = vector.broadcast %255 : vector<1x128xf32> to vector<2x128xf32>
    %275 = arith.addf %273, %274 : vector<2x128xf32>
    %276 = arith.negf %275 : vector<2x128xf32>
    %277 = math.exp %276 : vector<2x128xf32>
    %cst_143 = arith.constant 1.000000e+00 : f32
    %278 = vector.broadcast %cst_143 : f32 to vector<2x128xf32>
    %279 = arith.addf %278, %277 : vector<2x128xf32>
    %280 = arith.divf %278, %279 : vector<2x128xf32>
    %cst_144 = arith.constant 2.000000e+00 : f32
    %281 = vector.broadcast %cst_144 : f32 to vector<2x128xf32>
    %282 = arith.mulf %281, %280 : vector<2x128xf32>
    %283 = arith.mulf %282, %27 : vector<2x128xf32>
    %c0_145 = arith.constant 0 : index
    %c0_146 = arith.constant 0 : index
    %284 = vector.load %arg23[%c0_145, %c0_146] : memref<2x128xf32, #tpu.memory_space<vmem>>, vector<2x128xf32>
    tpu.vector_store %arg23[%c0_145, %c0_146], %283 {strides = array<i32>} : memref<2x128xf32, #tpu.memory_space<vmem>>, vector<2x128xf32>,
    %c2_147 = arith.constant 2 : index
    %c0_148 = arith.constant 0 : index
    %c0_149 = arith.constant 0 : index
    %285 = vector.load %arg12[%c2_147, %c0_148, %c0_149] : memref<3x1x128xf32, #tpu.memory_space<vmem>>, vector<1x1x128xf32>
    %286 = vector.shape_cast %285 : vector<1x1x128xf32> to vector<1x128xf32>
    %287 = vector.broadcast %286 : vector<1x128xf32> to vector<2x128xf32>
    %288 = arith.mulf %283, %287 : vector<2x128xf32>
    %cst_150 = arith.constant dense<0.000000e+00> : vector<2xf32>
    %289 = vector.multi_reduction <add>, %288, %cst_150 [1] : vector<2x128xf32> to vector<2xf32>
    %290 = vector.shape_cast %289 : vector<2xf32> to vector<2x1xf32>
    %c2_151 = arith.constant 2 : index
    %c0_152 = arith.constant 0 : index
    %c0_153 = arith.constant 0 : index
    %291 = vector.load %arg13[%c2_151, %c0_152, %c0_153] : memref<3x1x1xf32, #tpu.memory_space<vmem>>, vector<1x1x1xf32>
    %292 = vector.shape_cast %291 : vector<1x1x1xf32> to vector<1x1xf32>
    %293 = vector.broadcast %292 : vector<1x1xf32> to vector<2x1xf32>
    %294 = arith.addf %290, %293 : vector<2x1xf32>
    %cst_154 = arith.constant 0.000000e+00 : f32
    %295 = vector.broadcast %cst_154 : f32 to vector<2x125xf32>
    %296 = tpu.concatenate %138, %216, %294, %295 in 1 : vector<2x1xf32>, vector<2x1xf32>, vector<2x1xf32>, vector<2x125xf32> -> vector<2x128xf32>
    %c0_155 = arith.constant 0 : index
    %c0_156 = arith.constant 0 : index
    %297 = vector.load %arg19[%c0_155, %c0_156] : memref<2x128xf32, #tpu.memory_space<vmem>>, vector<2x128xf32>
    tpu.vector_store %arg19[%c0_155, %c0_156], %296 {strides = array<i32>} : memref<2x128xf32, #tpu.memory_space<vmem>>, vector<2x128xf32>,
    %298 = arith.truncf %127 : vector<2x128xf32> to vector<2x128xbf16>
    %c0_157 = arith.constant 0 : index
    %c0_158 = arith.constant 0 : index
    %299 = vector.load %arg14[%c0_157, %c0_158] : memref<128x128xbf16, #tpu.memory_space<vmem>>, vector<128x128xbf16>
    %cst_159 = arith.constant dense<0.000000e+00> : vector<2x128xf32>
    %300 = tpu.matmul %298, %299, %cst_159 {dimension_numbers = #tpu.dot_dimension_numbers<[1], [0], [0], [1], [0, 0, 1, 1], [], []>} : vector<2x128xbf16>, vector<128x128xbf16>, vector<2x128xf32> -> vector<2x128xf32>
    %c0_160 = arith.constant 0 : index
    %c0_161 = arith.constant 0 : index
    %301 = vector.load %arg15[%c0_160, %c0_161] : memref<1x128xf32, #tpu.memory_space<vmem>>, vector<1x128xf32>
    %302 = vector.broadcast %301 : vector<1x128xf32> to vector<2x128xf32>
    %303 = arith.addf %300, %302 : vector<2x128xf32>
    %cst_162 = arith.constant 0.000000e+00 : f32
    %304 = vector.broadcast %cst_162 : f32 to vector<2x128xf32>
    %305 = arith.maximumf %303, %304 : vector<2x128xf32>
    %306 = arith.truncf %305 : vector<2x128xf32> to vector<2x128xbf16>
    %c0_163 = arith.constant 0 : index
    %c0_164 = arith.constant 0 : index
    %307 = vector.load %arg16[%c0_163, %c0_164] : memref<128x128xbf16, #tpu.memory_space<vmem>>, vector<128x128xbf16>
    %cst_165 = arith.constant dense<0.000000e+00> : vector<2x128xf32>
    %308 = tpu.matmul %306, %307, %cst_165 {dimension_numbers = #tpu.dot_dimension_numbers<[1], [0], [0], [1], [0, 0, 1, 1], [], []>} : vector<2x128xbf16>, vector<128x128xbf16>, vector<2x128xf32> -> vector<2x128xf32>
    %c0_166 = arith.constant 0 : index
    %c0_167 = arith.constant 0 : index
    %309 = vector.load %arg17[%c0_166, %c0_167] : memref<1x128xf32, #tpu.memory_space<vmem>>, vector<1x128xf32>
    %310 = vector.broadcast %309 : vector<1x128xf32> to vector<2x128xf32>
    %311 = arith.addf %308, %310 : vector<2x128xf32>
    %c0_168 = arith.constant 0 : index
    %c0_169 = arith.constant 0 : index
    %312 = vector.load %arg18[%c0_168, %c0_169] : memref<2x128xf32, #tpu.memory_space<vmem>>, vector<2x128xf32>
    tpu.vector_store %arg18[%c0_168, %c0_169], %311 {strides = array<i32>} : memref<2x128xf32, #tpu.memory_space<vmem>>, vector<2x128xf32>,
    return
  }
}

</mosaic_0001>

<bundles_post_ra>
// kernel: forward.3
= control target key start
LH: loop header
LB: loop body
LE: loop exit
PB: predicated region body
PF: predicated region fallthrough
CT: control target
= control target key end

     0   :  { %v728_v63 = vmov 0.0   ;;  %s948_s1 = inlined_call_operand.vmem [shape: bf16[768,128], index: 1, kind: input, shape index: {}]   ;;  %s949_s0 = inlined_call_operand.vmem [shape: f32[8,768], index: 0, kind: input, shape index: {}]   ;;  %s950_s3 = inlined_call_operand.vmem [shape: f32[1,128], index: 3, kind: input, shape index: {}]   ;;  %s951_s4 = inlined_call_operand.vmem [shape: f32[5,128], index: 4, kind: input, shape index: {}]   ;;  %s952_s5 = inlined_call_operand.vmem [shape: f32[16,128], index: 5, kind: output, shape index: {}]   ;;  %s953_s2 = inlined_call_operand.vmem [shape: f32[1,128], index: 2, kind: input, shape index: {}]  }
   0x1   :  { %v680_v0 = vld [vmem:[%s948_s1 + $0x40] sm:$0xff]   ;;  %v684_v4 = vld [vmem:[%s948_s1 + $0x48] sm:$0xff]   ;;  %v688_v8 = vld [vmem:[%s948_s1 + $0x50] sm:$0xff]   ;;  %547 = vst [vmem:[%s952_s5] sm:$0xff] %v728_v63 }
   0x2   :  { %v681_v1 = vld [vmem:[%s948_s1] sm:$0xff]   ;;  %613 = vmatprep.subr.bf16.mxu0 %v680_v0  ;;  %v685_v5 = vld [vmem:[%s948_s1 + $0x8] sm:$0xff]   ;;  %v689_v9 = vld [vmem:[%s948_s1 + $0x10] sm:$0xff]   ;;  %548 = vst [vmem:[%s952_s5 + $0x8] sm:$0xff] %v728_v63 }
   0x3   :  { %v682_v2 = vld [vmem:[%s948_s1 + $0xc0] sm:$0xff]   ;;  %614 = vmatpush3.bf16.msra.mxu0 %v681_v1  ;;  %v686_v6 = vld [vmem:[%s948_s1 + $0xc8] sm:$0xff]   ;;  %v690_v10 = vld [vmem:[%s948_s1 + $0xd0] sm:$0xff]  }
   0x4   :  { %v683_v3 = vld [vmem:[%s948_s1 + $0x80] sm:$0xff]   ;;  %635 = vmatprep.subr.bf16.mxu1 %v682_v2  ;;  %615 = vmatprep.subr.bf16.mxu0 %v684_v4  ;;  %v687_v7 = vld [vmem:[%s948_s1 + $0x88] sm:$0xff]   ;;  %v691_v11 = vld [vmem:[%s948_s1 + $0x90] sm:$0xff]  }
   0x5   :  { %636 = vmatpush3.bf16.msra.mxu1 %v683_v3  ;;  %v692_v12 = vld [vmem:[%s948_s1 + $0x58] sm:$0xff]   ;;  %v696_v16 = vld [vmem:[%s948_s1 + $0x60] sm:$0xff]   ;;  %v700_v20 = vld [vmem:[%s948_s1 + $0x68] sm:$0xff]  }
   0x6   :  { %637 = vmatprep.subr.bf16.mxu1 %v686_v6  ;;  %v693_v13 = vld [vmem:[%s948_s1 + $0x18] sm:$0xff]   ;;  %v697_v17 = vld [vmem:[%s948_s1 + $0x20] sm:$0xff]   ;;  %v701_v21 = vld [vmem:[%s948_s1 + $0x28] sm:$0xff]  }
   0x7   :  { %616 = vmatpush3.bf16.msra.mxu0 %v685_v5  ;;  %v694_v14 = vld [vmem:[%s948_s1 + $0xd8] sm:$0xff]   ;;  %v698_v18 = vld [vmem:[%s948_s1 + $0xe0] sm:$0xff]   ;;  %v702_v22 = vld [vmem:[%s948_s1 + $0xe8] sm:$0xff]  }
   0x8   :  { %617 = vmatprep.subr.bf16.mxu0 %v688_v8  ;;  %v695_v15 = vld [vmem:[%s948_s1 + $0x98] sm:$0xff]   ;;  %v699_v19 = vld [vmem:[%s948_s1 + $0xa0] sm:$0xff]   ;;  %v703_v23 = vld [vmem:[%s948_s1 + $0xa8] sm:$0xff]  }
   0x9   :  { %638 = vmatpush3.bf16.msra.mxu1 %v687_v7  ;;  %v704_v24 = vld [vmem:[%s948_s1 + $0x70] sm:$0xff]   ;;  %v708_v28 = vld [vmem:[%s948_s1 + $0x78] sm:$0xff]   ;;  %v22_v31 = vld [vmem:[%s949_s0 + $0x8] sm:$0xff] }
   0xa   :  { %639 = vmatprep.subr.bf16.mxu1 %v690_v10  ;;  %v705_v25 = vld [vmem:[%s948_s1 + $0x30] sm:$0xff]   ;;  %v709_v29 = vld [vmem:[%s948_s1 + $0x38] sm:$0xff]   ;;  %v28_v32 = vpack.c.bf16 %v22_v31, %v22_v31  ;;  %v21_v34 = vld [vmem:[%s949_s0] sm:$0xff] }
   0xb   :  { %618 = vmatpush3.bf16.msra.mxu0 %v689_v9  ;;  %v706_v26 = vld [vmem:[%s948_s1 + $0xf0] sm:$0xff]   ;;  %v710_v30 = vld [vmem:[%s948_s1 + $0xf8] sm:$0xff]   ;;  %v27_v35 = vpack.c.bf16 %v21_v34, %v21_v34  ;;  %v712_v36 = vld [vmem:[%s948_s1 + $0x140] sm:$0xff]  }
   0xc   :  { %619 = vmatprep.subr.bf16.mxu0 %v692_v12  ;;  %v707_v27 = vld [vmem:[%s948_s1 + $0xb0] sm:$0xff]   ;;  %v711_v33 = vld [vmem:[%s948_s1 + $0xb8] sm:$0xff]   ;;  %456 = vmatprep.mubr.bf16.mxu0 %v28_v32  ;;  %v713_v39 = vld [vmem:[%s948_s1 + $0x100] sm:$0xff]  }
   0xd   :  { %640 = vmatpush3.bf16.msra.mxu1 %v691_v11  ;;  %v24_v37 = vld [vmem:[%s949_s0 + $0x18] sm:$0xff]  ;;  %v23_v40 = vld [vmem:[%s949_s0 + $0x10] sm:$0xff]  ;;  %v714_v42 = vld [vmem:[%s948_s1 + $0x148] sm:$0xff]  }
   0xe   :  { %641 = vmatprep.subr.bf16.mxu1 %v694_v14  ;;  %v30_v38 = vpack.c.bf16 %v24_v37, %v24_v37  ;;  %v29_v41 = vpack.c.bf16 %v23_v40, %v23_v40  ;;  %v715_v43 = vld [vmem:[%s948_s1 + $0x108] sm:$0xff]   ;;  %v716_v44 = vld [vmem:[%s948_s1 + $0x150] sm:$0xff]   ;;  %v718_v46 = vld [vmem:[%s948_s1 + $0x158] sm:$0xff]  }
   0xf   :  { %620 = vmatpush3.bf16.msra.mxu0 %v693_v13  ;;  %v717_v45 = vld [vmem:[%s948_s1 + $0x110] sm:$0xff]   ;;  %v719_v47 = vld [vmem:[%s948_s1 + $0x118] sm:$0xff]   ;;  %v720_v48 = vld [vmem:[%s948_s1 + $0x160] sm:$0xff]  }
  0x10   :  { %621 = vmatprep.subr.bf16.mxu0 %v696_v16  ;;  %496 = vmatprep.mubr.bf16.mxu1 %v30_v38  ;;  %v721_v49 = vld [vmem:[%s948_s1 + $0x120] sm:$0xff]   ;;  %v722_v50 = vld [vmem:[%s948_s1 + $0x168] sm:$0xff]   ;;  %v724_v54 = vld [vmem:[%s948_s1 + $0x170] sm:$0xff]  }
  0x11   :  { %642 = vmatpush3.bf16.msra.mxu1 %v695_v15  ;;  %v26_v51 = vld [vmem:[%s949_s0 + $0x28] sm:$0xff]  ;;  %v725_v55 = vld [vmem:[%s948_s1 + $0x130] sm:$0xff]   ;;  %v726_v56 = vld [vmem:[%s948_s1 + $0x178] sm:$0xff]  }
  0x12   :  { %643 = vmatprep.subr.bf16.mxu1 %v698_v18  ;;  %v32_v52 = vpack.c.bf16 %v26_v51, %v26_v51  ;;  %v723_v53 = vld [vmem:[%s948_s1 + $0x128] sm:$0xff]   ;;  %v727_v57 = vld [vmem:[%s948_s1 + $0x138] sm:$0xff]   ;;  %v25_v58 = vld [vmem:[%s949_s0 + $0x20] sm:$0xff] }
  0x13   :  { %622 = vmatpush3.bf16.msra.mxu0 %v697_v17  ;;  %v31_v59 = vpack.c.bf16 %v25_v58, %v25_v58  ;;  %v544_v60 = vld [vmem:[%s951_s4] sm:$0x1f] }
  0x14   :  { %623 = vmatprep.subr.bf16.mxu0 %v700_v20  ;;  %v545_v61 = vld [vmem:[%s950_s3] sm:$0x1]  ;;  %v551_v16 = vrot.slane %v544_v60, 1  ;;  %v556_v17 = vrot.slane %v544_v60, 5 }
  0x15   :  { %644 = vmatpush3.bf16.msra.mxu1 %v699_v19  ;;  %v546_v62 = vadd.f32 %v545_v61, %v544_v60  ;;  %v564_v1 = vld [vmem:[%s953_s2] ss:$0 sm:$0xff] }
  0x16   :  { %645 = vmatprep.subr.bf16.mxu1 %v702_v22 }
  0x17   :  { %624 = vmatpush3.bf16.msra.mxu0 %v701_v21  ;;  %549 = vst [vmem:[%s952_s5] sm:$0x1] %v546_v62  ;;  %555 = vst [vmem:[%s952_s5 + $0x8] sm:$0x1] %v546_v62 }
  0x18   :  { %625 = vmatprep.subr.bf16.mxu0 %v704_v24 }
  0x19   :  { %646 = vmatpush3.bf16.msra.mxu1 %v703_v23 }
  0x1a   :  { %647 = vmatprep.subr.bf16.mxu1 %v706_v26 }
  0x1b   :  { %626 = vmatpush3.bf16.msra.mxu0 %v705_v25 }
  0x1c   :  { %627 = vmatprep.subr.bf16.mxu0 %v708_v28 }
  0x1d   :  { %648 = vmatpush3.bf16.msra.mxu1 %v707_v27 }
  0x1e   :  { %649 = vmatprep.subr.bf16.mxu1 %v710_v30 }
  0x1f   :  { %628 = vmatpush3.bf16.msra.mxu0 %v709_v29 }
  0x20   :  { %657 = vmatprep.subr.bf16.mxu0 %v712_v36 }
  0x21   :  { %650 = vmatpush3.bf16.msra.mxu1 %v711_v33 }
  0x22   :  { %457 = vmatmul.mubr.bf16.vlgmr.msra.gmra.mrb[0].mxu0 %v27_v35 }
  0x23   :  { %658 = vmatpush3.bf16.msra.mxu0 %v713_v39  ;;  %536 = vmatprep.mubr.bf16.mxu0 %v32_v52 }
  0x24   :  { %497 = vmatmul.mubr.bf16.vlgmr.msra.gmra.mrb[0].mxu1 %v29_v41  ;;  %659 = vmatprep.subr.bf16.mxu0 %v714_v42 }
  0x27   :  { %660 = vmatpush3.bf16.msra.mxu0 %v715_v43 }
  0x28   :  { %661 = vmatprep.subr.bf16.mxu0 %v716_v44 }
  0x2b   :  { %662 = vmatpush3.bf16.msra.mxu0 %v717_v45 }
  0x2c   :  { %663 = vmatprep.subr.bf16.mxu0 %v718_v46 }
  0x2f   :  { %664 = vmatpush3.bf16.msra.mxu0 %v719_v47 }
  0x30   :  { %665 = vmatprep.subr.bf16.mxu0 %v720_v48 }
  0x33   :  { %666 = vmatpush3.bf16.msra.mxu0 %v721_v49 }
  0x34   :  { %667 = vmatprep.subr.bf16.mxu0 %v722_v50 }
  0x37   :  { %668 = vmatpush3.bf16.msra.mxu0 %v723_v53 }
  0x38   :  { %669 = vmatprep.subr.bf16.mxu0 %v724_v54 }
  0x3b   :  { %670 = vmatpush3.bf16.msra.mxu0 %v725_v55 }
  0x3c   :  { %671 = vmatprep.subr.bf16.mxu0 %v726_v56 }
  0x3f   :  { %672 = vmatpush3.bf16.msra.mxu0 %v727_v57 }
  0x42   :  { %537 = vmatmul.mubr.bf16.vlgmr.msra.gmra.mrb[4].mxu0 %v31_v59 }
  0xf5   :  { %v629_v0 = vpop.f32.mrb[0].mxu0 }
  0xf6   :  { %v630_v2 = vpop.f32.mrb[1].mxu0 }
  0xf7   :  { %v631_v3 = vadd.f32 %v630_v2, %v629_v0  ;;  %v632_v4 = vpop.f32.mrb[2].mxu0  ;;  %v651_v5 = vpop.f32.mrb[0].mxu1 }
  0xf8   :  { %v633_v6 = vpop.f32.mrb[3].mxu0  ;;  %v652_v8 = vpop.f32.mrb[1].mxu1 }
  0xf9   :  { %v459_v7 = vadd.f32 %v631_v3, %v564_v1  ;;  %v653_v9 = vadd.f32 %v652_v8, %v651_v5  ;;  %v654_v10 = vpop.f32.mrb[2].mxu1 }
  0xfa   :  { %v655_v11 = vpop.f32.mrb[3].mxu1 }
  0xfb   :  { %v499_v12 = vadd.f32 %v653_v9, %v459_v7 }
 0x115   :  { %v673_v13 = vpop.f32.mrb[4].mxu0 }
 0x116   :  { %v674_v14 = vpop.f32.mrb[5].mxu0 }
 0x117   :  { %v675_v15 = vadd.f32 %v674_v14, %v673_v13  ;;  %v676_v18 = vpop.f32.mrb[6].mxu0 }
 0x118   :  { %v677_v19 = vpop.f32.mrb[7].mxu0 }
 0x119   :  { %v539_v20 = vadd.f32 %v675_v15, %v499_v12 }
 0x11b   :  { %v553_v21 = vadd.f32 %v551_v16, %v539_v20  ;;  %v558_v22 = vadd.f32 %v556_v17, %v539_v20 }
 0x11d   :  { %554 = vst [vmem:[%s952_s5 + $0x1] sm:$0xf] %v553_v21  ;;  %559 = vst [vmem:[%s952_s5 + $0x5] sm:$0xf0] %v558_v22 }

// kernel: forward.5
= control target key start
LH: loop header
LB: loop body
LE: loop exit
PB: predicated region body
PF: predicated region fallthrough
CT: control target
= control target key end

     0   :  { %s2522_s0 = inlined_call_operand.vmem [shape: f32[2,8,128], index: 0, kind: input, shape index: {}]   ;;  %s2523_s1 = inlined_call_operand.vmem [shape: f32[2,8,128], index: 1, kind: input, shape index: {}]   ;;  %s2524_s2 = inlined_call_operand.vmem [shape: f32[1,128], index: 2, kind: input, shape index: {}]   ;;  %s2525_s3 = inlined_call_operand.vmem [shape: f32[1,128], index: 3, kind: input, shape index: {}]   ;;  %s2526_s4 = inlined_call_operand.vmem [shape: bf16[128,384], index: 4, kind: input, shape index: {}]   ;;  %s2527_s5 = inlined_call_operand.vmem [shape: f32[1,384], index: 5, kind: input, shape index: {}]   ;;  %s2528_s6 = inlined_call_operand.vmem [shape: f32[3,1,128], index: 6, kind: input, shape index: {}]   ;;  %s2529_s7 = inlined_call_operand.vmem [shape: f32[3,1,128], index: 7, kind: input, shape index: {}]   ;;  %s2530_s8 = inlined_call_operand.vmem [shape: bf16[3,128,128], index: 8, kind: input, shape index: {}]   ;;  %s2531_s9 = inlined_call_operand.vmem [shape: f32[3,1,128], index: 9, kind: input, shape index: {}]   ;;  %s2532_s10 = inlined_call_operand.vmem [shape: f32[3,1,128], index: 10, kind: input, shape index: {}]   ;;  %s2533_s11 = inlined_call_operand.vmem [shape: f32[3,1,128], index: 11, kind: input, shape index: {}]   ;;  %s2534_s12 = inlined_call_operand.vmem [shape: f32[3,1,128], index: 12, kind: input, shape index: {}]   ;;  %s2535_s13 = inlined_call_operand.vmem [shape: f32[3,1,1], index: 13, kind: input, shape index: {}]   ;;  %s2536_s14 = inlined_call_operand.vmem [shape: bf16[128,128], index: 14, kind: input, shape index: {}]   ;;  %s2537_s15 = inlined_call_operand.vmem [shape: f32[1,128], index: 15, kind: input, shape index: {}]   ;;  %s2538_s16 = inlined_call_operand.vmem [shape: bf16[128,128], index: 16, kind: input, shape index: {}]   ;;  %s2539_s17 = inlined_call_operand.vmem [shape: f32[1,128], index: 17, kind: input, shape index: {}]   ;;  %s2540_s18 = inlined_call_operand.hbm [shape: f32[2,128], index: 18, kind: output, shape index: {0}]   ;;  %s2541_s19 = inlined_call_operand.vmem [shape: f32[2,128], index: 19, kind: output, shape index: {1}]   ;;  %s2542_s20 = inlined_call_operand.hbm [shape: f32[2,128], index: 20, kind: output, shape index: {2}]   ;;  %s2543_s21 = inlined_call_operand.hbm [shape: f32[2,128], index: 21, kind: output, shape index: {3}]   ;;  %s2544_s22 = inlined_call_operand.vmem [shape: f32[2,128], index: 22, kind: output, shape index: {4}]   ;;  %s2545_s23 = inlined_call_operand.hbm [shape: f32[2,128], index: 23, kind: output, shape index: {5}]  }
   0x1   :  { %2551 = sst [smem:[#allocation12_spill]] %s2522_s0 }
   0x2   :  { %2552 = sst [smem:[#allocation13_spill]] %s2523_s1 }
   0x3   :  { %2553 = sst [smem:[#allocation14_spill]] %s2524_s2 }
   0x4   :  { %2554 = sst [smem:[#allocation15_spill]] %s2525_s3 }
   0x5   :  { %2555 = sst [smem:[#allocation16_spill]] %s2526_s4 }
   0x6   :  { %2556 = sst [smem:[#allocation17_spill]] %s2527_s5 }
   0x7   :  { %2557 = sst [smem:[#allocation18_spill]] %s2528_s6 }
   0x8   :  { %2558 = sst [smem:[#allocation19_spill]] %s2529_s7 }
   0x9   :  { %29 = vsyncpa [#allocation3], 0 }
   0xa   :  { %30 = vsyncpa [#allocation5], 0  ;;  %s2559_s24 = sld [smem:[#allocation13_spill]]  ;;  %vm79_vm0 = vcmask 1043456   ;;  %vm100_vm1 = vcmask 1041409   ;;  %vm103_vm2 = vcmask 1041408  }
  0x10   :  { %v71_v0 = vld [vmem:[%s2559_s24] sm:$0xff]  ;;  %v72_v1 = vld [vmem:[%s2559_s24 + $0x8] sm:$0xff] }
  0x11   :  { %v152_v2 = vrot.slane %v71_v0, 1  ;;  %v153_v3 = vrot.slane %v72_v1, 1 }
  0x13   :  { %v156_v4 = vsel %vm79_vm0, %v152_v2, 0.0  ;;  %v163_v5 = vsel %vm79_vm0, %v153_v3, 0.0 }
  0x14   :  { %v157_v6 = vrot.slane %v156_v4, 4  ;;  %v164_v7 = vrot.slane %v163_v5, 4 }
  0x16   :  { %v158_v8 = vadd.f32 %v157_v6, %v156_v4  ;;  %v165_v9 = vadd.f32 %v164_v7, %v163_v5 }
  0x18   :  { %v159_v10 = vrot.slane %v158_v8, 2  ;;  %v166_v11 = vrot.slane %v165_v9, 2 }
  0x1a   :  { %v160_v12 = vadd.f32 %v159_v10, %v158_v8  ;;  %v167_v13 = vadd.f32 %v166_v11, %v165_v9 }
  0x1c   :  { %v161_v14 = vrot.slane %v160_v12, 1  ;;  %v168_v15 = vrot.slane %v167_v13, 1 }
  0x1e   :  { %v162_v16 = vadd.f32 %v161_v14, %v160_v12  ;;  %v169_v17 = vadd.f32 %v168_v15, %v167_v13 }
  0x20   :  { %v170_v18 = vmul.f32 0.25, %v162_v16  ;;  %v171_v19 = vmul.f32 0.25, %v169_v17 }
  0x22   :  { %v174_v20 = vsel %vm100_vm1, %v171_v19, %v170_v18 }
  0x23   :  { %v176_v21 = vsel %vm103_vm2, %v174_v20, 0.0 }
  0x24   :  { %177 = vadd.xlane.f32.xlu0 %v176_v21 }
  0x25   :  { %31 = vsyncpa [#allocation8], 0  ;;  %s2560_s2 = sld [smem:[#allocation16_spill]]  ;;  %v1915_v35 = vmov 0.0   ;;  %v1916_v52 = vmov 0   ;;  %vm1917_vm3 = vmmov 0   ;;  %v251_v14 = vlaneseq }
  0x26   :  { %1592 = vmatprep.subr.bf16.mxu1 %v1915_v35  ;;  %434 = vmatprep.mubr.bf16.mxu0 %v1916_v52  ;;  %s2561_s0 = sld [smem:[#allocation14_spill]]  ;;  %s2562_s30 = sld [smem:[#allocation15_spill]]  ;;  %v1757_v52 = vld [vmem:[%s2530_s8 + $0x10] sm:$0xff]  }
  0x27   :  { %1608 = vmatprep.mubr.msk.bf16.mxu1 %vm1917_vm3, %v1915_v35  ;;  %v252_v15 = vshrl.u32 %v251_v14, 7  ;;  %s2563_s5 = sld [smem:[#allocation17_spill]]  ;;  %s2564_s7 = sld [smem:[#allocation12_spill]] }
  0x28   :  { %s1919_s24 = smov 2   ;;  %s1920_s25 = smov [#allocation4]  }
  0x29   :  { %v253_v16 = vsub.s32 0, %v252_v15  ;;  %s1355_s1 = sshll.u32 %s1920_s25, 4  ;;  %s1356_s1 = int_to_ptr.vmem [resolvable:$true] %s1355_s1 }
  0x2a   :  { %p1826_p1 = scmp.lt.s32.totalorder %s1356_s1, %s1356_s1 }
  0x2b   :  { %v1721_v32 = vld [vmem:[%s2560_s2 + $0x4] ss:$12 sps:$4 sm:$0xff]   ;;  %v1723_v33 = vld [vmem:[%s2560_s2] ss:$12 sps:$4 sm:$0xff]   ;;  %v1724_v34 = vld [vmem:[%s2560_s2 + $0x8] ss:$12 sps:$4 sm:$0xff]  }
  0x2c   :  { %402 = vmatprep.subr.bf16.mxu0 %v1721_v32  ;;  %1593 = vmatpush3.bf16.msra.mxu1 %v1724_v34  ;;  %v1725_v36 = vld [vmem:[%s2560_s2 + $0x1c] ss:$12 sps:$4 sm:$0xff]   ;;  %v1727_v37 = vld [vmem:[%s2560_s2 + $0x18] ss:$12 sps:$4 sm:$0xff]   ;;  %v1728_v38 = vld [vmem:[%s2560_s2 + $0x20] ss:$12 sps:$4 sm:$0xff]  }
  0x2d   :  { %403 = vmatpush1.bf16.msra.mxu0 %v1723_v33  ;;  %1594 = vmatprep.subr.bf16.mxu1 %v1915_v35  ;;  %v1729_v39 = vld [vmem:[%s2560_s2 + $0x34] ss:$12 sps:$4 sm:$0xff]   ;;  %v1731_v40 = vld [vmem:[%s2560_s2 + $0x30] ss:$12 sps:$4 sm:$0xff]   ;;  %v1732_v41 = vld [vmem:[%s2560_s2 + $0x38] ss:$12 sps:$4 sm:$0xff]  }
  0x2e   :  { %404 = vmatprep.subr.bf16.mxu0 %v1725_v36  ;;  %v1733_v42 = vld [vmem:[%s2560_s2 + $0x4c] ss:$12 sps:$4 sm:$0xff]   ;;  %v1735_v43 = vld [vmem:[%s2560_s2 + $0x48] ss:$12 sps:$4 sm:$0xff]   ;;  %v1736_v44 = vld [vmem:[%s2560_s2 + $0x50] ss:$12 sps:$4 sm:$0xff]  }
  0x2f   :  { %v1737_v45 = vld [vmem:[%s2560_s2 + $0x64] ss:$12 sps:$4 sm:$0xff]   ;;  %v1739_v46 = vld [vmem:[%s2560_s2 + $0x60] ss:$12 sps:$4 sm:$0xff]   ;;  %v1740_v47 = vld [vmem:[%s2560_s2 + $0x68] ss:$12 sps:$4 sm:$0xff]  }
  0x30   :  { %1595 = vmatpush3.bf16.msra.mxu1 %v1728_v38  ;;  %v1741_v48 = vld [vmem:[%s2560_s2 + $0x7c] ss:$12 sps:$4 sm:$0xff]   ;;  %v1743_v49 = vld [vmem:[%s2560_s2 + $0x78] ss:$12 sps:$4 sm:$0xff]   ;;  %v1744_v50 = vld [vmem:[%s2560_s2 + $0x80] ss:$12 sps:$4 sm:$0xff]  }
  0x31   :  { %405 = vmatpush1.bf16.msra.mxu0 %v1727_v37  ;;  %1596 = vmatprep.subr.bf16.mxu1 %v1915_v35  ;;  %v1745_v51 = vld [vmem:[%s2560_s2 + $0x94] ss:$12 sps:$4 sm:$0xff]   ;;  %v1747_v53 = vld [vmem:[%s2560_s2 + $0x90] ss:$12 sps:$4 sm:$0xff]   ;;  %v1748_v54 = vld [vmem:[%s2560_s2 + $0x98] ss:$12 sps:$4 sm:$0xff]  }
  0x32   :  { %406 = vmatprep.subr.bf16.mxu0 %v1729_v39  ;;  %v1749_v55 = vld [vmem:[%s2560_s2 + $0xac] ss:$12 sps:$4 sm:$0xff]   ;;  %v1751_v56 = vld [vmem:[%s2560_s2 + $0xa8] ss:$12 sps:$4 sm:$0xff]   ;;  %v1752_v57 = vld [vmem:[%s2560_s2 + $0xb0] ss:$12 sps:$4 sm:$0xff]  }
  0x33   :  { %v2151_v62 = vld [vmem:[%s2561_s0] ss:$0 sm:$0xff]  ;;  %v1755_v36 = vld [vmem:[%s2530_s8 + $0x8] sm:$0xff]   ;;  %v261_v38 = vsub.s32 2, %v252_v15  ;;  %s2565_s2 = sld [smem:[#allocation18_spill]] }
  0x34   :  { %1597 = vmatpush3.bf16.msra.mxu1 %v1732_v41  ;;  %v2157_v1 = vld [vmem:[%s2562_s30] ss:$0 sm:$0xff]  ;;  %v1756_v37 = vld [vmem:[%s2530_s8 + $0x48] sm:$0xff]  }
  0x35   :  { %407 = vmatpush1.bf16.msra.mxu0 %v1731_v40  ;;  %1598 = vmatprep.subr.bf16.mxu1 %v1915_v35  ;;  %v249_v17 = vld [vmem:[%s2563_s5] sm:$0x7]  ;;  %s2566_s5 = sld [smem:[#allocation19_spill]] }
  0x36   :  { %408 = vmatprep.subr.bf16.mxu0 %v1733_v42  ;;  %v1753_v33 = vld [vmem:[%s2530_s8] sm:$0xff]  }
  0x37   :  { %v1754_v34 = vld [vmem:[%s2530_s8 + $0x40] sm:$0xff]  }
  0x38   :  { %1599 = vmatpush3.bf16.msra.mxu1 %v1736_v44 }
  0x39   :  { %409 = vmatpush1.bf16.msra.mxu0 %v1735_v43  ;;  %1600 = vmatprep.subr.bf16.mxu1 %v1915_v35  ;;  %v262_v43 = vrot.slane %v249_v17, %v261_v38 }
  0x3a   :  { %410 = vmatprep.subr.bf16.mxu0 %v1737_v45 }
  0x3c   :  { %1601 = vmatpush3.bf16.msra.mxu1 %v1740_v47 }
  0x3d   :  { %411 = vmatpush1.bf16.msra.mxu0 %v1739_v46  ;;  %1602 = vmatprep.subr.bf16.mxu1 %v1915_v35 }
  0x3e   :  { %412 = vmatprep.subr.bf16.mxu0 %v1741_v48 }
  0x40   :  { %1603 = vmatpush3.bf16.msra.mxu1 %v1744_v50 }
  0x41   :  { %413 = vmatpush1.bf16.msra.mxu0 %v1743_v49  ;;  %1604 = vmatprep.subr.bf16.mxu1 %v1915_v35 }
  0x42   :  { %414 = vmatprep.subr.bf16.mxu0 %v1745_v51 }
  0x44   :  { %1605 = vmatpush3.bf16.msra.mxu1 %v1748_v54  ;;  %v1759_v54 = vld [vmem:[%s2530_s8 + $0x18] sm:$0xff]  }
  0x45   :  { %415 = vmatpush1.bf16.msra.mxu0 %v1747_v53  ;;  %1606 = vmatprep.subr.bf16.mxu1 %v1915_v35  ;;  %v1758_v53 = vld [vmem:[%s2530_s8 + $0x50] sm:$0xff]  }
  0x46   :  { %416 = vmatprep.subr.bf16.mxu0 %v1749_v55  ;;  %v1760_v55 = vld [vmem:[%s2530_s8 + $0x58] sm:$0xff]  }
  0x48   :  { %1607 = vmatpush3.bf16.msra.mxu1 %v1752_v57  ;;  %v1762_v57 = vld [vmem:[%s2530_s8 + $0x60] sm:$0xff]  }
  0x49   :  { %417 = vmatpush1.bf16.msra.mxu0 %v1751_v56  ;;  %1632 = vmatprep.subr.bf16.mxu1 %v1915_v35  ;;  %v1761_v56 = vld [vmem:[%s2530_s8 + $0x20] sm:$0xff]  }
  0x4a   :  { %1612 = vmatprep.subr.bf16.mxu0 %v1915_v35 }
  0xb1   :  { %v178_v22 = vpop.xlane.xlu0 %177 }
  0xb2   :  { %v179_v23 = vmul.f32 0.0078125, %v178_v22 }
  0xb4   :  { %v181_v24 = vrot.slane %v179_v23, 1  ;;  %v2054_v25 = vsub.f32 %v170_v18, %v179_v23  ;;  %v257_v18 = vsub.s32 1, %v252_v15 }
  0xb6   :  { %v2056_v26 = vsub.f32 %v171_v19, %v181_v24  ;;  %v186_v28 = vmul.f32 %v2054_v25, %v2054_v25  ;;  %v254_v19 = vrot.slane %v249_v17, %v253_v16  ;;  %v258_v20 = vrot.slane %v249_v17, %v257_v18 }
  0xb8   :  { %v187_v27 = vmul.f32 %v2056_v26, %v2056_v26 }
  0xba   :  { %v190_v29 = vrot.slane %v187_v27, 7 }
  0xbc   :  { %v191_v30 = vsel %vm100_vm1, %v190_v29, %v186_v28 }
  0xbd   :  { %v193_v31 = vsel %vm103_vm2, %v191_v30, 0.0 }
  0xbe   :  { %194 = vadd.xlane.f32.xlu0 %v193_v31 }
 0x14b   :  { %v195_v58 = vpop.xlane.xlu0 %194 }
 0x14c   :  { %v196_v59 = vmul.f32 0.0078125, %v195_v58  ;;  %v1763_v58 = vld [vmem:[%s2530_s8 + $0x28] sm:$0xff]  }
 0x14e   :  { %v197_v60 = vadd.f32 1e-06, %v196_v59  ;;  %v1764_v59 = vld [vmem:[%s2530_s8 + $0x68] sm:$0xff]  }
 0x150   :  { %1793 = vrsqrt.f32 %v197_v60  ;;  %v1765_v60 = vld [vmem:[%s2530_s8 + $0x30] sm:$0xff]  }
 0x15a   :  { %v1794_v61 = vpop.eup %1793 }
 0x15b   :  { %v200_v63 = vrot.slane %v1794_v61, 1  ;;  %v203_v0 = vmul.f32 %v1794_v61, %v2054_v25  ;;  %v1766_v61 = vld [vmem:[%s2530_s8 + $0x70] sm:$0xff]  }
 0x15d   :  { %v204_v2 = vmul.f32 %v200_v63, %v2056_v26  ;;  %v205_v3 = vmul.f32 %v2151_v62, %v203_v0  ;;  %v1767_v63 = vld [vmem:[%s2530_s8 + $0x38] sm:$0xff]  }
 0x15e   :  { %v1768_v0 = vld [vmem:[%s2530_s8 + $0x78] sm:$0xff]  }
 0x15f   :  { %v206_v4 = vmul.f32 %v2151_v62, %v204_v2  ;;  %v207_v5 = vadd.f32 %v2157_v1, %v205_v3  ;;  %v69_v2 = vld [vmem:[%s2564_s7] sm:$0xff]  ;;  %v70_v3 = vld [vmem:[%s2564_s7 + $0x8] sm:$0xff] }
 0x161   :  { %v208_v6 = vadd.f32 %v2157_v1, %v206_v4  ;;  %v215_v7 = vpack.c.bf16 %v207_v5, %v207_v5  ;;  %v75_v4 = vrot.slane %v69_v2, 1  ;;  %v76_v5 = vrot.slane %v70_v3, 1 }
 0x163   :  { %v216_v8 = vpack.c.bf16 %v208_v6, %v208_v6  ;;  %v268_v10 = vunpack.c.l.b16 %v215_v7  ;;  %v80_v6 = vsel %vm79_vm0, %v75_v4, 0.0  ;;  %v87_v7 = vsel %vm79_vm0, %v76_v5, 0.0 }
 0x165   :  { %v269_v9 = vunpack.c.l.b16 %v216_v8  ;;  %v81_v8 = vrot.slane %v80_v6, 4 }
 0x167   :  { %v270_v11 = vrot.slane %v269_v9, 7  ;;  %v88_v9 = vrot.slane %v87_v7, 4 }
 0x169   :  { %v271_v12 = vsel %vm100_vm1, %v270_v11, %v268_v10  ;;  %v82_v10 = vadd.f32 %v81_v8, %v80_v6  ;;  %v89_v11 = vadd.f32 %v88_v9, %v87_v7 }
 0x16a   :  { %v272_v13 = vpack.c.b16 %v271_v12, %v271_v12 }
 0x16b   :  { %v83_v12 = vrot.slane %v82_v10, 2 }
 0x16c   :  { %435 = vmatmul.mubr.bf16.vlgmr.msra.gmra.mrb[0].mxu0 %v272_v13  ;;  %1609 = vmatmul.mubr.bf16.vlgmr.msra.gmra.mrb[0].mxu1 %v272_v13  ;;  %v90_v13 = vrot.slane %v89_v11, 2 }
 0x16d   :  { %1628 = vmatprep.mubr.msk.bf16.mxu0 %vm1917_vm3, %v1915_v35  ;;  %1648 = vmatprep.mubr.msk.bf16.mxu1 %vm1917_vm3, %v1915_v35  ;;  %v84_v14 = vadd.f32 %v83_v12, %v82_v10  ;;  %v1483_v10 = vld [vmem:[%s2565_s2 + $0x2] ss:$0 sm:$0xff] }
 0x16e   :  { %1613 = vmatpush3.bf16.msra.mxu0 %v1753_v33  ;;  %1633 = vmatpush3.bf16.msra.mxu1 %v1754_v34  ;;  %v91_v15 = vadd.f32 %v90_v13, %v89_v11 }
 0x16f   :  { %1614 = vmatprep.subr.bf16.mxu0 %v1915_v35  ;;  %1634 = vmatprep.subr.bf16.mxu1 %v1915_v35  ;;  %v85_v16 = vrot.slane %v84_v14, 1 }
 0x170   :  { %v92_v17 = vrot.slane %v91_v15, 1 }
 0x172   :  { %1615 = vmatpush3.bf16.msra.mxu0 %v1755_v36  ;;  %1635 = vmatpush3.bf16.msra.mxu1 %v1756_v37  ;;  %v1426_v37 = vld [vmem:[%s2565_s2] ss:$0 sm:$0xff] }
 0x173   :  { %1616 = vmatprep.subr.bf16.mxu0 %v1915_v35  ;;  %1636 = vmatprep.subr.bf16.mxu1 %v1915_v35 }
 0x176   :  { %1617 = vmatpush3.bf16.msra.mxu0 %v1757_v52  ;;  %1637 = vmatpush3.bf16.msra.mxu1 %v1758_v53 }
 0x177   :  { %1618 = vmatprep.subr.bf16.mxu0 %v1915_v35  ;;  %1638 = vmatprep.subr.bf16.mxu1 %v1915_v35 }
 0x17a   :  { %1619 = vmatpush3.bf16.msra.mxu0 %v1759_v54  ;;  %1639 = vmatpush3.bf16.msra.mxu1 %v1760_v55  ;;  %v1771_v54 = vld [vmem:[%s2530_s8 + $0x90] sm:$0xff]   ;;  %v1772_v55 = vld [vmem:[%s2530_s8 + $0x98] sm:$0xff]  }
 0x17b   :  { %1620 = vmatprep.subr.bf16.mxu0 %v1915_v35  ;;  %1640 = vmatprep.subr.bf16.mxu1 %v1915_v35 }
 0x17e   :  { %1621 = vmatpush3.bf16.msra.mxu0 %v1761_v56  ;;  %1641 = vmatpush3.bf16.msra.mxu1 %v1762_v57  ;;  %v1773_v56 = vld [vmem:[%s2530_s8 + $0xa0] sm:$0xff]   ;;  %v1774_v57 = vld [vmem:[%s2530_s8 + $0xa8] sm:$0xff]  }
 0x17f   :  { %1622 = vmatprep.subr.bf16.mxu0 %v1915_v35  ;;  %1642 = vmatprep.subr.bf16.mxu1 %v1915_v35 }
 0x182   :  { %1623 = vmatpush3.bf16.msra.mxu0 %v1763_v58  ;;  %1643 = vmatpush3.bf16.msra.mxu1 %v1764_v59  ;;  %v1775_v58 = vld [vmem:[%s2530_s8 + $0xb0] sm:$0xff]   ;;  %v1776_v59 = vld [vmem:[%s2530_s8 + $0xb8] sm:$0xff]  }
 0x183   :  { %1624 = vmatprep.subr.bf16.mxu0 %v1915_v35  ;;  %1644 = vmatprep.subr.bf16.mxu1 %v1915_v35 }
 0x186   :  { %1625 = vmatpush3.bf16.msra.mxu0 %v1765_v60  ;;  %1645 = vmatpush3.bf16.msra.mxu1 %v1766_v61 }
 0x187   :  { %1626 = vmatprep.subr.bf16.mxu0 %v1915_v35  ;;  %1646 = vmatprep.subr.bf16.mxu1 %v1915_v35 }
 0x18a   :  { %1627 = vmatpush3.bf16.msra.mxu0 %v1767_v63  ;;  %1647 = vmatpush3.bf16.msra.mxu1 %v1768_v0 }
 0x18b   :  { %1652 = vmatprep.subr.bf16.mxu0 %v1915_v35  ;;  %1672 = vmatprep.subr.bf16.mxu1 %v1915_v35 }
 0x23f   :  { %v436_v21 = vpop.f32.mrb[0].mxu0  ;;  %v477_v22 = vpop.f32.mrb[0].mxu1 }
 0x240   :  { %v437_v23 = vadd.f32 %v436_v21, %v254_v19  ;;  %v438_v24 = vpop.f32.mrb[1].mxu0  ;;  %v1610_v25 = vpop.f32.mrb[1].mxu1  ;;  %v2198_v48 = vadd.f32 %v477_v22, %v262_v43  ;;  %v86_v22 = vadd.f32 %v85_v16, %v84_v14  ;;  %v1484_v14 = vld [vmem:[%s2566_s5 + $0x2] ss:$0 sm:$0xff] }
 0x241   :  { %v439_v26 = vadd.f32 %v438_v24, %v258_v20  ;;  %v440_v27 = vpop.f32.mrb[2].mxu0  ;;  %v480_v28 = vpop.f32.mrb[2].mxu1 }
 0x242   :  { %v441_v29 = vpop.f32.mrb[3].mxu0  ;;  %v1611_v30 = vpop.f32.mrb[3].mxu1  ;;  %v485_v31 = vsel %vm103_vm2, %v437_v23, 0.0  ;;  %v893_v51 = vsel %vm103_vm2, %v2198_v48, 0.0  ;;  %v94_v28 = vmul.f32 0.25, %v86_v22 }
 0x243   :  { %486 = vadd.xlane.f32.xlu1 %v485_v31  ;;  %v686_v32 = vsel %vm103_vm2, %v439_v26, 0.0 }
 0x244   :  { %687 = vadd.xlane.f32.xlu0 %v686_v32 }
 0x2d0   :  { %v487_v39 = vpop.xlane.xlu1 %486 }
 0x2d1   :  { %v488_v40 = vmul.f32 0.0078125, %v487_v39  ;;  %v688_v41 = vpop.xlane.xlu0 %687 }
 0x2d2   :  { %v689_v42 = vmul.f32 0.0078125, %v688_v41  ;;  %v1427_v41 = vld [vmem:[%s2566_s5] ss:$0 sm:$0xff] }
 0x2d3   :  { %v2190_v44 = vsub.f32 %v437_v23, %v488_v40  ;;  %v93_v23 = vadd.f32 %v92_v17, %v91_v15  ;;  %v1444_v40 = vld [vmem:[%s2565_s2 + $0x1] ss:$0 sm:$0xff] }
 0x2d4   :  { %v2192_v45 = vsub.f32 %v439_v26, %v689_v42 }
 0x2d5   :  { %v490_v46 = vmul.f32 %v2190_v44, %v2190_v44  ;;  %v95_v29 = vmul.f32 0.25, %v93_v23 }
 0x2d6   :  { %v691_v47 = vmul.f32 %v2192_v45, %v2192_v45 }
 0x2d7   :  { %v491_v49 = vsel %vm103_vm2, %v490_v46, 0.0  ;;  %v101_v32 = vsel %vm100_vm1, %v95_v29, %v94_v28  ;;  %v1445_v46 = vld [vmem:[%s2566_s5 + $0x1] ss:$0 sm:$0xff] }
 0x2d8   :  { %492 = vadd.xlane.f32.xlu1 %v491_v49  ;;  %v692_v50 = vsel %vm103_vm2, %v691_v47, 0.0  ;;  %v104_v34 = vsel %vm103_vm2, %v101_v32, 0.0 }
 0x2d9   :  { %693 = vadd.xlane.f32.xlu0 %v692_v50 }
 0x2dc   :  { %894 = vadd.xlane.f32.xlu1 %v893_v51  ;;  %v1769_v51 = vld [vmem:[%s2530_s8 + $0x80] sm:$0xff]  }
 0x365   :  { %v493_v18 = vpop.xlane.xlu1 %492 }
 0x366   :  { %v494_v19 = vmul.f32 0.0078125, %v493_v18  ;;  %v694_v20 = vpop.xlane.xlu0 %693 }
 0x367   :  { %v695_v21 = vmul.f32 0.0078125, %v694_v20 }
 0x368   :  { %v495_v24 = vadd.f32 1e-05, %v494_v19  ;;  %v1428_v19 = vld [vmem:[%s2531_s9] ss:$0 sm:$0xff] }
 0x369   :  { %v696_v25 = vadd.f32 1e-05, %v695_v21  ;;  %v895_v26 = vpop.xlane.xlu1 %894 }
 0x36a   :  { %1795 = vrsqrt.f32 %v495_v24  ;;  %v896_v27 = vmul.f32 0.0078125, %v895_v26 }
 0x36b   :  { %1797 = vrsqrt.f32 %v696_v25 }
 0x36c   :  { %v2261_v30 = vsub.f32 %v2198_v48, %v896_v27 }
 0x36e   :  { %v898_v31 = vmul.f32 %v2261_v30, %v2261_v30 }
 0x370   :  { %v899_v33 = vsel %vm103_vm2, %v898_v31, 0.0 }
 0x371   :  { %900 = vadd.xlane.f32.xlu1 %v899_v33 }
 0x374   :  { %v1796_v36 = vpop.eup %1795 }
 0x375   :  { %v1798_v38 = vpop.eup %1797  ;;  %v497_v39 = vmul.f32 %v1796_v36, %v2190_v44  ;;  %105 = vadd.xlane.f32.xlu1 %v104_v34 }
 0x376   :  { %v698_v42 = vmul.f32 %v1798_v38, %v2192_v45  ;;  %v1770_v45 = vld [vmem:[%s2530_s8 + $0x88] sm:$0xff]  }
 0x377   :  { %v504_v43 = vmul.f32 %v1426_v37, %v497_v39 }
 0x378   :  { %v705_v47 = vmul.f32 %v1444_v40, %v698_v42 }
 0x379   :  { %v511_v48 = vadd.f32 %v1427_v41, %v504_v43 }
 0x37a   :  { %v712_v49 = vadd.f32 %v1445_v46, %v705_v47 }
 0x37b   :  { %v512_v44 = vmax.f32 %v511_v48, 0.0 }
 0x37c   :  { %v713_v50 = vmax.f32 %v712_v49, 0.0  ;;  %v1463_v49 = vld [vmem:[%s2531_s9 + $0x1] ss:$0 sm:$0xff] }
 0x37d   :  { %v513_v52 = vpack.c.bf16 %v512_v44, %v512_v44 }
 0x37e   :  { %v714_v53 = vpack.c.bf16 %v713_v50, %v713_v50 }
 0x37f   :  { %1629 = vmatmul.mubr.bf16.vlgmr.msra.gmra.mrb[4].mxu0 %v513_v52 }
 0x380   :  { %1649 = vmatmul.mubr.bf16.vlgmr.msra.gmra.mrb[4].mxu1 %v714_v53  ;;  %1653 = vmatpush3.bf16.msra.mxu0 %v1769_v51 }
 0x381   :  { %1654 = vmatprep.subr.bf16.mxu0 %v1915_v35  ;;  %1668 = vmatprep.mubr.msk.bf16.mxu0 %vm1917_vm3, %v1915_v35 }
 0x382   :  { %1688 = vmatprep.mubr.msk.bf16.mxu1 %vm1917_vm3, %v1915_v35 }
 0x384   :  { %1655 = vmatpush3.bf16.msra.mxu0 %v1770_v45 }
 0x385   :  { %1656 = vmatprep.subr.bf16.mxu0 %v1915_v35 }
 0x388   :  { %1657 = vmatpush3.bf16.msra.mxu0 %v1771_v54 }
 0x389   :  { %1658 = vmatprep.subr.bf16.mxu0 %v1915_v35 }
 0x38c   :  { %1659 = vmatpush3.bf16.msra.mxu0 %v1772_v55 }
 0x38d   :  { %1660 = vmatprep.subr.bf16.mxu0 %v1915_v35 }
 0x390   :  { %1661 = vmatpush3.bf16.msra.mxu0 %v1773_v56 }
 0x391   :  { %1662 = vmatprep.subr.bf16.mxu0 %v1915_v35 }
 0x394   :  { %1663 = vmatpush3.bf16.msra.mxu0 %v1774_v57  ;;  %v1777_v57 = vld [vmem:[%s2536_s14] sm:$0xff]  }
 0x395   :  { %1664 = vmatprep.subr.bf16.mxu0 %v1915_v35  ;;  %1673 = vmatpush3.bf16.msra.mxu1 %v1777_v57 }
 0x396   :  { %1674 = vmatprep.subr.bf16.mxu1 %v1915_v35 }
 0x398   :  { %1665 = vmatpush3.bf16.msra.mxu0 %v1775_v58  ;;  %v1778_v58 = vld [vmem:[%s2536_s14 + $0x8] sm:$0xff]  }
 0x399   :  { %1666 = vmatprep.subr.bf16.mxu0 %v1915_v35  ;;  %1675 = vmatpush3.bf16.msra.mxu1 %v1778_v58 }
 0x39a   :  { %1676 = vmatprep.subr.bf16.mxu1 %v1915_v35 }
 0x39c   :  { %1667 = vmatpush3.bf16.msra.mxu0 %v1776_v59  ;;  %v1779_v59 = vld [vmem:[%s2536_s14 + $0x10] sm:$0xff]  }
 0x39d   :  { %1692 = vmatprep.subr.bf16.mxu0 %v1915_v35  ;;  %1677 = vmatpush3.bf16.msra.mxu1 %v1779_v59 }
 0x39e   :  { %1678 = vmatprep.subr.bf16.mxu1 %v1915_v35 }
 0x3fe   :  { %v901_v60 = vpop.xlane.xlu1 %900 }
 0x3ff   :  { %v902_v61 = vmul.f32 0.0078125, %v901_v60  ;;  %v1780_v60 = vld [vmem:[%s2536_s14 + $0x18] sm:$0xff]  }
 0x400   :  { %1679 = vmatpush3.bf16.msra.mxu1 %v1780_v60 }
 0x401   :  { %v903_v63 = vadd.f32 1e-05, %v902_v61  ;;  %v1781_v61 = vld [vmem:[%s2536_s14 + $0x20] sm:$0xff]   ;;  %1680 = vmatprep.subr.bf16.mxu1 %v1915_v35 }
 0x402   :  { %v106_v0 = vpop.xlane.xlu1 %105 }
 0x403   :  { %1799 = vrsqrt.f32 %v903_v63  ;;  %v108_v2 = vmul.f32 0.0078125, %v106_v0  ;;  %v1782_v63 = vld [vmem:[%s2536_s14 + $0x28] sm:$0xff]   ;;  %v1783_v0 = vld [vmem:[%s2536_s14 + $0x30] sm:$0xff]  }
 0x404   :  { %1681 = vmatpush3.bf16.msra.mxu1 %v1781_v61 }
 0x405   :  { %v110_v3 = vrot.slane %v108_v2, 1  ;;  %v113_v4 = vsub.f32 %v94_v28, %v108_v2  ;;  %1682 = vmatprep.subr.bf16.mxu1 %v1915_v35  ;;  %v1784_v2 = vld [vmem:[%s2536_s14 + $0x38] sm:$0xff]  }
 0x407   :  { %v114_v5 = vsub.f32 %v95_v29, %v110_v3  ;;  %v115_v6 = vmul.f32 %v113_v4, %v113_v4 }
 0x408   :  { %1683 = vmatpush3.bf16.msra.mxu1 %v1782_v63 }
 0x409   :  { %v116_v7 = vmul.f32 %v114_v5, %v114_v5  ;;  %1684 = vmatprep.subr.bf16.mxu1 %v1915_v35 }
 0x40b   :  { %v119_v8 = vrot.slane %v116_v7, 7 }
 0x40c   :  { %1685 = vmatpush3.bf16.msra.mxu1 %v1783_v0  ;;  %v1478_v0 = vld [vmem:[%s2534_s12 + $0x1] ss:$0 sm:$0xff] }
 0x40d   :  { %v1800_v9 = vpop.eup %1799  ;;  %v120_v11 = vsel %vm100_vm1, %v119_v8, %v115_v6  ;;  %1686 = vmatprep.subr.bf16.mxu1 %v1915_v35 }
 0x40e   :  { %v905_v12 = vmul.f32 %v1800_v9, %v2261_v30  ;;  %v122_v13 = vsel %vm103_vm2, %v120_v11, 0.0 }
 0x40f   :  { %123 = vadd.xlane.f32.xlu1 %v122_v13 }
 0x410   :  { %v912_v15 = vmul.f32 %v1483_v10, %v905_v12  ;;  %1687 = vmatpush3.bf16.msra.mxu1 %v1784_v2 }
 0x412   :  { %v919_v16 = vadd.f32 %v1484_v14, %v912_v15 }
 0x414   :  { %v920_v17 = vmax.f32 %v919_v16, 0.0 }
 0x416   :  { %v921_v18 = vpack.c.bf16 %v920_v17, %v920_v17  ;;  %v1437_v17 = vld [vmem:[%s2532_s10] ss:$0 sm:$0xff] }
 0x418   :  { %1669 = vmatmul.mubr.bf16.vlgmr.msra.gmra.mrb[8].mxu0 %v921_v18 }
 0x419   :  { %1708 = vmatprep.mubr.msk.bf16.mxu0 %vm1917_vm3, %v1915_v35 }
 0x452   :  { %v619_v20 = vpop.f32.mrb[4].mxu0 }
 0x453   :  { %v620_v21 = vadd.f32 %v1428_v19, %v619_v20  ;;  %v1630_v22 = vpop.f32.mrb[5].mxu0  ;;  %v822_v23 = vpop.f32.mrb[4].mxu1  ;;  %v1438_v19 = vld [vmem:[%s2533_s11] ss:$0 sm:$0xff] }
 0x454   :  { %v622_v24 = vpop.f32.mrb[6].mxu0  ;;  %v1650_v25 = vpop.f32.mrb[5].mxu1  ;;  %v823_v50 = vadd.f32 %v1463_v49, %v822_v23 }
 0x455   :  { %v1631_v26 = vpop.f32.mrb[7].mxu0  ;;  %v825_v27 = vpop.f32.mrb[6].mxu1  ;;  %v627_v28 = vsel %vm103_vm2, %v620_v21, 0.0 }
 0x456   :  { %v1651_v29 = vpop.f32.mrb[7].mxu1  ;;  %628 = vadd.xlane.f32.xlu0 %v627_v28  ;;  %v832_v55 = vsel %vm103_vm2, %v823_v50, 0.0 }
 0x457   :  { %v1785_v29 = vld [vmem:[%s2538_s16] sm:$0xff]  }
 0x458   :  { %1693 = vmatpush3.bf16.msra.mxu0 %v1785_v29 }
 0x459   :  { %1694 = vmatprep.subr.bf16.mxu0 %v1915_v35 }
 0x49c   :  { %v124_v30 = vpop.xlane.xlu1 %123 }
 0x49d   :  { %v125_v31 = vmul.f32 0.0078125, %v124_v30  ;;  %v1786_v30 = vld [vmem:[%s2538_s16 + $0x8] sm:$0xff]  }
 0x49e   :  { %1695 = vmatpush3.bf16.msra.mxu0 %v1786_v30 }
 0x49f   :  { %v126_v32 = vadd.f32 1e-06, %v125_v31  ;;  %v1787_v31 = vld [vmem:[%s2538_s16 + $0x10] sm:$0xff]   ;;  %1696 = vmatprep.subr.bf16.mxu0 %v1915_v35 }
 0x4a1   :  { %1801 = vrsqrt.f32 %v126_v32  ;;  %v1788_v32 = vld [vmem:[%s2538_s16 + $0x18] sm:$0xff]  }
 0x4a2   :  { %1697 = vmatpush3.bf16.msra.mxu0 %v1787_v31 }
 0x4a3   :  { %1698 = vmatprep.subr.bf16.mxu0 %v1915_v35 }
 0x4a6   :  { %1699 = vmatpush3.bf16.msra.mxu0 %v1788_v32 }
 0x4a7   :  { %1700 = vmatprep.subr.bf16.mxu0 %v1915_v35 }
 0x4ab   :  { %v1802_v33 = vpop.eup %1801 }
 0x4ac   :  { %v129_v34 = vrot.slane %v1802_v33, 1  ;;  %v132_v36 = vmul.f32 %v1802_v33, %v113_v4  ;;  %v1789_v33 = vld [vmem:[%s2538_s16 + $0x20] sm:$0xff]  }
 0x4ad   :  { %1701 = vmatpush3.bf16.msra.mxu0 %v1789_v33 }
 0x4ae   :  { %v133_v37 = vmul.f32 %v129_v34, %v114_v5  ;;  %v140_v38 = vmul.f32 %v2151_v62, %v132_v36  ;;  %v1790_v34 = vld [vmem:[%s2538_s16 + $0x28] sm:$0xff]   ;;  %1702 = vmatprep.subr.bf16.mxu0 %v1915_v35  ;;  %v1791_v36 = vld [vmem:[%s2538_s16 + $0x30] sm:$0xff]  }
 0x4b0   :  { %v141_v39 = vmul.f32 %v2151_v62, %v133_v37  ;;  %v148_v40 = vadd.f32 %v2157_v1, %v140_v38  ;;  %v1502_v62 = vld [vmem:[%s2531_s9 + $0x2] ss:$0 sm:$0xff]  ;;  %v1792_v37 = vld [vmem:[%s2538_s16 + $0x38] sm:$0xff]   ;;  %s1821_s9 = scalar_lea.vmem %s1356_s1, 32 }
 0x4b1   :  { %1703 = vmatpush3.bf16.msra.mxu0 %v1790_v34  ;;  %p1822_p0 = scmp.ne.s32.totalorder %s1356_s1, %s1821_s9  ;;  %p1827_p2 = scmp.lt.s32.totalorder %s1821_s9, %s1821_s9 }
 0x4b2   :  { %v149_v41 = vadd.f32 %v2157_v1, %v141_v39  ;;  %1704 = vmatprep.subr.bf16.mxu0 %v1915_v35 }
 0x4b3   :  { %p1828_p3 = por %p1827_p2, %p1826_p1 }
 0x4b4   :  { %v211_v42 = vrot.slane %v149_v41, 7 }
 0x4b5   :  { %1705 = vmatpush3.bf16.msra.mxu0 %v1791_v36  ;;  %p1829_p4 = pnand %p1828_p3, %p1822_p0 }
 0x4b6   :  { %v2338_v43 = vsel %vm100_vm1, %v211_v42, %v148_v40  ;;  %1706 = vmatprep.subr.bf16.mxu0 %v1915_v35 }
 0x4b7   :  { %214 = vst [vmem:[#allocation4] sm:$0x3] %v2338_v43 }
 0x4b9   :  { %1707 = vmatpush3.bf16.msra.mxu0 %v1792_v37 }
 0x4e3   :  { %v629_v46 = vpop.xlane.xlu0 %628 }
 0x4e4   :  { %v630_v47 = vmul.f32 0.0078125, %v629_v46 }
 0x4e6   :  { %v631_v48 = vsub.f32 %v620_v21, %v630_v47 }
 0x4e8   :  { %v632_v44 = vmul.f32 %v631_v48, %v631_v48 }
 0x4ea   :  { %v633_v1 = vsel %vm103_vm2, %v632_v44, 0.0  ;;  %v1513_v44 = vld [vmem:[%s2532_s10 + $0x2] ss:$0 sm:$0xff] }
 0x4eb   :  { %634 = vadd.xlane.f32.xlu0 %v633_v1  ;;  %v1029_v51 = vpop.f32.mrb[8].mxu0 }
 0x4ec   :  { %v1030_v52 = vadd.f32 %v1502_v62, %v1029_v51  ;;  %v1670_v53 = vpop.f32.mrb[9].mxu0  ;;  %v1514_v51 = vld [vmem:[%s2533_s11 + $0x2] ss:$0 sm:$0xff] }
 0x4ed   :  { %v1032_v45 = vpop.f32.mrb[10].mxu0 }
 0x4ee   :  { %v1671_v54 = vpop.f32.mrb[11].mxu0  ;;  %v1039_v56 = vsel %vm103_vm2, %v1030_v52, 0.0 }
 0x4ef   :  { %833 = vadd.xlane.f32.xlu0 %v832_v55  ;;  %1040 = vadd.xlane.f32.xlu1 %v1039_v56 }
 0x578   :  { %v635_v3 = vpop.xlane.xlu0 %634 }
 0x579   :  { %v636_v4 = vmul.f32 0.0078125, %v635_v3 }
 0x57b   :  { %v637_v5 = vadd.f32 1e-05, %v636_v4  ;;  %v1517_v4 = vld [vmem:[%s2534_s12 + $0x2] ss:$0 sm:$0xff] }
 0x57c   :  { %v834_v6 = vpop.xlane.xlu0 %833  ;;  %v1041_v7 = vpop.xlane.xlu1 %1040 }
 0x57d   :  { %1803 = vrsqrt.f32 %v637_v5  ;;  %v835_v8 = vmul.f32 0.0078125, %v834_v6  ;;  %v1042_v9 = vmul.f32 0.0078125, %v1041_v7  ;;  %v1440_v6 = vld [vmem:[%s2534_s12] ss:$0 sm:$0xff] }
 0x57f   :  { %v836_v10 = vsub.f32 %v823_v50, %v835_v8  ;;  %v1043_v11 = vsub.f32 %v1030_v52, %v1042_v9  ;;  %v1475_v50 = vld [vmem:[%s2533_s11 + $0x1] ss:$0 sm:$0xff] }
 0x581   :  { %v837_v12 = vmul.f32 %v836_v10, %v836_v10  ;;  %v1044_v13 = vmul.f32 %v1043_v11, %v1043_v11 }
 0x583   :  { %v838_v14 = vsel %vm103_vm2, %v837_v12, 0.0  ;;  %v1045_v15 = vsel %vm103_vm2, %v1044_v13, 0.0  ;;  %v1520_v12 = vld [vmem:[%s2537_s15] ss:$0 sm:$0xff]  ;;  %s1918_s15 = smov 1  }
 0x584   :  { %839 = vadd.xlane.f32.xlu0 %v838_v14  ;;  %1046 = vadd.xlane.f32.xlu1 %v1045_v15 }
 0x587   :  { %v1804_v16 = vpop.eup %1803 }
 0x588   :  { %v639_v18 = vmul.f32 %v1804_v16, %v631_v48  ;;  %v1474_v48 = vld [vmem:[%s2532_s10 + $0x1] ss:$0 sm:$0xff] }
 0x58a   :  { %v646_v20 = vmul.f32 %v1437_v17, %v639_v18 }
 0x58c   :  { %v653_v21 = vadd.f32 %v1438_v19, %v646_v20  ;;  %v1480_v20 = vld [vmem:[%s2535_s13 + $0x1] ss:$0 sm:$0xff] }
 0x58e   :  { %v1439_v22 = vmul.f32 -1.442695, %v653_v21  ;;  %v1519_v21 = vld [vmem:[%s2535_s13 + $0x2] ss:$0 sm:$0xff] }
 0x590   :  { %1805 = vpow2.f32 %v1439_v22 }
 0x59a   :  { %v1806_v23 = vpop.eup %1805 }
 0x59b   :  { %v657_v24 = vadd.f32 1.0, %v1806_v23 }
 0x59d   :  { %1807 = vrcp.f32 %v657_v24 }
 0x5a7   :  { %v1808_v25 = vpop.eup %1807 }
 0x5a8   :  { %v660_v26 = vmul.f32 2.0, %v1808_v25 }
 0x5aa   :  { %v2390_v27 = vmul.f32 %v660_v26, %v2338_v43 }
 0x5ac   :  { %v1111_v28 = vpack.c.bf16 %v2390_v27, %v2390_v27  ;;  %662 = vst [vmem:[#allocation6] sm:$0x3] %v2390_v27 }
 0x5ae   :  { %1689 = vmatmul.mubr.bf16.vlgmr.msra.gmra.mrb[8].mxu1 %v1111_v28 }
 0x611   :  { %v840_v38 = vpop.xlane.xlu0 %839  ;;  %v1047_v39 = vpop.xlane.xlu1 %1046 }
 0x612   :  { %v841_v40 = vmul.f32 0.0078125, %v840_v38  ;;  %v1048_v41 = vmul.f32 0.0078125, %v1047_v39 }
 0x614   :  { %v842_v42 = vadd.f32 1e-05, %v841_v40  ;;  %v1049_v46 = vadd.f32 1e-05, %v1048_v41 }
 0x616   :  { %1809 = vrsqrt.f32 %v842_v42 }
 0x617   :  { %1811 = vrsqrt.f32 %v1049_v46 }
 0x620   :  { %v1810_v47 = vpop.eup %1809 }
 0x621   :  { %v1812_v49 = vpop.eup %1811  ;;  %v844_v35 = vmul.f32 %v1810_v47, %v836_v10  ;;  %v670_v10 = vmul.f32 %v1440_v6, %v2390_v27 }
 0x622   :  { %v1051_v62 = vmul.f32 %v1812_v49, %v1043_v11 }
 0x623   :  { %v851_v1 = vmul.f32 %v1474_v48, %v844_v35 }
 0x624   :  { %v1058_v52 = vmul.f32 %v1513_v44, %v1051_v62 }
 0x625   :  { %v858_v53 = vadd.f32 %v1475_v50, %v851_v1 }
 0x626   :  { %v1065_v45 = vadd.f32 %v1514_v51, %v1058_v52 }
 0x627   :  { %v1476_v54 = vmul.f32 -1.442695, %v858_v53 }
 0x628   :  { %v1515_v55 = vmul.f32 -1.442695, %v1065_v45 }
 0x629   :  { %1813 = vpow2.f32 %v1476_v54 }
 0x62a   :  { %1815 = vpow2.f32 %v1515_v55 }
 0x633   :  { %v1814_v56 = vpop.eup %1813 }
 0x634   :  { %v1816_v57 = vpop.eup %1815  ;;  %v862_v58 = vadd.f32 1.0, %v1814_v56 }
 0x635   :  { %v1069_v59 = vadd.f32 1.0, %v1816_v57 }
 0x636   :  { %1817 = vrcp.f32 %v862_v58 }
 0x637   :  { %1819 = vrcp.f32 %v1069_v59 }
 0x640   :  { %v1818_v60 = vpop.eup %1817 }
 0x641   :  { %v1820_v61 = vpop.eup %1819  ;;  %v865_v63 = vmul.f32 2.0, %v1818_v60 }
 0x642   :  { %v1072_v2 = vmul.f32 2.0, %v1820_v61 }
 0x643   :  { %v866_v3 = vmul.f32 %v865_v63, %v2338_v43 }
 0x644   :  { %v1073_v5 = vmul.f32 %v1072_v2, %v2338_v43  ;;  %v671_v43 = vsel %vm103_vm2, %v670_v10, 0.0 }
 0x645   :  { %v876_v7 = vmul.f32 %v1478_v0, %v866_v3  ;;  %867 = vst [vmem:[%s2544_s22] sm:$0x3] %v866_v3 }
 0x646   :  { %v1083_v8 = vmul.f32 %v1517_v4, %v1073_v5  ;;  %1074 = vst [vmem:[#allocation7] sm:$0x3] %v1073_v5 }
 0x647   :  { %v877_v9 = vsel %vm103_vm2, %v876_v7, 0.0 }
 0x648   :  { %878 = vadd.xlane.f32.xlu0 %v877_v9  ;;  %v1084_v11 = vsel %vm103_vm2, %v1083_v8, 0.0 }
 0x649   :  { %1085 = vadd.xlane.f32.xlu1 %v1084_v11 }
 0x64c   :  { %672 = vadd.xlane.f32.xlu0 %v671_v43 }
 0x681   :  { %v1217_v13 = vpop.f32.mrb[8].mxu1 }
 0x682   :  { %v1218_v14 = vadd.f32 %v1520_v12, %v1217_v13  ;;  %v1690_v15 = vpop.f32.mrb[9].mxu1 }
 0x683   :  { %v1220_v16 = vpop.f32.mrb[10].mxu1 }
 0x684   :  { %v1223_v17 = vmax.f32 %v1218_v14, 0.0  ;;  %v1691_v18 = vpop.f32.mrb[11].mxu1 }
 0x686   :  { %v1224_v19 = vpack.c.bf16 %v1223_v17, %v1223_v17 }
 0x688   :  { %1709 = vmatmul.mubr.bf16.vlgmr.msra.gmra.mrb[12].mxu0 %v1224_v19 }
 0x6d5   :  { %v879_v22 = vpop.xlane.xlu0 %878 }
 0x6d6   :  { %v888_v23 = vadd.f32 %v1480_v20, %v879_v22  ;;  %v1086_v24 = vpop.xlane.xlu1 %1085 }
 0x6d7   :  { %v1095_v25 = vadd.f32 %v1519_v21, %v1086_v24 }
 0x6d8   :  { %1097 = vrot.lane.b32.xlu1 %v888_v23, %s1918_s15 }
 0x6d9   :  { %1101 = vrot.lane.b32.xlu0 %v1095_v25, %s1919_s24 }
 0x6da   :  { %1832 = shalt.err (!%p1829_p4)
}
 0x6db   :  { %s1833_s6 = scalar_lea.hbm %s2542_s20, 32 }
 0x6dc   :  { %p1834_p5 = scmp.ne.s32.totalorder %s2542_s20, %s1833_s6  ;;  %p1837_p6 = scmp.lt.u32.totalorder %s1833_s6, %s2542_s20 }
 0x6de   :  { %p1839_p7 = pnand %p1837_p6, %p1834_p5 }
 0x6e0   :  { %1842 = shalt.err (!%p1839_p7)
}
 0x6e1   :  { %1358 = dma.vmem_to_hbm [thread:$0]  %s1356_s1, 32, %s2542_s20, [#allocation5]  }
 0x6e2   :  { %s1921_s29 = smov [#allocation6]   ;;  %s1922_s2 = smov [#allocation7]  }
 0x6e3   :  { %s1365_s3 = sshll.u32 %s1921_s29, 4  ;;  %s1377_s0 = sshll.u32 %s1922_s2, 4  ;;  %s1366_s3 = int_to_ptr.vmem [resolvable:$true] %s1365_s3  ;;  %s1378_s0 = int_to_ptr.vmem [resolvable:$true] %s1377_s0 }
 0x6e4   :  { %s1843_s5 = scalar_lea.vmem %s1366_s3, 32  ;;  %p1848_p9 = scmp.lt.s32.totalorder %s1366_s3, %s1366_s3 }
 0x6e5   :  { %p1844_p8 = scmp.ne.s32.totalorder %s1366_s3, %s1843_s5  ;;  %p1849_p10 = scmp.lt.s32.totalorder %s1843_s5, %s1843_s5 }
 0x6e7   :  { %p1850_p11 = por %p1849_p10, %p1848_p9 }
 0x6e9   :  { %p1851_p12 = pnand %p1850_p11, %p1844_p8 }
 0x6eb   :  { %1854 = shalt.err (!%p1851_p12)
}
 0x6ec   :  { %s1855_s4 = scalar_lea.hbm %s2543_s21, 32 }
 0x6ed   :  { %p1856_p13 = scmp.ne.s32.totalorder %s2543_s21, %s1855_s4  ;;  %p1859_p0 = scmp.lt.u32.totalorder %s1855_s4, %s2543_s21 }
 0x6ef   :  { %p1861_p1 = pnand %p1859_p0, %p1856_p13 }
 0x6f1   :  { %1864 = shalt.err (!%p1861_p1)
}
 0x6f2   :  { %1368 = dma.vmem_to_hbm [thread:$0]  %s1366_s3, 32, %s2543_s21, [#allocation5]  }
 0x6f3   :  { %s1865_s1 = scalar_lea.vmem %s1378_s0, 32  ;;  %p1870_p3 = scmp.lt.s32.totalorder %s1378_s0, %s1378_s0 }
 0x6f4   :  { %p1866_p2 = scmp.ne.s32.totalorder %s1378_s0, %s1865_s1  ;;  %p1871_p4 = scmp.lt.s32.totalorder %s1865_s1, %s1865_s1 }
 0x6f6   :  { %p1872_p5 = por %p1871_p4, %p1870_p3 }
 0x6f8   :  { %p1873_p6 = pnand %p1872_p5, %p1866_p2 }
 0x6fa   :  { %1876 = shalt.err (!%p1873_p6)
}
 0x6fb   :  { %s1877_s16 = scalar_lea.hbm %s2545_s23, 32 }
 0x6fc   :  { %p1878_p7 = scmp.ne.s32.totalorder %s2545_s23, %s1877_s16  ;;  %p1881_p8 = scmp.lt.u32.totalorder %s1877_s16, %s2545_s23 }
 0x6fe   :  { %p1883_p9 = pnand %p1881_p8, %p1878_p7 }
 0x700   :  { %1886 = shalt.err (!%p1883_p9)
}
 0x701   :  { %1380 = dma.vmem_to_hbm [thread:$0]  %s1378_s0, 32, %s2545_s23, [#allocation8]   ;;  %v1441_v26 = vld [vmem:[%s2535_s13] ss:$0 sm:$0xff]  ;;  %v673_v27 = vpop.xlane.xlu0 %672  ;;  %vm1104_vm4 = vcmask 7168   ;;  %vm1106_vm5 = vcmask 15360  }
 0x702   :  { %v681_v28 = vadd.f32 %v1441_v26, %v673_v27  ;;  %vm1108_vm6 = vcmask 23552   ;;  %v1529_v34 = vld [vmem:[%s2539_s17] ss:$0 sm:$0xff]  ;;  %s1923_s0 = smov [#allocation2]  }
 0x703   :  { %s1343_s13 = sshll.u32 %s1923_s0, 4  ;;  %s1344_s13 = int_to_ptr.vmem [resolvable:$true] %s1343_s13 }
 0x704   :  { %s1887_s5 = scalar_lea.vmem %s1344_s13, 32  ;;  %p1892_p11 = scmp.lt.s32.totalorder %s1344_s13, %s1344_s13 }
 0x705   :  { %p1888_p10 = scmp.ne.s32.totalorder %s1344_s13, %s1887_s5  ;;  %p1893_p12 = scmp.lt.s32.totalorder %s1887_s5, %s1887_s5 }
 0x707   :  { %p1894_p13 = por %p1893_p12, %p1892_p11 }
 0x709   :  { %p1895_p0 = pnand %p1894_p13, %p1888_p10 }
 0x74a   :  { %v1098_v29 = vpop.permute.xlu1 %1097 }
 0x74b   :  { %v1102_v30 = vpop.permute.xlu0 %1101  ;;  %v1105_v31 = vsel %vm1104_vm4, %v681_v28, %v1098_v29 }
 0x74c   :  { %v1107_v32 = vsel %vm1106_vm5, %v1105_v31, %v1102_v30 }
 0x74d   :  { %v1109_v33 = vsel %vm1108_vm6, %v1107_v32, 0.0 }
 0x74e   :  { %1110 = vst [vmem:[%s2541_s19] sm:$0x3] %v1109_v33 }
 0x75b   :  { %v1330_v36 = vpop.f32.mrb[12].mxu0 }
 0x75c   :  { %v1331_v37 = vadd.f32 %v1529_v34, %v1330_v36  ;;  %v1710_v38 = vpop.f32.mrb[13].mxu0 }
 0x75d   :  { %v1333_v39 = vpop.f32.mrb[14].mxu0 }
 0x75e   :  { %1336 = vst [vmem:[#allocation2] sm:$0x3] %v1331_v37  ;;  %v1711_v40 = vpop.f32.mrb[15].mxu0 }
 0x75f   :  { %1898 = shalt.err (!%p1895_p0)
}
 0x760   :  { %s1899_s17 = scalar_lea.hbm %s2540_s18, 32 }
 0x761   :  { %p1900_p1 = scmp.ne.s32.totalorder %s2540_s18, %s1899_s17  ;;  %p1903_p2 = scmp.lt.u32.totalorder %s1899_s17, %s2540_s18 }
 0x763   :  { %p1905_p3 = pnand %p1903_p2, %p1900_p1 }
 0x765   :  { %1908 = shalt.err (!%p1905_p3)
}
 0x766   :  { %1346 = dma.vmem_to_hbm [thread:$0]  %s1344_s13, 32, %s2540_s18, [#allocation3]  }
 0x767   :  { %1909 = dma.done.wait [#allocation3], 32  }
 0x768   :  { %1910 = vsyncadd [#allocation3], 4294967264 }
 0x769   :  { %1911 = dma.done.wait [#allocation5], 64  }
 0x76a   :  { %1912 = vsyncadd [#allocation5], 4294967232 }
 0x76b   :  { %1913 = dma.done.wait [#allocation8], 32  }
 0x76c   :  { %1914 = vsyncadd [#allocation8], 4294967264 }
 0x76d   :  { %1397 = vsyncpa [#allocation3], 1 }
 0x76e   :  { %1398 = vsyncpa [#allocation5], 1 }
 0x76f   :  { %1399 = vsyncpa [#allocation8], 1 }

// kernel: forward.4
= control target key start
LH: loop header
LB: loop body
LE: loop exit
PB: predicated region body
PF: predicated region fallthrough
CT: control target
= control target key end

     0   :  { %s3066_s25 = smov 0   ;;  %s3068_s26 = smov 0   ;;  %s3440_s0 = inlined_call_operand.vmem [shape: f32[16,128], index: 0, kind: input, shape index: {}]   ;;  %s3441_s1 = inlined_call_operand.vmem [shape: f32[2,1,128], index: 1, kind: input, shape index: {}]   ;;  %s3442_s2 = inlined_call_operand.vmem [shape: f32[2,1,128], index: 2, kind: input, shape index: {}]   ;;  %s3443_s3 = inlined_call_operand.vmem [shape: bf16[2,128,384], index: 3, kind: input, shape index: {}]   ;;  %s3444_s4 = inlined_call_operand.vmem [shape: f32[2,1,384], index: 4, kind: input, shape index: {}]   ;;  %s3445_s5 = inlined_call_operand.vmem [shape: bf16[2,128,128], index: 5, kind: input, shape index: {}]   ;;  %s3446_s6 = inlined_call_operand.vmem [shape: f32[2,1,128], index: 6, kind: input, shape index: {}]   ;;  %s3447_s7 = inlined_call_operand.vmem [shape: f32[2,1,128], index: 7, kind: input, shape index: {}]   ;;  %s3448_s8 = inlined_call_operand.vmem [shape: f32[2,1,128], index: 8, kind: input, shape index: {}]   ;;  %s3449_s9 = inlined_call_operand.vmem [shape: bf16[2,128,512], index: 9, kind: input, shape index: {}]   ;;  %s3450_s10 = inlined_call_operand.vmem [shape: f32[2,1,512], index: 10, kind: input, shape index: {}]   ;;  %s3451_s11 = inlined_call_operand.vmem [shape: bf16[2,512,128], index: 11, kind: input, shape index: {}]   ;;  %s3452_s12 = inlined_call_operand.vmem [shape: f32[2,1,128], index: 12, kind: input, shape index: {}]   ;;  %s3453_s13 = inlined_call_operand.vmem [shape: f32[2,16,128], index: 13, kind: output, shape index: {}]  }
   0x1   :  { %3458 = sst [smem:[#allocation10_spill]] %s3440_s0  ;;  %s3070_s27 = smov 0  }
   0x2   :  { %3459 = sst [smem:[#allocation11_spill]] %s3442_s2  ;;  %s3072_s28 = smov 0  }
   0x3   :  { %3460 = sst [smem:[#allocation12_spill]] %s3443_s3  ;;  %s3074_s29 = smov 0  }
   0x4   :  { %3461 = sst [smem:[#allocation13_spill]] %s3444_s4 }
   0x5   :  { %3462 = sst [smem:[#allocation14_spill]] %s3445_s5 }
   0x6   :  { %3463 = sst [smem:[#allocation15_spill]] %s3448_s8 }
   0x7   :  { %3464 = sst [smem:[#allocation16_spill]] %s3449_s9 }
   0x8   :  { %3465 = sst [smem:[#allocation17_spill]] %s3453_s13 }
   0x9 LB: > { %3466 = sst [smem:[#allocation4_spill]] %s2972_s25  ;;  %s32_s30 = sadd.s32 1, %s2980_s27  ;;  %s2988_s29 = sphi %s3074_s29, %s23_s29   ;;  %s2984_s28 = sphi %s3072_s28, %s3492_s28   ;;  %s2980_s27 = sphi %s3070_s27, %s3491_s27   ;;  %s2976_s26 = sphi %s3068_s26, %s3490_s26   ;;  %s2972_s25 = sphi %s3066_s25, %s3489_s25  }
   0xa   : > { %3467 = sst [smem:[#allocation5_spill]] %s2980_s27  ;;  %s35_s14 = sadd.s32 1, %s2984_s28 }
   0xb   : > { %3468 = sst [smem:[#allocation6_spill]] %s2984_s28  ;;  %p33_p0 = scmp.ge.s32.totalorder %s32_s30, 2 }
   0xc   : > { %3469 = sst [smem:[#allocation7_spill]] %s2988_s29  ;;  %p2460_p1 = scmp.ge.s32.totalorder %s2988_s29, 1 }
   0xd   : > { %p506_p2 = scmp.lt.s32.totalorder %s2988_s29, 5  ;;  %s3494_s30 = smov (%p33_p0, %s32_s30), 0 }
   0xe   : > { %3470 = sst [smem:[#allocation8_spill]] %s3494_s30  ;;  %s3496_s14 = smov (!%p33_p0, %s35_s14), %s2984_s28 }
   0xf   : > { %p507_p3 = pnand %p2460_p1, %p506_p2  ;;  %p37_p4 = scmp.ge.s32.totalorder %s3496_s14, 2 }
  0x10   : > { %p598_p5 = scmp.lt.s32.totalorder (!%p507_p3), %s2976_s26, 1  ;;  %p602_p6 = scmp.lt.s32.totalorder (!%p507_p3), %s2972_s25, 1 }
  0x11   : > { %s3498_s14 = smov (%p37_p4, %s3496_s14), 0  ;;  %510 = sbr.rel (%p507_p3) target bundleno = 3011 (0xbc3), region = 72 }
  0x12   : > { %3471 = sst [smem:[#allocation9_spill]] %s3498_s14  ;;  %s3472_s0 = sld [smem:[#allocation10_spill]] (!%p507_p3) }
  0x13   : > { %s3474_s3 = sld [smem:[#allocation12_spill]] (!%p507_p3)  ;;  %s3475_s5 = sld [smem:[#allocation14_spill]] (!%p507_p3) }
  0x14   : > { %s3476_s4 = sld [smem:[#allocation13_spill]] (!%p507_p3)  ;;  %s3478_s9 = sld [smem:[#allocation16_spill]] (!%p507_p3) }
  0x18   : > { %s3500_s26 = smov (!%p598_p5, %s2976_s26), 1 }
  0x19   : > { %s3100_s15 = scalar_select %p602_p6, %s2972_s25, 1 }
  0x1a   : > { %s2461_s16 = sshll.u32 %s3500_s26, 3 }
  0x1b   : > { %s601_s19 = scalar_lea.vmem %s3472_s0, %s2461_s16  ;;  %s2754_s30 = smul.u32 192, %s3100_s15 }
  0x1c   : > { %s2755_s28 = smul.u32 3, %s3100_s15  ;;  %s2585_s27 = sshll.u32 %s3100_s15, 6 }
  0x1d   : > { %s3119_s13 = scalar_lea.vmem %s3474_s3, %s2754_s30  ;;  %s3124_s18 = scalar_lea.vmem %s3475_s5, %s2585_s27 }
  0x1e   : > { %s3129_s23 = scalar_lea.vmem %s3476_s4, %s2755_s28  ;;  %s2586_s17 = sshll.u32 %s3100_s15, 8 }
  0x1f   : > { %s2467_s27 = sshll.u32 %s3100_s15, 2  ;;  %s3148_s20 = scalar_lea.vmem %s3478_s9, %s2586_s17 }
  0x20   : > { %s3153_s14 = scalar_lea.vmem %s3450_s10, %s2467_s27  ;;  %s3158_s0 = scalar_lea.vmem %s3451_s11, %s2586_s17 }
  0x21   : > { %s647_s30 = scalar_lea.vmem %s3452_s12, %s3100_s15  ;;  %s2470_s3 = sshll.u32 %s3100_s15, 1 }
  0x22   : > { %s653_s25 = sadd.s32 %s2470_s3, %s3500_s26  ;;  %s3479_s9 = sld [smem:[#allocation17_spill]] }
  0x23   : > { %s2471_s4 = sshll.u32 %s653_s25, 3  ;;  %s3480_s28 = sld [smem:[#allocation4_spill]] }
  0x28   : > { %s3168_s8 = scalar_lea.vmem %s3479_s9, %s2471_s4 }
  0x29   : > { %p2472_p7 = scmp.ne.s32.totalorder %s3480_s28, 0 }
  0x2a   : > { %v661_v0 = vld [vmem:[%s601_s19] sm:$0xff] (!%p2472_p7) }
  0x2b   : > { %660 = sbr.rel (%p2472_p7) target bundleno = 50 (0x32), region = 76  ;;  %662 = vst [vmem:[#allocation2] sm:$0xff] (!%p2472_p7), %v661_v0 }
  0x32 PF: > { %v3171_v1 = vld [vmem:[#allocation2] sm:$0xff]  ;;  %v2990_v4 = vmov 0.0   ;;  %v2805_v5 = vld [vmem:[%s3119_s13 + $0x8] ss:$12 sps:$4 sm:$0xff]   ;;  %v2812_v14 = vld [vmem:[%s3119_s13 + $0x30] ss:$12 sps:$4 sm:$0xff]   ;;  %s3481_s9 = scalar_lea.vmem %s3441_s1, %s3100_s15  ;;  %v727_v42 = vlaneseq  ;;  %s3484_s21 = scalar_lea.vmem %s3446_s6, %s3100_s15 }
  0x33   : > { %666 = vadd.xlane.f32.xlu0 %v3171_v1  ;;  %v2802_v2 = vld [vmem:[%s3119_s13 + $0x4] ss:$12 sps:$4 sm:$0xff]   ;;  %v2804_v3 = vld [vmem:[%s3119_s13] ss:$12 sps:$4 sm:$0xff]   ;;  %2666 = vmatprep.subr.bf16.mxu1 %v2990_v4  ;;  %v2806_v6 = vld [vmem:[%s3119_s13 + $0x1c] ss:$12 sps:$4 sm:$0xff]   ;;  %s3485_s29 = scalar_lea.vmem %s3447_s7, %s3100_s15 }
  0x34   : > { %v2808_v7 = vld [vmem:[%s3119_s13 + $0x18] ss:$12 sps:$4 sm:$0xff]   ;;  %870 = vmatprep.subr.bf16.mxu0 %v2802_v2  ;;  %v2809_v8 = vld [vmem:[%s3119_s13 + $0x20] ss:$12 sps:$4 sm:$0xff]   ;;  %2667 = vmatpush3.bf16.msra.mxu1 %v2805_v5  ;;  %v2816_v17 = vld [vmem:[%s3119_s13 + $0x48] ss:$12 sps:$4 sm:$0xff]  }
  0x35   : > { %v2810_v9 = vld [vmem:[%s3119_s13 + $0x34] ss:$12 sps:$4 sm:$0xff]   ;;  %871 = vmatpush1.bf16.msra.mxu0 %v2804_v3  ;;  %2668 = vmatprep.subr.bf16.mxu1 %v2990_v4  ;;  %v2813_v15 = vld [vmem:[%s3119_s13 + $0x38] ss:$12 sps:$4 sm:$0xff]   ;;  %v2817_v18 = vld [vmem:[%s3119_s13 + $0x50] ss:$12 sps:$4 sm:$0xff]  }
  0x36   : > { %872 = vmatprep.subr.bf16.mxu0 %v2806_v6  ;;  %v2814_v16 = vld [vmem:[%s3119_s13 + $0x4c] ss:$12 sps:$4 sm:$0xff]   ;;  %v2818_v19 = vld [vmem:[%s3119_s13 + $0x64] ss:$12 sps:$4 sm:$0xff]   ;;  %v2821_v21 = vld [vmem:[%s3119_s13 + $0x68] ss:$12 sps:$4 sm:$0xff]  }
  0x37   : > { %v2820_v20 = vld [vmem:[%s3119_s13 + $0x60] ss:$12 sps:$4 sm:$0xff]   ;;  %v2822_v22 = vld [vmem:[%s3119_s13 + $0x7c] ss:$12 sps:$4 sm:$0xff]   ;;  %v2824_v23 = vld [vmem:[%s3119_s13 + $0x78] ss:$12 sps:$4 sm:$0xff]  }
  0x38   : > { %2669 = vmatpush3.bf16.msra.mxu1 %v2809_v8  ;;  %v2825_v24 = vld [vmem:[%s3119_s13 + $0x80] ss:$12 sps:$4 sm:$0xff]   ;;  %v2991_v26 = vmov 0   ;;  %vm2992_vm0 = vmmov 0   ;;  %v2828_v27 = vld [vmem:[%s3119_s13 + $0x90] ss:$12 sps:$4 sm:$0xff]  }
  0x39   : > { %873 = vmatpush1.bf16.msra.mxu0 %v2808_v7  ;;  %2670 = vmatprep.subr.bf16.mxu1 %v2990_v4  ;;  %v2826_v25 = vld [vmem:[%s3119_s13 + $0x94] ss:$12 sps:$4 sm:$0xff]   ;;  %v2829_v28 = vld [vmem:[%s3119_s13 + $0x98] ss:$12 sps:$4 sm:$0xff]   ;;  %v2833_v31 = vld [vmem:[%s3119_s13 + $0xb0] ss:$12 sps:$4 sm:$0xff]  }
  0x3a   : > { %874 = vmatprep.subr.bf16.mxu0 %v2810_v9  ;;  %902 = vmatprep.mubr.bf16.mxu0 %v2991_v26  ;;  %v2830_v29 = vld [vmem:[%s3119_s13 + $0xac] ss:$12 sps:$4 sm:$0xff]   ;;  %v2832_v30 = vld [vmem:[%s3119_s13 + $0xa8] ss:$12 sps:$4 sm:$0xff]   ;;  %v2473_v36 = vld [vmem:[%s3481_s9] ss:$0 sm:$0xff] }
  0x3b   : > { %2682 = vmatprep.mubr.msk.bf16.mxu1 %vm2992_vm0, %v2990_v4  ;;  %s3482_s19 = sld [smem:[#allocation11_spill]]  ;;  %v3226_v43 = vshrl.u32 %v727_v42, 7  ;;  %v725_v45 = vld [vmem:[%s3129_s23] sm:$0x7]  ;;  %vm957_vm1 = vcmask 261120   ;;  %s2993_s23 = smov 96  }
  0x3c   : > { %2671 = vmatpush3.bf16.msra.mxu1 %v2813_v15  ;;  %s2994_s25 = smov 32   ;;  %vm1023_vm2 = vcmask 1043456   ;;  %v952_v5 = vand.u32 127, %v727_v42  ;;  %vm1006_vm4 = vcmask 64512   ;;  %s2995_s17 = smov 64   ;;  %vm1187_vm5 = vcmask 523520  }
  0x3d   : > { %875 = vmatpush1.bf16.msra.mxu0 %v2812_v14  ;;  %2672 = vmatprep.subr.bf16.mxu1 %v2990_v4  ;;  %v733_v44 = vsub.s32 1, %v3226_v43  ;;  %v737_v46 = vsub.s32 2, %v3226_v43  ;;  %v729_v48 = vsub.s32 0, %v3226_v43  ;;  %vm1305_vm6 = vcmask 785920   ;;  %s3486_s16 = sld [smem:[#allocation15_spill]] }
  0x3e   : > { %876 = vmatprep.subr.bf16.mxu0 %v2814_v16  ;;  %vm953_vm3 = vcmp.ge.s32.totalorder %v952_v5, 5  ;;  %vm1423_vm7 = vcmask 1048320  }
  0x3f   : > { %v734_v47 = vrot.slane %v725_v45, %v733_v44  ;;  %v738_v53 = vrot.slane %v725_v45, %v737_v46  ;;  %v730_v59 = vrot.slane %v725_v45, %v729_v48  ;;  %v3251_v7 = vsel %vm953_vm3, -1e+30, %v2990_v4 }
  0x40   : > { %2673 = vmatpush3.bf16.msra.mxu1 %v2817_v18 }
  0x41   : > { %877 = vmatpush1.bf16.msra.mxu0 %v2816_v17  ;;  %2674 = vmatprep.subr.bf16.mxu1 %v2990_v4  ;;  %s3483_s22 = scalar_lea.vmem %s3482_s19, %s3100_s15 }
  0x42   : > { %878 = vmatprep.subr.bf16.mxu0 %v2818_v19  ;;  %v2474_v38 = vld [vmem:[%s3483_s22] ss:$0 sm:$0xff] }
  0x43   : > { %s3487_s28 = scalar_lea.vmem %s3486_s16, %s3100_s15 }
  0x44   : > { %2675 = vmatpush3.bf16.msra.mxu1 %v2821_v21 }
  0x45   : > { %879 = vmatpush1.bf16.msra.mxu0 %v2820_v20  ;;  %2676 = vmatprep.subr.bf16.mxu1 %v2990_v4 }
  0x46   : > { %880 = vmatprep.subr.bf16.mxu0 %v2822_v22 }
  0x48   : > { %2677 = vmatpush3.bf16.msra.mxu1 %v2825_v24 }
  0x49   : > { %881 = vmatpush1.bf16.msra.mxu0 %v2824_v23  ;;  %2678 = vmatprep.subr.bf16.mxu1 %v2990_v4 }
  0x4a   : > { %882 = vmatprep.subr.bf16.mxu0 %v2826_v25 }
  0x4c   : > { %2679 = vmatpush3.bf16.msra.mxu1 %v2829_v28 }
  0x4d   : > { %883 = vmatpush1.bf16.msra.mxu0 %v2828_v27  ;;  %2680 = vmatprep.subr.bf16.mxu1 %v2990_v4 }
  0x4e   : > { %884 = vmatprep.subr.bf16.mxu0 %v2830_v29 }
  0x50   : > { %2681 = vmatpush3.bf16.msra.mxu1 %v2833_v31 }
  0x51   : > { %885 = vmatpush1.bf16.msra.mxu0 %v2832_v30  ;;  %2686 = vmatprep.subr.bf16.mxu1 %v2990_v4 }
  0x52   : > { %2710 = vmatprep.subr.bf16.mxu0 %v2990_v4 }
  0xc0   : > { %v667_v10 = vpop.xlane.xlu0 %666 }
  0xc1   : > { %v669_v11 = vmul.f32 0.0078125, %v667_v10 }
  0xc3   : > { %v670_v12 = vsub.f32 %v3171_v1, %v669_v11 }
  0xc5   : > { %v671_v13 = vmul.f32 %v670_v12, %v670_v12 }
  0xc7   : > { %672 = vadd.xlane.f32.xlu0 %v671_v13 }
 0x154   : > { %v673_v32 = vpop.xlane.xlu0 %672 }
 0x155   : > { %v674_v33 = vmul.f32 0.0078125, %v673_v32 }
 0x157   : > { %v675_v34 = vadd.f32 1e-06, %v674_v33 }
 0x159   : > { %2922 = vrsqrt.f32 %v675_v34 }
 0x163   : > { %v2923_v35 = vpop.eup %2922 }
 0x164   : > { %v677_v37 = vmul.f32 %v2923_v35, %v670_v12 }
 0x166   : > { %v684_v39 = vmul.f32 %v2473_v36, %v677_v37 }
 0x168   : > { %v691_v40 = vadd.f32 %v2474_v38, %v684_v39 }
 0x16a   : > { %v692_v41 = vpack.c.bf16 %v691_v40, %v691_v40 }
 0x16c   : > { %903 = vmatmul.mubr.bf16.vlgmr.msra.gmra.mrb[0].mxu0 %v692_v41  ;;  %2683 = vmatmul.mubr.bf16.vlgmr.msra.gmra.mrb[0].mxu1 %v692_v41 }
 0x16d   : > { %2688 = vmatprep.mubr.msk.bf16.mxu1 %vm2992_vm0, %v2990_v4  ;;  %2712 = vmatprep.mubr.msk.bf16.mxu0 %vm2992_vm0, %v2990_v4 }
 0x23f   : > { %v904_v49 = vpop.f32.mrb[0].mxu0  ;;  %v945_v50 = vpop.f32.mrb[0].mxu1 }
 0x240   : > { %v906_v51 = vpop.f32.mrb[1].mxu0  ;;  %v2684_v52 = vpop.f32.mrb[1].mxu1  ;;  %v946_v61 = vadd.f32 %v945_v50, %v738_v53  ;;  %v905_v63 = vadd.f32 %v904_v49, %v730_v59 }
 0x241   : > { %v907_v54 = vadd.f32 %v906_v51, %v734_v47  ;;  %v908_v55 = vpop.f32.mrb[2].mxu0  ;;  %v948_v56 = vpop.f32.mrb[2].mxu1 }
 0x242   : > { %v909_v57 = vpop.f32.mrb[3].mxu0  ;;  %v2685_v58 = vpop.f32.mrb[3].mxu1  ;;  %v3241_v0 = vpack.c.bf16 %v946_v61, %v946_v61  ;;  %v955_v2 = vpack.c.bf16 %v905_v63, %v905_v63 }
 0x243   : > { %v956_v60 = vpack.c.bf16 %v907_v54, %v907_v54 }
 0x244   : > { %v1025_v3 = vsel %vm1023_vm2, %v3241_v0, 0 }
 0x245   : > { %1072 = vrot.lane.b32.xlu0 %v956_v60, %s2993_s23  ;;  %v962_v62 = vsel %vm957_vm1, %v956_v60, 0 }
 0x246   : > { %2687 = vmatpush3.bf16.xpose.msra.mxu1 %v962_v62 }
 0x247   : > { %2692 = vmatprep.subr.bf16.mxu1 %v2990_v4 }
 0x249   : > { %1309 = vrot.lane.b32.xlu0 %v956_v60, %s2994_s25 }
 0x24d   : > { %2689 = vmatmul.mubr.msk.bf16.vlgmr.msra.gmra.mrb[4].mxu1 %vm957_vm1, %v955_v2 }
 0x24e   : > { %2693 = vmatpush3.bf16.msra.mxu1 %v1025_v3  ;;  %2694 = vmatprep.mubr.msk.bf16.mxu1 %vm2992_vm0, %v2990_v4 }
 0x24f   : > { %2698 = vmatprep.subr.bf16.mxu1 %v2990_v4 }
 0x2b7   : > { %v1073_v21 = vpop.permute.xlu0 %1072 }
 0x2b8   : > { %v1078_v29 = vsel %vm957_vm1, %v1073_v21, 0 }
 0x2bb   : > { %v1310_v27 = vpop.permute.xlu0 %1309 }
 0x2bc   : > { %v1315_v31 = vsel %vm957_vm1, %v1310_v27, 0 }
 0x320   : > { %v998_v6 = vpop.f32.mrb[4].mxu1 }
 0x321   : > { %v1004_v8 = vmul.f32 0.17677669, %v998_v6  ;;  %v2690_v9 = vpop.f32.mrb[5].mxu1 }
 0x322   : > { %v1001_v10 = vpop.f32.mrb[6].mxu1 }
 0x323   : > { %v2691_v11 = vpop.f32.mrb[7].mxu1  ;;  %v1005_v12 = vadd.f32 %v1004_v8, %v3251_v7 }
 0x325   : > { %v1007_v13 = vsel %vm1006_vm4, %v1005_v12, -inf }
 0x326   : > { %1008 = vmax.xlane.f32.xlu1 %v1007_v13 }
 0x3b3   : > { %v1009_v14 = vpop.xlane.xlu1 %1008 }
 0x3b4   : > { %v1010_v15 = vsub.f32 %v1005_v12, %v1009_v14 }
 0x3b6   : > { %v1011_v16 = vmul.f32 1.442695, %v1010_v15 }
 0x3b8   : > { %2924 = vpow2.f32 %v1011_v16 }
 0x3c2   : > { %v2925_v17 = vpop.eup %2924 }
 0x3c3   : > { %v1013_v18 = vsel %vm1006_vm4, %v2925_v17, 0.0 }
 0x3c4   : > { %1014 = vadd.xlane.f32.xlu1 %v1013_v18 }
 0x3d5   : > { %1069 = vrot.lane.b32.xlu1 %v955_v2, %s2993_s23 }
 0x3d9   : > { %1191 = vrot.lane.b32.xlu1 %v956_v60, %s2995_s17 }
 0x3dd   : > { %1189 = vrot.lane.b32.xlu1 %v955_v2, %s2995_s17 }
 0x3e1   : > { %1307 = vrot.lane.b32.xlu1 %v955_v2, %s2994_s25 }
 0x451   : > { %v1015_v19 = vpop.xlane.xlu1 %1014 }
 0x452   : > { %2926 = vrcp.f32 %v1015_v19 }
 0x455   : > { %v1070_v20 = vpop.permute.xlu1 %1069 }
 0x459   : > { %v1192_v22 = vpop.permute.xlu1 %1191 }
 0x45a   : > { %v1197_v23 = vsel %vm957_vm1, %v1192_v22, 0 }
 0x45b   : > { %2711 = vmatpush3.bf16.xpose.msra.mxu0 %v1197_v23 }
 0x45c   : > { %v2927_v24 = vpop.eup %2926  ;;  %2722 = vmatprep.subr.bf16.mxu0 %v2990_v4 }
 0x45d   : > { %v1017_v25 = vmul.f32 %v2927_v24, %v2925_v17  ;;  %v1190_v30 = vpop.permute.xlu1 %1189 }
 0x45f   : > { %v1018_v28 = vpack.c.bf16 %v1017_v25, %v1017_v25 }
 0x461   : > { %2695 = vmatmul.mubr.msk.bf16.vlgmr.msra.gmra.mrb[8].mxu1 %vm1006_vm4, %v1018_v28  ;;  %v1308_v32 = vpop.permute.xlu1 %1307 }
 0x462   : > { %2699 = vmatpush3.bf16.xpose.msra.mxu1 %v1078_v29  ;;  %2713 = vmatmul.mubr.msk.bf16.vlgmr.msra.gmra.mrb[4].mxu0 %vm957_vm1, %v1190_v30 }
 0x463   : > { %2723 = vmatpush3.bf16.xpose.msra.mxu0 %v1315_v31  ;;  %2700 = vmatprep.mubr.msk.bf16.mxu1 %vm2992_vm0, %v2990_v4 }
 0x464   : > { %2724 = vmatprep.mubr.msk.bf16.mxu0 %vm2992_vm0, %v2990_v4  ;;  %2704 = vmatprep.subr.bf16.mxu1 %v2990_v4 }
 0x465   : > { %2734 = vmatprep.subr.bf16.mxu0 %v2990_v4 }
 0x469   : > { %2701 = vmatmul.mubr.msk.bf16.vlgmr.msra.gmra.mrb[12].mxu1 %vm957_vm1, %v1070_v20 }
 0x46a   : > { %2725 = vmatmul.mubr.msk.bf16.vlgmr.msra.gmra.mrb[8].mxu0 %vm957_vm1, %v1308_v32  ;;  %2706 = vmatprep.mubr.msk.bf16.mxu1 %vm2992_vm0, %v2990_v4 }
 0x46b   : > { %2750 = vmatprep.mubr.msk.bf16.mxu0 %vm2992_vm0, %v2990_v4 }
 0x534   : > { %v1061_v33 = vpop.f32.mrb[8].mxu1 }
 0x535   : > { %1067 = vst.msk [vmem:[#allocation3] sm:$0xff] %vm957_vm1, %v1061_v33  ;;  %v2696_v34 = vpop.f32.mrb[9].mxu1  ;;  %v1233_v35 = vpop.f32.mrb[4].mxu0 }
 0x536   : > { %v1239_v36 = vmul.f32 0.17677669, %v1233_v35  ;;  %v1064_v37 = vpop.f32.mrb[10].mxu1  ;;  %v2714_v38 = vpop.f32.mrb[5].mxu0  ;;  %v2834_v34 = vld [vmem:[%s3124_s18] sm:$0xff]   ;;  %v2835_v35 = vld [vmem:[%s3124_s18 + $0x8] sm:$0xff]  }
 0x537   : > { %v2697_v39 = vpop.f32.mrb[11].mxu1  ;;  %v1236_v40 = vpop.f32.mrb[6].mxu0  ;;  %2735 = vmatpush3.bf16.msra.mxu0 %v2834_v34  ;;  %v2837_v37 = vld [vmem:[%s3124_s18 + $0x18] sm:$0xff]   ;;  %v2838_v38 = vld [vmem:[%s3124_s18 + $0x20] sm:$0xff]  }
 0x538   : > { %v2715_v41 = vpop.f32.mrb[7].mxu0  ;;  %v1240_v42 = vadd.f32 %v1239_v36, %v3251_v7  ;;  %2736 = vmatprep.subr.bf16.mxu0 %v2990_v4  ;;  %v2836_v36 = vld [vmem:[%s3124_s18 + $0x10] sm:$0xff]   ;;  %v2839_v39 = vld [vmem:[%s3124_s18 + $0x28] sm:$0xff]  }
 0x539   : > { %v2880_v34 = vld [vmem:[%s3148_s20 + $0xc4] ss:$16 sps:$4 sm:$0xff]  }
 0x53a   : > { %v1241_v45 = vsel %vm1006_vm4, %v1240_v42, -inf }
 0x53b   : > { %1242 = vmax.xlane.f32.xlu1 %v1241_v45  ;;  %2737 = vmatpush3.bf16.msra.mxu0 %v2835_v35  ;;  %v2883_v35 = vld [vmem:[%s3148_s20 + $0xcc] ss:$16 sps:$4 sm:$0xff]  }
 0x53c   : > { %v1114_v47 = vpop.f32.mrb[12].mxu1  ;;  %2738 = vmatprep.subr.bf16.mxu0 %v2990_v4 }
 0x53d   : > { %v1120_v49 = vmul.f32 0.17677669, %v1114_v47  ;;  %v2702_v50 = vpop.f32.mrb[13].mxu1  ;;  %v1351_v51 = vpop.f32.mrb[8].mxu0  ;;  %v2840_v47 = vld [vmem:[%s3124_s18 + $0x30] sm:$0xff]  }
 0x53e   : > { %v1357_v52 = vmul.f32 0.17677669, %v1351_v51  ;;  %v1117_v53 = vpop.f32.mrb[14].mxu1  ;;  %v2726_v54 = vpop.f32.mrb[9].mxu0 }
 0x53f   : > { %v2703_v55 = vpop.f32.mrb[15].mxu1  ;;  %v1354_v56 = vpop.f32.mrb[10].mxu0  ;;  %v1121_v57 = vadd.f32 %v1120_v49, %v3251_v7  ;;  %2739 = vmatpush3.bf16.msra.mxu0 %v2836_v36  ;;  %v2841_v49 = vld [vmem:[%s3124_s18 + $0x38] sm:$0xff]   ;;  %v2878_v36 = vld [vmem:[%s3148_s20 + $0xc0] ss:$16 sps:$4 sm:$0xff]  }
 0x540   : > { %v2727_v58 = vpop.f32.mrb[11].mxu0  ;;  %v1358_v60 = vadd.f32 %v1357_v52, %v3251_v7  ;;  %2740 = vmatprep.subr.bf16.mxu0 %v2990_v4 }
 0x541   : > { %v1122_v59 = vsel %vm1006_vm4, %v1121_v57, -inf }
 0x542   : > { %1123 = vmax.xlane.f32.xlu0 %v1122_v59  ;;  %v1359_v61 = vsel %vm1006_vm4, %v1358_v60, -inf }
 0x543   : > { %2741 = vmatpush3.bf16.msra.mxu0 %v2837_v37  ;;  %v2881_v37 = vld [vmem:[%s3148_s20 + $0xc8] ss:$16 sps:$4 sm:$0xff]  }
 0x544   : > { %2742 = vmatprep.subr.bf16.mxu0 %v2990_v4 }
 0x546   : > { %1360 = vmax.xlane.f32.xlu0 %v1359_v61 }
 0x547   : > { %2743 = vmatpush3.bf16.msra.mxu0 %v2838_v38  ;;  %v2886_v38 = vld [vmem:[%s3148_s20 + $0xe4] ss:$16 sps:$4 sm:$0xff]  }
 0x548   : > { %2744 = vmatprep.subr.bf16.mxu0 %v2990_v4 }
 0x54b   : > { %2745 = vmatpush3.bf16.msra.mxu0 %v2839_v39  ;;  %v2889_v39 = vld [vmem:[%s3148_s20 + $0xec] ss:$16 sps:$4 sm:$0xff]  }
 0x54c   : > { %2746 = vmatprep.subr.bf16.mxu0 %v2990_v4 }
 0x54f   : > { %2747 = vmatpush3.bf16.msra.mxu0 %v2840_v47 }
 0x550   : > { %2748 = vmatprep.subr.bf16.mxu0 %v2990_v4 }
 0x553   : > { %2749 = vmatpush3.bf16.msra.mxu0 %v2841_v49 }
 0x5c8   : > { %v1243_v62 = vpop.xlane.xlu1 %1242 }
 0x5c9   : > { %v1244_v63 = vsub.f32 %v1240_v42, %v1243_v62 }
 0x5cb   : > { %v1245_v2 = vmul.f32 1.442695, %v1244_v63  ;;  %v2515_v63 = vld [vmem:[%s3484_s21] ss:$0 sm:$0xff] }
 0x5cd   : > { %2928 = vpow2.f32 %v1245_v2 }
 0x5cf   : > { %v1124_v3 = vpop.xlane.xlu0 %1123 }
 0x5d0   : > { %v1125_v5 = vsub.f32 %v1121_v57, %v1124_v3 }
 0x5d2   : > { %v1126_v6 = vmul.f32 1.442695, %v1125_v5 }
 0x5d3   : > { %v1361_v8 = vpop.xlane.xlu0 %1360 }
 0x5d4   : > { %2930 = vpow2.f32 %v1126_v6  ;;  %v1362_v9 = vsub.f32 %v1358_v60, %v1361_v8 }
 0x5d6   : > { %v1363_v10 = vmul.f32 1.442695, %v1362_v9  ;;  %v2844_v9 = vld [vmem:[%s3148_s20 + $0x4] ss:$16 sps:$4 sm:$0xff]  }
 0x5d7   : > { %v2929_v11 = vpop.eup %2928 }
 0x5d8   : > { %2932 = vpow2.f32 %v1363_v10  ;;  %v1247_v12 = vsel %vm1006_vm4, %v2929_v11, 0.0  ;;  %v2845_v10 = vld [vmem:[%s3148_s20 + $0x8] ss:$16 sps:$4 sm:$0xff]  }
 0x5d9   : > { %1248 = vadd.xlane.f32.xlu0 %v1247_v12  ;;  %v2850_v12 = vld [vmem:[%s3148_s20 + $0x24] ss:$16 sps:$4 sm:$0xff]  }
 0x5de   : > { %v2931_v7 = vpop.eup %2930 }
 0x5df   : > { %v1128_v13 = vsel %vm1006_vm4, %v2931_v7, 0.0 }
 0x5e0   : > { %1129 = vadd.xlane.f32.xlu0 %v1128_v13  ;;  %v2851_v13 = vld [vmem:[%s3148_s20 + $0x28] ss:$16 sps:$4 sm:$0xff]  }
 0x5e2   : > { %v2933_v14 = vpop.eup %2932 }
 0x5e3   : > { %v1365_v15 = vsel %vm1006_vm4, %v2933_v14, 0.0 }
 0x5e4   : > { %1366 = vadd.xlane.f32.xlu1 %v1365_v15  ;;  %v2859_v15 = vld [vmem:[%s3148_s20 + $0x4c] ss:$16 sps:$4 sm:$0xff]  }
 0x5f5   : > { %1253 = vrot.lane.b32.xlu1 %v3241_v0, %s2995_s17 }
 0x5f6   : > { %1135 = vrot.lane.b32.xlu0 %v3241_v0, %s2993_s23 }
 0x5f9   : > { %1371 = vrot.lane.b32.xlu1 %v3241_v0, %s2994_s25 }
 0x666   : > { %v1249_v16 = vpop.xlane.xlu0 %1248 }
 0x66d   : > { %v1130_v17 = vpop.xlane.xlu0 %1129 }
 0x66e   : > { %2934 = vrcp.f32 %v1130_v17  ;;  %v2857_v17 = vld [vmem:[%s3148_s20 + $0x48] ss:$16 sps:$4 sm:$0xff]  }
 0x66f   : > { %2936 = vrcp.f32 %v1249_v16  ;;  %v2854_v16 = vld [vmem:[%s3148_s20 + $0x40] ss:$16 sps:$4 sm:$0xff]  }
 0x671   : > { %v1136_v18 = vpop.permute.xlu0 %1135  ;;  %v1367_v20 = vpop.xlane.xlu1 %1366 }
 0x672   : > { %v1141_v19 = vsel %vm1023_vm2, %v1136_v18, 0  ;;  %2938 = vrcp.f32 %v1367_v20 }
 0x673   : > { %2705 = vmatpush3.bf16.msra.mxu1 %v1141_v19 }
 0x674   : > { %2716 = vmatprep.subr.bf16.mxu1 %v2990_v4 }
 0x675   : > { %v1254_v23 = vpop.permute.xlu1 %1253 }
 0x676   : > { %v1259_v27 = vsel %vm1023_vm2, %v1254_v23, 0  ;;  %v2865_v23 = vld [vmem:[%s3148_s20 + $0x6c] ss:$16 sps:$4 sm:$0xff]  }
 0x678   : > { %v2935_v21 = vpop.eup %2934 }
 0x679   : > { %v1132_v22 = vmul.f32 %v2935_v21, %v2931_v7  ;;  %v2937_v25 = vpop.eup %2936  ;;  %v1372_v28 = vpop.permute.xlu1 %1371  ;;  %v2853_v7 = vld [vmem:[%s3148_s20 + $0x2c] ss:$16 sps:$4 sm:$0xff]  }
 0x67a   : > { %v1251_v0 = vmul.f32 %v2937_v25, %v2929_v11  ;;  %v1377_v31 = vsel %vm1023_vm2, %v1372_v28, 0  ;;  %v2847_v11 = vld [vmem:[%s3148_s20 + $0xc] ss:$16 sps:$4 sm:$0xff]   ;;  %v2863_v25 = vld [vmem:[%s3148_s20 + $0x68] ss:$16 sps:$4 sm:$0xff]  }
 0x67b   : > { %v1133_v24 = vpack.c.bf16 %v1132_v22, %v1132_v22  ;;  %1823 = vmatprep.subr.bf16.mxu0 %v2847_v11  ;;  %v2862_v22 = vld [vmem:[%s3148_s20 + $0x64] ss:$16 sps:$4 sm:$0xff]   ;;  %v2866_v28 = vld [vmem:[%s3148_s20 + $0x80] ss:$16 sps:$4 sm:$0xff]  }
 0x67c   : > { %v1252_v29 = vpack.c.bf16 %v1251_v0, %v1251_v0  ;;  %v2939_v30 = vpop.eup %2938  ;;  %v2871_v0 = vld [vmem:[%s3148_s20 + $0x8c] ss:$16 sps:$4 sm:$0xff]   ;;  %v2906_v11 = vld [vmem:[%s3158_s0 + $0x60] sm:$0xff]  }
 0x67d   : > { %2707 = vmatmul.mubr.msk.bf16.vlgmr.msra.gmra.mrb[16].mxu1 %vm1006_vm4, %v1133_v24  ;;  %v1369_v32 = vmul.f32 %v2939_v30, %v2933_v14  ;;  %v2856_v14 = vld [vmem:[%s3148_s20 + $0x44] ss:$16 sps:$4 sm:$0xff]   ;;  %v2860_v24 = vld [vmem:[%s3148_s20 + $0x60] ss:$16 sps:$4 sm:$0xff]  }
 0x67e   : > { %2717 = vmatpush3.bf16.msra.mxu1 %v1259_v27  ;;  %2718 = vmatprep.mubr.msk.bf16.mxu1 %vm2992_vm0, %v2990_v4  ;;  %v2868_v27 = vld [vmem:[%s3148_s20 + $0x84] ss:$16 sps:$4 sm:$0xff]  }
 0x67f   : > { %2728 = vmatprep.subr.bf16.mxu1 %v2990_v4  ;;  %v1370_v33 = vpack.c.bf16 %v1369_v32, %v1369_v32  ;;  %v2874_v30 = vld [vmem:[%s3148_s20 + $0xa4] ss:$16 sps:$4 sm:$0xff]   ;;  %v2872_v32 = vld [vmem:[%s3148_s20 + $0xa0] ss:$16 sps:$4 sm:$0xff]  }
 0x685   : > { %2719 = vmatmul.mubr.msk.bf16.vlgmr.msra.gmra.mrb[20].mxu1 %vm1006_vm4, %v1252_v29  ;;  %v2869_v29 = vld [vmem:[%s3148_s20 + $0x88] ss:$16 sps:$4 sm:$0xff]  }
 0x686   : > { %2729 = vmatpush3.bf16.msra.mxu1 %v1377_v31  ;;  %2730 = vmatprep.mubr.msk.bf16.mxu1 %vm2992_vm0, %v2990_v4  ;;  %v2877_v31 = vld [vmem:[%s3148_s20 + $0xac] ss:$16 sps:$4 sm:$0xff]  }
 0x687   : > { %1782 = vmatprep.subr.bf16.mxu1 %v2844_v9  ;;  %v2904_v9 = vld [vmem:[%s3158_s0 + $0x18] sm:$0xff]  }
 0x68d   : > { %2731 = vmatmul.mubr.msk.bf16.vlgmr.msra.gmra.mrb[24].mxu1 %vm1006_vm4, %v1370_v33  ;;  %v2875_v33 = vld [vmem:[%s3148_s20 + $0xa8] ss:$16 sps:$4 sm:$0xff]  }
 0x68e   : > { %1814 = vmatprep.mubr.bf16.mxu1 %v2991_v26 }
 0x750   : > { %v1177_v40 = vpop.f32.mrb[16].mxu1 }
 0x751   : > { %1184 = vrot.lane.b32.xlu1 %v1177_v40, %s2994_s25  ;;  %v2708_v41 = vpop.f32.mrb[17].mxu1  ;;  %v2884_v40 = vld [vmem:[%s3148_s20 + $0xe0] ss:$16 sps:$4 sm:$0xff]  }
 0x752   : > { %v1180_v42 = vpop.f32.mrb[18].mxu1  ;;  %v2887_v41 = vld [vmem:[%s3148_s20 + $0xe8] ss:$16 sps:$4 sm:$0xff]  }
 0x753   : > { %v2709_v45 = vpop.f32.mrb[19].mxu1 }
 0x758   : > { %v1295_v50 = vpop.f32.mrb[20].mxu1 }
 0x759   : > { %1302 = vrot.lane.b32.xlu0 %v1295_v50, %s2995_s17  ;;  %v2720_v51 = vpop.f32.mrb[21].mxu1  ;;  %v2516_v50 = vld [vmem:[%s3485_s29] ss:$0 sm:$0xff] }
 0x75a   : > { %v1298_v52 = vpop.f32.mrb[22].mxu1 }
 0x75b   : > { %v2721_v53 = vpop.f32.mrb[23].mxu1  ;;  %v2517_v52 = vld [vmem:[%s3487_s28] ss:$0 sm:$0xff] }
 0x760   : > { %v1413_v54 = vpop.f32.mrb[24].mxu1 }
 0x761   : > { %1420 = vrot.lane.b32.xlu1 %v1413_v54, %s2993_s23  ;;  %v2732_v55 = vpop.f32.mrb[25].mxu1 }
 0x762   : > { %v1416_v56 = vpop.f32.mrb[26].mxu1 }
 0x763   : > { %v2733_v57 = vpop.f32.mrb[27].mxu1  ;;  %v2890_v56 = vld [vmem:[%s3158_s0 + $0x40] sm:$0xff]  }
 0x764   : > { %v2891_v57 = vld [vmem:[%s3158_s0 + $0xc0] sm:$0xff]  }
 0x7c3   : > { %v1185_v58 = vpop.permute.xlu1 %1184 }
 0x7c4   : > { %1188 = vst.msk [vmem:[#allocation3] sm:$0xff] %vm1187_vm5, %v1185_v58  ;;  %v2892_v58 = vld [vmem:[%s3158_s0] sm:$0xff]  }
 0x7cb   : > { %v1303_v59 = vpop.permute.xlu0 %1302 }
 0x7cc   : > { %1306 = vst.msk [vmem:[#allocation3] sm:$0xff] %vm1305_vm6, %v1303_v59  ;;  %v2893_v59 = vld [vmem:[%s3158_s0 + $0x80] sm:$0xff]  }
 0x7d3   : > { %v1421_v4 = vpop.permute.xlu1 %1420 }
 0x7d4   : > { %1424 = vst.msk [vmem:[#allocation3] sm:$0xff] %vm1423_vm7, %v1421_v4  ;;  %v2894_v4 = vld [vmem:[%s3158_s0 + $0x48] sm:$0xff]  }
 0x7db   : > { %v1425_v60 = vld [vmem:[#allocation3] sm:$0xff] }
 0x7dc   : > { %v1426_v61 = vpack.c.bf16 %v1425_v60, %v1425_v60  ;;  %v2895_v60 = vld [vmem:[%s3158_s0 + $0xc8] sm:$0xff]  }
 0x7de   : > { %2751 = vmatmul.mubr.bf16.vlgmr.msra.gmra.mrb[12].mxu0 %v1426_v61  ;;  %v2896_v61 = vld [vmem:[%s3158_s0 + $0x8] sm:$0xff]  }
 0x7df   : > { %1855 = vmatprep.mubr.bf16.mxu0 %v2991_v26  ;;  %v2842_v26 = vld [vmem:[%s3148_s20] ss:$16 sps:$4 sm:$0xff]   ;;  %1824 = vmatpush1.bf16.msra.mxu0 %v2845_v10  ;;  %v2905_v10 = vld [vmem:[%s3158_s0 + $0x98] sm:$0xff]  }
 0x7e0   : > { %1783 = vmatpush1.bf16.msra.mxu1 %v2842_v26  ;;  %1825 = vmatprep.subr.bf16.mxu0 %v2853_v7  ;;  %v2903_v26 = vld [vmem:[%s3158_s0 + $0xd8] sm:$0xff]   ;;  %v2908_v7 = vld [vmem:[%s3158_s0 + $0x20] sm:$0xff]  }
 0x7e1   : > { %1784 = vmatprep.subr.bf16.mxu1 %v2850_v12  ;;  %v2907_v12 = vld [vmem:[%s3158_s0 + $0xe0] sm:$0xff]  }
 0x7e3   : > { %1826 = vmatpush1.bf16.msra.mxu0 %v2851_v13  ;;  %v2910_v13 = vld [vmem:[%s3158_s0 + $0x68] sm:$0xff]  }
 0x7e4   : > { %1827 = vmatprep.subr.bf16.mxu0 %v2859_v15  ;;  %v2912_v15 = vld [vmem:[%s3158_s0 + $0x28] sm:$0xff]  }
 0x7e7   : > { %1828 = vmatpush1.bf16.msra.mxu0 %v2857_v17  ;;  %v2914_v17 = vld [vmem:[%s3158_s0 + $0x70] sm:$0xff]  }
 0x7e8   : > { %1829 = vmatprep.subr.bf16.mxu0 %v2865_v23  ;;  %v2920_v23 = vld [vmem:[%s3158_s0 + $0x38] sm:$0xff]  }
 0x7eb   : > { %1830 = vmatpush1.bf16.msra.mxu0 %v2863_v25  ;;  %v1600_v25 = vld [vmem:[%s3153_s14] sm:$0xf] }
 0x7ec   : > { %1831 = vmatprep.subr.bf16.mxu0 %v2871_v0  ;;  %v1605_v0 = vrot.slane %v1600_v25, %v729_v48 }
 0x7ef   : > { %1832 = vmatpush1.bf16.msra.mxu0 %v2869_v29  ;;  %v1609_v29 = vrot.slane %v1600_v25, %v733_v44 }
 0x7f0   : > { %1833 = vmatprep.subr.bf16.mxu0 %v2877_v31 }
 0x7f3   : > { %1834 = vmatpush1.bf16.msra.mxu0 %v2875_v33 }
 0x7f4   : > { %1835 = vmatprep.subr.bf16.mxu0 %v2883_v35 }
 0x7f7   : > { %1836 = vmatpush1.bf16.msra.mxu0 %v2881_v37 }
 0x7f8   : > { %1837 = vmatprep.subr.bf16.mxu0 %v2889_v39 }
 0x7fb   : > { %1838 = vmatpush1.bf16.msra.mxu0 %v2887_v41 }
 0x7fc   : > { %2644 = vmatprep.subr.bf16.mxu0 %v2891_v57 }
 0x8b1   : > { %v1525_v62 = vpop.f32.mrb[12].mxu0 }
 0x8b2   : > { %v1531_v2 = vadd.f32 %v1525_v62, %v3171_v1  ;;  %v2752_v3 = vpop.f32.mrb[13].mxu0  ;;  %v2848_v1 = vld [vmem:[%s3148_s20 + $0x20] ss:$16 sps:$4 sm:$0xff]   ;;  %v2897_v62 = vld [vmem:[%s3158_s0 + $0x88] sm:$0xff]  }
 0x8b3   : > { %v1528_v5 = vpop.f32.mrb[14].mxu0  ;;  %1785 = vmatpush1.bf16.msra.mxu1 %v2848_v1  ;;  %v2900_v3 = vld [vmem:[%s3158_s0 + $0x10] sm:$0xff]   ;;  %v2909_v1 = vld [vmem:[%s3158_s0 + $0xa0] sm:$0xff]  }
 0x8b4   : > { %v3332_v6 = vadd.f32 %v2515_v63, %v1531_v2  ;;  %v2753_v8 = vpop.f32.mrb[15].mxu0  ;;  %1786 = vmatprep.subr.bf16.mxu1 %v2856_v14  ;;  %v2898_v63 = vld [vmem:[%s3158_s0 + $0x50] sm:$0xff]   ;;  %v2911_v14 = vld [vmem:[%s3158_s0 + $0xe8] sm:$0xff]  }
 0x8b5   : > { %v2899_v2 = vld [vmem:[%s3158_s0 + $0xd0] sm:$0xff]   ;;  %v2902_v8 = vld [vmem:[%s3158_s0 + $0x58] sm:$0xff]  }
 0x8b6   : > { %1542 = vadd.xlane.f32.xlu0 %v3332_v6  ;;  %v2901_v5 = vld [vmem:[%s3158_s0 + $0x90] sm:$0xff]  }
 0x8b7   : > { %1787 = vmatpush1.bf16.msra.mxu1 %v2854_v16  ;;  %v2913_v16 = vld [vmem:[%s3158_s0 + $0xa8] sm:$0xff]  }
 0x8b8   : > { %1788 = vmatprep.subr.bf16.mxu1 %v2862_v22  ;;  %v2919_v22 = vld [vmem:[%s3158_s0 + $0xf8] sm:$0xff]  }
 0x8bb   : > { %1789 = vmatpush1.bf16.msra.mxu1 %v2860_v24  ;;  %v2921_v24 = vld [vmem:[%s3158_s0 + $0xb8] sm:$0xff]  }
 0x8bc   : > { %1790 = vmatprep.subr.bf16.mxu1 %v2868_v27  ;;  %v1616_v27 = vsub.s32 3, %v3226_v43 }
 0x8bf   : > { %1791 = vmatpush1.bf16.msra.mxu1 %v2866_v28  ;;  %v1613_v28 = vrot.slane %v1600_v25, %v737_v46 }
 0x8c0   : > { %1792 = vmatprep.subr.bf16.mxu1 %v2874_v30  ;;  %v1617_v30 = vrot.slane %v1600_v25, %v1616_v27 }
 0x8c3   : > { %1793 = vmatpush1.bf16.msra.mxu1 %v2872_v32 }
 0x8c4   : > { %1794 = vmatprep.subr.bf16.mxu1 %v2880_v34 }
 0x8c7   : > { %1795 = vmatpush1.bf16.msra.mxu1 %v2878_v36 }
 0x8c8   : > { %1796 = vmatprep.subr.bf16.mxu1 %v2886_v38 }
 0x8cb   : > { %1797 = vmatpush1.bf16.msra.mxu1 %v2884_v40 }
 0x8cc   : > { %2622 = vmatprep.subr.bf16.mxu1 %v2890_v56 }
 0x943   : > { %v1543_v18 = vpop.xlane.xlu0 %1542 }
 0x944   : > { %v1544_v19 = vmul.f32 0.0078125, %v1543_v18  ;;  %v2915_v18 = vld [vmem:[%s3158_s0 + $0xf0] sm:$0xff]  }
 0x946   : > { %v1545_v20 = vsub.f32 %v3332_v6, %v1544_v19  ;;  %v2916_v19 = vld [vmem:[%s3158_s0 + $0x30] sm:$0xff]  }
 0x948   : > { %v1546_v21 = vmul.f32 %v1545_v20, %v1545_v20 }
 0x94a   : > { %1547 = vadd.xlane.f32.xlu1 %v1546_v21  ;;  %v2918_v21 = vld [vmem:[%s3158_s0 + $0x78] sm:$0xff]  }
 0x9d7   : > { %v1548_v42 = vpop.xlane.xlu1 %1547 }
 0x9d8   : > { %v1549_v45 = vmul.f32 0.0078125, %v1548_v42 }
 0x9da   : > { %v1550_v47 = vadd.f32 1e-06, %v1549_v45 }
 0x9dc   : > { %2940 = vrsqrt.f32 %v1550_v47 }
 0x9e6   : > { %v2941_v49 = vpop.eup %2940 }
 0x9e7   : > { %v1552_v51 = vmul.f32 %v2941_v49, %v1545_v20  ;;  %v2917_v20 = vld [vmem:[%s3158_s0 + $0xb0] sm:$0xff]  }
 0x9e9   : > { %v1559_v53 = vmul.f32 %v2516_v50, %v1552_v51 }
 0x9eb   : > { %v1566_v54 = vadd.f32 %v2517_v52, %v1559_v53 }
 0x9ed   : > { %v1567_v55 = vpack.c.bf16 %v1566_v54, %v1566_v54 }
 0x9ef   : > { %1815 = vmatmul.mubr.bf16.vlgmr.msra.gmra.mrb[28].mxu1 %v1567_v55  ;;  %1856 = vmatmul.mubr.bf16.vlgmr.msra.gmra.mrb[16].mxu0 %v1567_v55 }
 0x9f0   : > { %2623 = vmatpush3.bf16.msra.mxu1 %v2892_v58  ;;  %2645 = vmatpush3.bf16.msra.mxu0 %v2893_v59 }
 0x9f1   : > { %2624 = vmatprep.subr.bf16.mxu1 %v2894_v4  ;;  %2646 = vmatprep.subr.bf16.mxu0 %v2895_v60 }
 0x9f4   : > { %2625 = vmatpush3.bf16.msra.mxu1 %v2896_v61  ;;  %2647 = vmatpush3.bf16.msra.mxu0 %v2897_v62 }
 0x9f5   : > { %2626 = vmatprep.subr.bf16.mxu1 %v2898_v63  ;;  %2648 = vmatprep.subr.bf16.mxu0 %v2899_v2 }
 0x9f8   : > { %2627 = vmatpush3.bf16.msra.mxu1 %v2900_v3  ;;  %2649 = vmatpush3.bf16.msra.mxu0 %v2901_v5 }
 0x9f9   : > { %2628 = vmatprep.subr.bf16.mxu1 %v2902_v8  ;;  %2650 = vmatprep.subr.bf16.mxu0 %v2903_v26 }
 0x9fc   : > { %2629 = vmatpush3.bf16.msra.mxu1 %v2904_v9  ;;  %2651 = vmatpush3.bf16.msra.mxu0 %v2905_v10 }
 0x9fd   : > { %2630 = vmatprep.subr.bf16.mxu1 %v2906_v11  ;;  %2652 = vmatprep.subr.bf16.mxu0 %v2907_v12 }
 0xa00   : > { %2631 = vmatpush3.bf16.msra.mxu1 %v2908_v7  ;;  %2653 = vmatpush3.bf16.msra.mxu0 %v2909_v1 }
 0xa01   : > { %2632 = vmatprep.subr.bf16.mxu1 %v2910_v13  ;;  %2654 = vmatprep.subr.bf16.mxu0 %v2911_v14 }
 0xa04   : > { %2633 = vmatpush3.bf16.msra.mxu1 %v2912_v15  ;;  %2655 = vmatpush3.bf16.msra.mxu0 %v2913_v16 }
 0xa05   : > { %2634 = vmatprep.subr.bf16.mxu1 %v2914_v17  ;;  %2656 = vmatprep.subr.bf16.mxu0 %v2915_v18 }
 0xa08   : > { %2635 = vmatpush3.bf16.msra.mxu1 %v2916_v19  ;;  %2657 = vmatpush3.bf16.msra.mxu0 %v2917_v20 }
 0xa09   : > { %2636 = vmatprep.subr.bf16.mxu1 %v2918_v21  ;;  %2658 = vmatprep.subr.bf16.mxu0 %v2919_v22  ;;  %v2550_v22 = vld [vmem:[%s647_s30] ss:$0 sm:$0xff] }
 0xa0c   : > { %2637 = vmatpush3.bf16.msra.mxu1 %v2920_v23  ;;  %2659 = vmatpush3.bf16.msra.mxu0 %v2921_v24 }
 0xac2   : > { %v1816_v31 = vpop.f32.mrb[28].mxu1  ;;  %v1857_v32 = vpop.f32.mrb[16].mxu0 }
 0xac3   : > { %v1817_v33 = vadd.f32 %v1816_v31, %v1605_v0  ;;  %v1858_v34 = vadd.f32 %v1857_v32, %v1613_v28  ;;  %v1818_v35 = vpop.f32.mrb[29].mxu1  ;;  %v1859_v36 = vpop.f32.mrb[17].mxu0 }
 0xac4   : > { %v1819_v37 = vadd.f32 %v1818_v35, %v1609_v29  ;;  %v1860_v38 = vadd.f32 %v1859_v36, %v1617_v30  ;;  %v1820_v39 = vpop.f32.mrb[30].mxu1  ;;  %v1861_v40 = vpop.f32.mrb[18].mxu0 }
 0xac5   : > { %v1864_v41 = vmul.f32 %v1817_v33, %v1817_v33  ;;  %v1866_v42 = vmul.f32 %v1858_v34, %v1858_v34  ;;  %v1821_v48 = vpop.f32.mrb[31].mxu1  ;;  %v1862_v45 = vpop.f32.mrb[19].mxu0 }
 0xac6   : > { %v1865_v47 = vmul.f32 %v1819_v37, %v1819_v37  ;;  %v1867_v46 = vmul.f32 %v1860_v38, %v1860_v38 }
 0xac7   : > { %v1868_v49 = vmul.f32 %v1864_v41, %v1817_v33  ;;  %v1870_v43 = vmul.f32 %v1866_v42, %v1858_v34 }
 0xac8   : > { %v1869_v44 = vmul.f32 %v1865_v47, %v1819_v37  ;;  %v1871_v50 = vmul.f32 %v1867_v46, %v1860_v38 }
 0xac9   : > { %v1872_v51 = vmul.f32 0.044715, %v1868_v49  ;;  %v1874_v52 = vmul.f32 0.044715, %v1870_v43 }
 0xaca   : > { %v1873_v53 = vmul.f32 0.044715, %v1869_v44  ;;  %v1875_v54 = vmul.f32 0.044715, %v1871_v50 }
 0xacb   : > { %v1876_v55 = vadd.f32 %v1872_v51, %v1817_v33  ;;  %v1878_v56 = vadd.f32 %v1874_v52, %v1858_v34 }
 0xacc   : > { %v1877_v57 = vadd.f32 %v1873_v53, %v1819_v37  ;;  %v1879_v58 = vadd.f32 %v1875_v54, %v1860_v38 }
 0xacd   : > { %v1880_v59 = vmul.f32 0.7978846, %v1876_v55  ;;  %v1882_v4 = vmul.f32 0.7978846, %v1878_v56 }
 0xace   : > { %v1881_v60 = vmul.f32 0.7978846, %v1877_v57  ;;  %v1883_v61 = vmul.f32 0.7978846, %v1879_v58 }
 0xacf   : > { %2942 = vtanh.f32 %v1880_v59 }
 0xad0   : > { %2944 = vtanh.f32 %v1882_v4 }
 0xad1   : > { %2946 = vtanh.f32 %v1881_v60 }
 0xad2   : > { %2948 = vtanh.f32 %v1883_v61 }
 0xad9   : > { %v2943_v62 = vpop.eup %2942 }
 0xada   : > { %v2945_v63 = vpop.eup %2944  ;;  %v1888_v2 = vadd.f32 1.0, %v2943_v62 }
 0xadb   : > { %v2947_v3 = vpop.eup %2946  ;;  %v1890_v5 = vadd.f32 1.0, %v2945_v63 }
 0xadc   : > { %v2949_v8 = vpop.eup %2948  ;;  %v1889_v26 = vadd.f32 1.0, %v2947_v3  ;;  %v1892_v9 = vmul.f32 0.5, %v1888_v2 }
 0xadd   : > { %v1891_v10 = vadd.f32 1.0, %v2949_v8  ;;  %v1894_v11 = vmul.f32 0.5, %v1890_v5 }
 0xade   : > { %v1893_v12 = vmul.f32 0.5, %v1889_v26  ;;  %v1896_v1 = vmul.f32 %v1892_v9, %v1817_v33 }
 0xadf   : > { %v1895_v7 = vmul.f32 0.5, %v1891_v10  ;;  %v1898_v14 = vmul.f32 %v1894_v11, %v1858_v34 }
 0xae0   : > { %v1897_v13 = vmul.f32 %v1893_v12, %v1819_v37  ;;  %v1900_v18 = vpack.c.bf16 %v1896_v1, %v1896_v1 }
 0xae1   : > { %v1899_v15 = vmul.f32 %v1895_v7, %v1860_v38  ;;  %v1902_v19 = vpack.c.bf16 %v1898_v14, %v1898_v14 }
 0xae2   : > { %v1901_v16 = vpack.c.bf16 %v1897_v13, %v1897_v13 }
 0xae3   : > { %v1903_v17 = vpack.c.bf16 %v1899_v15, %v1899_v15 }
 0xae4   : > { %2199 = vmatprep.mubr.bf16.mxu1 %v1901_v16 }
 0xae5   : > { %2239 = vmatprep.mubr.bf16.mxu0 %v1903_v17  ;;  %2200 = vmatmul.mubr.bf16.vlgmr.msra.gmra.mrb[32].mxu1 %v1900_v18 }
 0xae6   : > { %2240 = vmatmul.mubr.bf16.vlgmr.msra.gmra.mrb[20].mxu0 %v1902_v19 }
 0xbb8   : > { %v2638_v20 = vpop.f32.mrb[32].mxu1 }
 0xbb9   : > { %v2660_v21 = vpop.f32.mrb[20].mxu0  ;;  %v2639_v23 = vpop.f32.mrb[33].mxu1 }
 0xbba   : > { %v2640_v24 = vadd.f32 %v2639_v23, %v2638_v20  ;;  %v2661_v25 = vpop.f32.mrb[21].mxu0  ;;  %v2641_v27 = vpop.f32.mrb[34].mxu1 }
 0xbbb   : > { %v2662_v0 = vadd.f32 %v2661_v25, %v2660_v21  ;;  %v2663_v28 = vpop.f32.mrb[22].mxu0  ;;  %v2642_v29 = vpop.f32.mrb[35].mxu1 }
 0xbbc   : > { %v2202_v30 = vadd.f32 %v2640_v24, %v2550_v22  ;;  %v2664_v31 = vpop.f32.mrb[23].mxu0 }
 0xbbe   : > { %v2242_v32 = vadd.f32 %v2662_v0, %v2202_v30 }
 0xbc0   : > { %v2247_v33 = vadd.f32 %v2242_v32, %v3332_v6 }
 0xbc2   : > { %2248 = vst [vmem:[#allocation2] sm:$0xff] %v2247_v33  ;;  %2249 = vst [vmem:[%s3168_s8] sm:$0xff] %v2247_v33 }
 0xbc3 PF: > { %s3488_s3 = sld [smem:[#allocation7_spill]]  ;;  %s3489_s25 = sld [smem:[#allocation5_spill]] }
 0xbc4   : > { %s3490_s26 = sld [smem:[#allocation6_spill]]  ;;  %s3491_s27 = sld [smem:[#allocation8_spill]] }
 0xbc5   : > { %s3492_s28 = sld [smem:[#allocation9_spill]] }
 0xbc9   : > { %s23_s29 = sadd.s32 1, %s3488_s3  }
 0xbca   : > { %p20_p8 = scmp.ge.s32.totalorder %s23_s29, 6  }
 0xbcc   :  { %22 = sbr.rel (!%p20_p8) target bundleno = 9 (0x9), region = 142 }

</bundles_post_ra>
